<compile_context>
chip_gen: v7x
topology: tpu7x:2x2x1
jax: 0.10.0
libtpu: 0.0.40
codegen_flags: <defaults>
</compile_context>

<pallas_src>
import functools

import jax
import jax.numpy as jnp
import numpy as np
from jax.experimental import pallas as pl
from jax.experimental.pallas import tpu as pltpu

# ---------------- problem sizes (small, consistent with the module) ---------
B = 2              # batch
T = 8              # encoder sequence length
H = 256            # hidden_units (default)
ENC = 3 * H        # 768 = BERT encoder width (so attn_combine is Linear(4H, H))
E = 32             # embed_dim
V = 64             # vocab_size
NG = 4 * H         # LSTM gate width (i|f|g|o)
VPAD = 128         # lane-padded vocab width for the fc output
XIN = ENC + H      # fused gate-matmul input width [context | h] = 1024
SPW = 2 * H + NG + VPAD          # packed small-params width = 1664
_OFF_BAC = 0                     # attn_combine bias        (H)
_OFF_WSC = H                     # score_layer weight       (H)
_OFF_BG = 2 * H                  # fused LSTM gate bias     (NG)
_OFF_BFC = 2 * H + NG            # fc bias (zero padded)    (VPAD)


def _decoder_step_kernel(
    # inputs (weights have constant index maps -> VMEM-resident across steps)
    h0_ref,       # (B, H)      f32   initial hidden state (layer 0)
    c0_ref,       # (B, H)      f32   initial cell state
    enc2d_ref,    # (B*T, ENC)  bf16  encoder outputs (2-D view)
    embg_ref,     # (1, B, NG)  f32   per-step folded emb @ W_ih_emb^T block
    w_ac_e_ref,   # (ENC, H)    bf16  attn_combine cols acting on encoder_out
    w_ac_h_ref,   # (H, H)      bf16  attn_combine cols acting on decoder_hidden
    w_gates_ref,  # (XIN, NG)   bf16  fused [W_ih_ctx ; W_hh]
    w_fc_ref,     # (H, VPAD)   bf16  fc weight, zero-padded to 128 lanes
    sp_ref,       # (1, SPW)    f32   packed [b_ac | w_score | b_gates | b_fc]
    # outputs
    logits_ref,   # (1, B, VPAD) f32  per-step padded logits block
    h_out_ref,    # (B, H)       f32  final hidden state
    c_out_ref,    # (B, H)       f32  final cell state
    attn_ref,     # (1, B, T)    f32  per-step attention weights block
    # scratch (persists across grid steps)
    eproj_sc,     # (B*T, H)    f32   step-invariant encoder attention projection
    x_sc,         # (B, XIN)    bf16  fused LSTM input [context | h]
    h_sc,         # (B, H)      f32   hidden-state carry
    c_sc,         # (B, H)      f32   cell-state carry
):
    f32 = jnp.float32
    bf16 = jnp.bfloat16
    s = pl.program_id(0)

    @pl.when(s == 0)
    def _init():
        h_sc[...] = h0_ref[...]
        c_sc[...] = c0_ref[...]
        # encoder part of the attention MLP does not depend on the step:
        eproj_sc[...] = jnp.dot(enc2d_ref[...], w_ac_e_ref[...],
                                preferred_element_type=f32)          # (B*T, H)

    h_prev = h_sc[...]
    c_prev = c_sc[...]

    # packed small params (static 128-aligned lane slices)
    b_ac = sp_ref[:, _OFF_BAC:_OFF_BAC + H]            # (1, H)
    w_score = sp_ref[:, _OFF_WSC:_OFF_WSC + H]         # (1, H)
    b_g = sp_ref[:, _OFF_BG:_OFF_BG + NG]              # (1, NG)
    b_fc = sp_ref[:, _OFF_BFC:_OFF_BFC + VPAD]         # (1, VPAD)

    # ---------------- attention (AttentionNetworkBERT) ----------------------
    h_proj = jnp.dot(h_prev.astype(bf16), w_ac_h_ref[...],
                     preferred_element_type=f32)                     # (B, H)
    energy = jnp.tanh(eproj_sc[...].reshape(B, T, H)
                      + h_proj[:, None, :] + b_ac[None])             # (B, T, H)
    scores = jnp.sum(energy * w_score[None], axis=-1)                # (B, T)
    m = jnp.max(scores, axis=1, keepdims=True)
    ex = jnp.exp(scores - m)
    attn = ex / jnp.sum(ex, axis=1, keepdims=True)                   # (B, T)
    attn_ref[0] = attn

    enc3 = enc2d_ref[...].reshape(B, T, ENC).astype(f32)             # free view + cast
    context = jnp.sum(attn[:, :, None] * enc3, axis=1)               # (B, ENC)

    # ---------------- LSTM cell (one step, num_layers=1, batch_first) -------
    # fused gate matmul with K = ENC + H = 1024 (emb term pre-folded into embg).
    x_sc[:, 0:ENC] = context.astype(bf16)
    x_sc[:, ENC:XIN] = h_prev.astype(bf16)
    gates = (jnp.dot(x_sc[...], w_gates_ref[...], preferred_element_type=f32)
             + b_g + embg_ref[0])                                    # (B, NG)
    i_g = jax.nn.sigmoid(gates[:, 0 * H:1 * H])
    f_g = jax.nn.sigmoid(gates[:, 1 * H:2 * H])
    g_g = jnp.tanh(gates[:, 2 * H:3 * H])
    o_g = jax.nn.sigmoid(gates[:, 3 * H:4 * H])
    c_new = f_g * c_prev + i_g * g_g
    h_new = o_g * jnp.tanh(c_new)
    h_sc[...] = h_new
    c_sc[...] = c_new
    h_out_ref[...] = h_new
    c_out_ref[...] = c_new

    # ---------------- final projection (fc), 128-lane padded ----------------
    logits_ref[0] = (jnp.dot(h_new.astype(bf16), w_fc_ref[...],
                             preferred_element_type=f32) + b_fc)


def prepare_decoder_params(params):
    """ONE-TIME conversion of PyTorch-layout params to kernel layout."""
    f32 = jnp.float32
    bf16 = jnp.bfloat16

    # attention: torch Linear(4H, H) weight is (H, 4H) = (out, in),
    # input order [decoder_hidden (H) ; encoder_outputs (ENC)]
    w_ac = params["attn_combine_w"]
    w_ac_h = jnp.transpose(w_ac[:, :H]).astype(bf16)            # (H, H)
    w_ac_e = jnp.transpose(w_ac[:, H:]).astype(bf16)            # (ENC, H)
    b_ac = params["attn_combine_b"].reshape(H).astype(f32)
    w_score = params["score_w"].reshape(H).astype(f32)

    # LSTM: torch W_ih is (4H, E+ENC), input order [emb (E) ; context (ENC)]
    w_ih = params["lstm_w_ih"]
    w_ih_e_t = jnp.transpose(w_ih[:, :E]).astype(f32)           # (E, 4H), stays f32
    w_ih_c_t = jnp.transpose(w_ih[:, E:])                       # (ENC, 4H)
    w_hh_t = jnp.transpose(params["lstm_w_hh"])                 # (H, 4H)
    # fused weight matches kernel x order [context ; h], K = 1024
    w_gates = jnp.concatenate([w_ih_c_t, w_hh_t], axis=0).astype(bf16)   # (XIN, NG)
    b_g = (params["lstm_b_ih"] + params["lstm_b_hh"]).reshape(NG).astype(f32)

    # per-token folded gate contribution  emb_gate_table[v] = embedding[v] @ W_ih_emb^T
    emb_gate_table = (params["embedding"].astype(f32) @ w_ih_e_t)        # (V, NG)

    # fc, padded to a lane-dense 128-wide output
    w_fc_t = jnp.transpose(params["fc_w"])                      # (H, V)
    w_fc = jnp.zeros((H, VPAD), f32).at[:, :V].set(w_fc_t).astype(bf16)
    b_fc = jnp.zeros((VPAD,), f32).at[:V].set(params["fc_b"].reshape(V))

    # pack all tiny f32 side params into one array (one DMA descriptor)
    small = jnp.concatenate([b_ac, w_score, b_g, b_fc]).reshape(1, SPW).astype(f32)

    return {
        "emb_gate_table": emb_gate_table,
        "w_ac_h": w_ac_h, "w_ac_e": w_ac_e,
        "w_gates": w_gates, "w_fc": w_fc,
        "small": small,
    }


@jax.jit
def lstm_attn_decoder_bert_decode(tokens_seq, h_c, encoder_out, kparams):
    """Multi-step (teacher-forced) decode; each step == LSTMAttnDecoderBERT.forward.

    tokens_seq:  (S, B) int32 token ids (one per decode step)
    h_c:         ((1, B, H), (1, B, H))  initial (h0, c0)
    encoder_out: (B, T, ENC)
    returns:     (logits (S, B, V), (ht (1,B,H), ct (1,B,H)), attn (S, B, T))
    """
    S = tokens_seq.shape[0]
    h0, c0 = h_c

    # embedding gather + fold into gate bias (fuses in XLA; eval dropout = identity)
    embg_steps = kparams["emb_gate_table"][tokens_seq]        # (S, B, NG) f32
    enc2d = encoder_out.reshape(B * T, ENC).astype(jnp.bfloat16)

    grid_spec = pltpu.PrefetchScalarGridSpec(
        num_scalar_prefetch=0,
        grid=(S,),
        in_specs=[
            pl.BlockSpec((B, H), lambda s: (0, 0)),           # h0
            pl.BlockSpec((B, H), lambda s: (0, 0)),           # c0
            pl.BlockSpec((B * T, ENC), lambda s: (0, 0)),     # encoder (bf16)
            pl.BlockSpec((1, B, NG), lambda s: (s, 0, 0)),    # per-step emb gate fold
            pl.BlockSpec((ENC, H), lambda s: (0, 0)),         # w_ac_e
            pl.BlockSpec((H, H), lambda s: (0, 0)),           # w_ac_h
            pl.BlockSpec((XIN, NG), lambda s: (0, 0)),        # w_gates
            pl.BlockSpec((H, VPAD), lambda s: (0, 0)),        # w_fc
            pl.BlockSpec((1, SPW), lambda s: (0, 0)),         # packed small params
        ],
        out_specs=(
            pl.BlockSpec((1, B, VPAD), lambda s: (s, 0, 0)),  # per-step logits
            pl.BlockSpec((B, H), lambda s: (0, 0)),           # final h
            pl.BlockSpec((B, H), lambda s: (0, 0)),           # final c
            pl.BlockSpec((1, B, T), lambda s: (s, 0, 0)),     # per-step attention
        ),
        scratch_shapes=[
            pltpu.VMEM((B * T, H), jnp.float32),              # enc attention projection
            pltpu.VMEM((B, XIN), jnp.bfloat16),               # fused LSTM input
            pltpu.VMEM((B, H), jnp.float32),                  # h carry
            pltpu.VMEM((B, H), jnp.float32),                  # c carry
        ],
    )
    out_shapes = (
        jax.ShapeDtypeStruct((S, B, VPAD), jnp.float32),
        jax.ShapeDtypeStruct((B, H), jnp.float32),
        jax.ShapeDtypeStruct((B, H), jnp.float32),
        jax.ShapeDtypeStruct((S, B, T), jnp.float32),
    )
    logits_p, h_new, c_new, attn = pl.pallas_call(
        _decoder_step_kernel,
        out_shape=out_shapes,
        grid_spec=grid_spec,
        compiler_params=pltpu.CompilerParams(
            dimension_semantics=("arbitrary",)),   # sequential h/c carry
    )(h0[0], c0[0], enc2d, embg_steps,
      kparams["w_ac_e"], kparams["w_ac_h"], kparams["w_gates"],
      kparams["w_fc"], kparams["small"])

    return logits_p[:, :, :V], (h_new[None], c_new[None]), attn


def lstm_attn_decoder_bert_forward(tokens, h_c, encoder_out, kparams):
    """Single-step forward with the original module's output shapes:
    output (B, 1, V), (ht (1,B,H), ct (1,B,H)), attn (B, 1, T)."""
    out_seq, (ht, ct), attn_seq = lstm_attn_decoder_bert_decode(
        tokens[None], h_c, encoder_out, kparams)
    return out_seq[0][:, None, :], (ht, ct), attn_seq[0][:, None, :]


# ---------------------------- test harness ----------------------------------
def _init_params(key):
    ks = jax.random.split(key, 10)
    scale = 0.05
    emb_tbl = scale * jax.random.normal(ks[0], (V, E), jnp.float32)
    emb_tbl = emb_tbl.at[0].set(0.0)                      # padding_idx=0
    return {
        "embedding": emb_tbl,
        "attn_combine_w": scale * jax.random.normal(ks[1], (H, 4 * H), jnp.float32),
        "attn_combine_b": scale * jax.random.normal(ks[2], (H,), jnp.float32),
        "score_w": scale * jax.random.normal(ks[3], (1, H), jnp.float32),
        "lstm_w_ih": scale * jax.random.normal(ks[4], (NG, ENC + E), jnp.float32),
        "lstm_w_hh": scale * jax.random.normal(ks[5], (NG, H), jnp.float32),
        "lstm_b_ih": scale * jax.random.normal(ks[6], (NG,), jnp.float32),
        "lstm_b_hh": scale * jax.random.normal(ks[7], (NG,), jnp.float32),
        "fc_w": scale * jax.random.normal(ks[8], (V, H), jnp.float32),
        "fc_b": scale * jax.random.normal(ks[9], (V,), jnp.float32),
    }


def _reference_decode(tokens_seq, h_c, encoder_out, params):
    """Pure-jnp f32 loop mirroring LSTMAttnDecoderBERT.forward per step."""
    h, c = h_c[0][0], h_c[1][0]
    logits_steps, attn_steps = [], []
    for s in range(tokens_seq.shape[0]):
        emb = params["embedding"][tokens_seq[s]]                         # (B, E)
        dec_h = jnp.broadcast_to(h[:, None, :], (B, T, H))
        combined = jnp.concatenate([dec_h, encoder_out], axis=2)        # (B, T, 4H)
        energy = jnp.tanh(combined @ params["attn_combine_w"].T
                          + params["attn_combine_b"])
        scores = (energy @ params["score_w"].T)[..., 0]                  # (B, T)
        attn = jax.nn.softmax(scores, axis=1)                            # (B, T)
        context = jnp.einsum("bt,bte->be", attn, encoder_out)            # (B, ENC)
        xin = jnp.concatenate([emb, context], axis=1)                    # (B, E+ENC)
        gates = (xin @ params["lstm_w_ih"].T + params["lstm_b_ih"]
                 + h @ params["lstm_w_hh"].T + params["lstm_b_hh"])
        i_g = jax.nn.sigmoid(gates[:, 0 * H:1 * H])
        f_g = jax.nn.sigmoid(gates[:, 1 * H:2 * H])
        g_g = jnp.tanh(gates[:, 2 * H:3 * H])
        o_g = jax.nn.sigmoid(gates[:, 3 * H:4 * H])
        c = f_g * c + i_g * g_g
        h = o_g * jnp.tanh(c)
        logits_steps.append(h @ params["fc_w"].T + params["fc_b"])
        attn_steps.append(attn)
    return jnp.stack(logits_steps), (h[None], c[None]), jnp.stack(attn_steps)


if __name__ == "__main__":
    key = jax.random.PRNGKey(0)
    kp, kx, kh, kc, ke = jax.random.split(key, 5)

    params = _init_params(kp)
    kparams = prepare_decoder_params(params)      # one-time weight prep (hoisted)

    num_steps = 8
    tokens_seq = jax.random.randint(kx, (num_steps, B), 0, V, dtype=jnp.int32)
    h0 = 0.1 * jax.random.normal(kh, (1, B, H), jnp.float32)
    c0 = 0.1 * jax.random.normal(kc, (1, B, H), jnp.float32)
    encoder_out = 0.1 * jax.random.normal(ke, (B, T, ENC), jnp.float32)

    # -------- multi-step decode (weights VMEM-resident across all steps) ----
    out_seq, (ht, ct), attn_seq = lstm_attn_decoder_bert_decode(
        tokens_seq, (h0, c0), encoder_out, kparams)
    jax.block_until_ready((out_seq, ht, ct, attn_seq))

    ref_out, (ref_ht, ref_ct), ref_attn = _reference_decode(
        tokens_seq, (h0, c0), encoder_out, params)
    assert out_seq.shape == (num_steps, B, V)
    assert ht.shape == (1, B, H) and ct.shape == (1, B, H)
    assert attn_seq.shape == (num_steps, B, T)
    # bf16 weights + 8-step recurrence -> slightly loose tolerance
    np.testing.assert_allclose(np.asarray(out_seq), np.asarray(ref_out),
                               atol=2e-2, rtol=2e-2)
    np.testing.assert_allclose(np.asarray(ht), np.asarray(ref_ht), atol=2e-2, rtol=2e-2)
    np.testing.assert_allclose(np.asarray(ct), np.asarray(ref_ct), atol=2e-2, rtol=2e-2)
    np.testing.assert_allclose(np.asarray(attn_seq), np.asarray(ref_attn),
                               atol=2e-2, rtol=2e-2)

    # -------- single-step call with the original module's signature ---------
    out1, (ht1, ct1), attn1 = lstm_attn_decoder_bert_forward(
        tokens_seq[0], (h0, c0), encoder_out, kparams)
    jax.block_until_ready((out1, ht1, ct1, attn1))
    ref1_out, _, ref1_attn = _reference_decode(
        tokens_seq[:1], (h0, c0), encoder_out, params)
    assert out1.shape == (B, 1, V) and attn1.shape == (B, 1, T)
    np.testing.assert_allclose(np.asarray(out1[:, 0]), np.asarray(ref1_out[0]),
                               atol=2e-2, rtol=2e-2)
    np.testing.assert_allclose(np.asarray(attn1[:, 0]), np.asarray(ref1_attn[0]),
                               atol=2e-2, rtol=2e-2)

    print("KERNEL_OK")
</pallas_src>

<mosaic_0001>
module attributes {stable_mosaic.version = 11 : i64} {
  func.func @_decoder_step_kernel(%arg0: i32, %arg1: memref<2x256xf32, #tpu.memory_space<vmem>>, %arg2: memref<2x256xf32, #tpu.memory_space<vmem>>, %arg3: memref<16x768xbf16, #tpu.memory_space<vmem>>, %arg4: memref<1x2x1024xf32, #tpu.memory_space<vmem>>, %arg5: memref<768x256xbf16, #tpu.memory_space<vmem>>, %arg6: memref<256x256xbf16, #tpu.memory_space<vmem>>, %arg7: memref<1024x1024xbf16, #tpu.memory_space<vmem>>, %arg8: memref<256x128xbf16, #tpu.memory_space<vmem>>, %arg9: memref<1x1664xf32, #tpu.memory_space<vmem>>, %arg10: memref<1x2x128xf32, #tpu.memory_space<vmem>>, %arg11: memref<2x256xf32, #tpu.memory_space<vmem>>, %arg12: memref<2x256xf32, #tpu.memory_space<vmem>>, %arg13: memref<1x2x8xf32, #tpu.memory_space<vmem>>, %arg14: memref<16x256xf32, #tpu.memory_space<vmem>>, %arg15: memref<2x1024xbf16, #tpu.memory_space<vmem>>, %arg16: memref<2x256xf32, #tpu.memory_space<vmem>>, %arg17: memref<2x256xf32, #tpu.memory_space<vmem>>) attributes {dimension_semantics = [#tpu.dimension_semantics<arbitrary>], iteration_bounds = array<i64: 8>, scalar_prefetch = 0 : i64, scratch_operands = 4 : i64, tpu.core_type = #tpu.core_type<tc>, window_params = [{pipeline_mode = #tpu.pipeline_mode<synchronous>, transform_indices = @transform_0, window_bounds = array<i64: 2, 256>}, {pipeline_mode = #tpu.pipeline_mode<synchronous>, transform_indices = @transform_1, window_bounds = array<i64: 2, 256>}, {pipeline_mode = #tpu.pipeline_mode<synchronous>, transform_indices = @transform_2, window_bounds = array<i64: 16, 768>}, {transform_indices = @transform_3, window_bounds = array<i64: 1, 2, 1024>}, {pipeline_mode = #tpu.pipeline_mode<synchronous>, transform_indices = @transform_4, window_bounds = array<i64: 768, 256>}, {pipeline_mode = #tpu.pipeline_mode<synchronous>, transform_indices = @transform_5, window_bounds = array<i64: 256, 256>}, {pipeline_mode = #tpu.pipeline_mode<synchronous>, transform_indices = @transform_6, window_bounds = array<i64: 1024, 1024>}, {pipeline_mode = #tpu.pipeline_mode<synchronous>, transform_indices = @transform_7, window_bounds = array<i64: 256, 128>}, {pipeline_mode = #tpu.pipeline_mode<synchronous>, transform_indices = @transform_8, window_bounds = array<i64: 1, 1664>}, {transform_indices = @transform_9, window_bounds = array<i64: 1, 2, 128>}, {pipeline_mode = #tpu.pipeline_mode<synchronous>, transform_indices = @transform_10, window_bounds = array<i64: 2, 256>}, {pipeline_mode = #tpu.pipeline_mode<synchronous>, transform_indices = @transform_11, window_bounds = array<i64: 2, 256>}, {transform_indices = @transform_12, window_bounds = array<i64: 1, 2, 8>}]} {
    %c0_i32 = arith.constant 0 : i32
    %0 = arith.cmpi eq, %arg0, %c0_i32 : i32
    %1 = arith.extui %0 : i1 to i32
    %c0_i32_0 = arith.constant 0 : i32
    %2 = arith.cmpi ne, %1, %c0_i32_0 : i32
    scf.if %2 {
      %c0_50 = arith.constant 0 : index
      %c0_51 = arith.constant 0 : index
      %93 = vector.load %arg1[%c0_50, %c0_51] : memref<2x256xf32, #tpu.memory_space<vmem>>, vector<2x256xf32>
      %c0_52 = arith.constant 0 : index
      %c0_53 = arith.constant 0 : index
      %94 = vector.load %arg16[%c0_52, %c0_53] : memref<2x256xf32, #tpu.memory_space<vmem>>, vector<2x256xf32>
      tpu.vector_store %arg16[%c0_52, %c0_53], %93 {strides = array<i32>} : memref<2x256xf32, #tpu.memory_space<vmem>>, vector<2x256xf32>,
      %c0_54 = arith.constant 0 : index
      %c0_55 = arith.constant 0 : index
      %95 = vector.load %arg2[%c0_54, %c0_55] : memref<2x256xf32, #tpu.memory_space<vmem>>, vector<2x256xf32>
      %c0_56 = arith.constant 0 : index
      %c0_57 = arith.constant 0 : index
      %96 = vector.load %arg17[%c0_56, %c0_57] : memref<2x256xf32, #tpu.memory_space<vmem>>, vector<2x256xf32>
      tpu.vector_store %arg17[%c0_56, %c0_57], %95 {strides = array<i32>} : memref<2x256xf32, #tpu.memory_space<vmem>>, vector<2x256xf32>,
      %c0_58 = arith.constant 0 : index
      %c0_59 = arith.constant 0 : index
      %97 = vector.load %arg3[%c0_58, %c0_59] : memref<16x768xbf16, #tpu.memory_space<vmem>>, vector<16x768xbf16>
      %c0_60 = arith.constant 0 : index
      %c0_61 = arith.constant 0 : index
      %98 = vector.load %arg5[%c0_60, %c0_61] : memref<768x256xbf16, #tpu.memory_space<vmem>>, vector<768x256xbf16>
      %cst_62 = arith.constant dense<0.000000e+00> : vector<16x256xf32>
      %99 = tpu.matmul %97, %98, %cst_62 {dimension_numbers = #tpu.dot_dimension_numbers<[1], [0], [0], [1], [0, 0, 1, 1], [], []>} : vector<16x768xbf16>, vector<768x256xbf16>, vector<16x256xf32> -> vector<16x256xf32>
      %c0_63 = arith.constant 0 : index
      %c0_64 = arith.constant 0 : index
      %100 = vector.load %arg14[%c0_63, %c0_64] : memref<16x256xf32, #tpu.memory_space<vmem>>, vector<16x256xf32>
      tpu.vector_store %arg14[%c0_63, %c0_64], %99 {strides = array<i32>} : memref<16x256xf32, #tpu.memory_space<vmem>>, vector<16x256xf32>,
    } else {
    }
    %c0 = arith.constant 0 : index
    %c0_1 = arith.constant 0 : index
    %3 = vector.load %arg16[%c0, %c0_1] : memref<2x256xf32, #tpu.memory_space<vmem>>, vector<2x256xf32>
    %c0_2 = arith.constant 0 : index
    %c0_3 = arith.constant 0 : index
    %4 = vector.load %arg17[%c0_2, %c0_3] : memref<2x256xf32, #tpu.memory_space<vmem>>, vector<2x256xf32>
    %c0_4 = arith.constant 0 : index
    %c0_5 = arith.constant 0 : index
    %5 = vector.load %arg9[%c0_4, %c0_5] : memref<1x1664xf32, #tpu.memory_space<vmem>>, vector<1x256xf32>
    %c0_6 = arith.constant 0 : index
    %c256 = arith.constant 256 : index
    %6 = vector.load %arg9[%c0_6, %c256] : memref<1x1664xf32, #tpu.memory_space<vmem>>, vector<1x256xf32>
    %c0_7 = arith.constant 0 : index
    %c512 = arith.constant 512 : index
    %7 = vector.load %arg9[%c0_7, %c512] : memref<1x1664xf32, #tpu.memory_space<vmem>>, vector<1x1024xf32>
    %c0_8 = arith.constant 0 : index
    %c1536 = arith.constant 1536 : index
    %8 = vector.load %arg9[%c0_8, %c1536] : memref<1x1664xf32, #tpu.memory_space<vmem>>, vector<1x128xf32>
    %9 = arith.truncf %3 : vector<2x256xf32> to vector<2x256xbf16>
    %c0_9 = arith.constant 0 : index
    %c0_10 = arith.constant 0 : index
    %10 = vector.load %arg6[%c0_9, %c0_10] : memref<256x256xbf16, #tpu.memory_space<vmem>>, vector<256x256xbf16>
    %cst = arith.constant dense<0.000000e+00> : vector<2x256xf32>
    %11 = tpu.matmul %9, %10, %cst {dimension_numbers = #tpu.dot_dimension_numbers<[1], [0], [0], [1], [0, 0, 1, 1], [], []>} : vector<2x256xbf16>, vector<256x256xbf16>, vector<2x256xf32> -> vector<2x256xf32>
    %c0_11 = arith.constant 0 : index
    %c0_12 = arith.constant 0 : index
    %12 = vector.load %arg14[%c0_11, %c0_12] : memref<16x256xf32, #tpu.memory_space<vmem>>, vector<16x256xf32>
    %13 = vector.shape_cast %12 : vector<16x256xf32> to vector<2x8x256xf32>
    %14 = vector.shape_cast %11 : vector<2x256xf32> to vector<2x1x256xf32>
    %15 = vector.broadcast %14 : vector<2x1x256xf32> to vector<2x8x256xf32>
    %16 = arith.addf %13, %15 : vector<2x8x256xf32>
    %17 = vector.shape_cast %5 : vector<1x256xf32> to vector<1x1x256xf32>
    %18 = vector.broadcast %17 : vector<1x1x256xf32> to vector<2x8x256xf32>
    %19 = arith.addf %16, %18 : vector<2x8x256xf32>
    %20 = math.tanh %19 : vector<2x8x256xf32>
    %21 = vector.shape_cast %6 : vector<1x256xf32> to vector<1x1x256xf32>
    %22 = vector.broadcast %21 : vector<1x1x256xf32> to vector<2x8x256xf32>
    %23 = arith.mulf %20, %22 : vector<2x8x256xf32>
    %cst_13 = arith.constant dense<0.000000e+00> : vector<2x8xf32>
    %24 = vector.multi_reduction <add>, %23, %cst_13 [2] : vector<2x8x256xf32> to vector<2x8xf32>
    %cst_14 = arith.constant dense<0xFF800000> : vector<2xf32>
    %25 = vector.multi_reduction <maximumf>, %24, %cst_14 [1] : vector<2x8xf32> to vector<2xf32>
    %26 = vector.shape_cast %25 : vector<2xf32> to vector<2x1xf32>
    %27 = vector.broadcast %26 : vector<2x1xf32> to vector<2x8xf32>
    %28 = arith.subf %24, %27 : vector<2x8xf32>
    %29 = math.exp %28 : vector<2x8xf32>
    %cst_15 = arith.constant dense<0.000000e+00> : vector<2xf32>
    %30 = vector.multi_reduction <add>, %29, %cst_15 [1] : vector<2x8xf32> to vector<2xf32>
    %31 = vector.shape_cast %30 : vector<2xf32> to vector<2x1xf32>
    %32 = vector.broadcast %31 : vector<2x1xf32> to vector<2x8xf32>
    %33 = arith.divf %29, %32 : vector<2x8xf32>
    %c0_16 = arith.constant 0 : index
    %c0_17 = arith.constant 0 : index
    %c0_18 = arith.constant 0 : index
    %34 = vector.load %arg13[%c0_16, %c0_17, %c0_18] : memref<1x2x8xf32, #tpu.memory_space<vmem>>, vector<1x2x8xf32>
    %35 = vector.shape_cast %34 : vector<1x2x8xf32> to vector<2x8xf32>
    %36 = vector.shape_cast %33 : vector<2x8xf32> to vector<1x2x8xf32>
    tpu.vector_store %arg13[%c0_16, %c0_17, %c0_18], %36 {strides = array<i32>} : memref<1x2x8xf32, #tpu.memory_space<vmem>>, vector<1x2x8xf32>,
    %c0_19 = arith.constant 0 : index
    %c0_20 = arith.constant 0 : index
    %37 = vector.load %arg3[%c0_19, %c0_20] : memref<16x768xbf16, #tpu.memory_space<vmem>>, vector<16x768xbf16>
    %38 = vector.shape_cast %37 : vector<16x768xbf16> to vector<2x8x768xbf16>
    %39 = arith.extf %38 : vector<2x8x768xbf16> to vector<2x8x768xf32>
    %40 = vector.shape_cast %33 : vector<2x8xf32> to vector<2x8x1xf32>
    %41 = vector.broadcast %40 : vector<2x8x1xf32> to vector<2x8x768xf32>
    %42 = arith.mulf %41, %39 : vector<2x8x768xf32>
    %cst_21 = arith.constant dense<0.000000e+00> : vector<2x768xf32>
    %43 = vector.multi_reduction <add>, %42, %cst_21 [1] : vector<2x8x768xf32> to vector<2x768xf32>
    %44 = arith.truncf %43 : vector<2x768xf32> to vector<2x768xbf16>
    %c0_22 = arith.constant 0 : index
    %c0_23 = arith.constant 0 : index
    %45 = vector.load %arg15[%c0_22, %c0_23] : memref<2x1024xbf16, #tpu.memory_space<vmem>>, vector<2x768xbf16>
    tpu.vector_store %arg15[%c0_22, %c0_23], %44 {strides = array<i32>} : memref<2x1024xbf16, #tpu.memory_space<vmem>>, vector<2x768xbf16>,
    %46 = arith.truncf %3 : vector<2x256xf32> to vector<2x256xbf16>
    %c0_24 = arith.constant 0 : index
    %c768 = arith.constant 768 : index
    %47 = vector.load %arg15[%c0_24, %c768] : memref<2x1024xbf16, #tpu.memory_space<vmem>>, vector<2x256xbf16>
    tpu.vector_store %arg15[%c0_24, %c768], %46 {strides = array<i32>} : memref<2x1024xbf16, #tpu.memory_space<vmem>>, vector<2x256xbf16>,
    %c0_25 = arith.constant 0 : index
    %c0_26 = arith.constant 0 : index
    %48 = vector.load %arg15[%c0_25, %c0_26] : memref<2x1024xbf16, #tpu.memory_space<vmem>>, vector<2x1024xbf16>
    %c0_27 = arith.constant 0 : index
    %c0_28 = arith.constant 0 : index
    %49 = vector.load %arg7[%c0_27, %c0_28] : memref<1024x1024xbf16, #tpu.memory_space<vmem>>, vector<1024x1024xbf16>
    %cst_29 = arith.constant dense<0.000000e+00> : vector<2x1024xf32>
    %50 = tpu.matmul %48, %49, %cst_29 {dimension_numbers = #tpu.dot_dimension_numbers<[1], [0], [0], [1], [0, 0, 1, 1], [], []>} : vector<2x1024xbf16>, vector<1024x1024xbf16>, vector<2x1024xf32> -> vector<2x1024xf32>
    %51 = vector.broadcast %7 : vector<1x1024xf32> to vector<2x1024xf32>
    %52 = arith.addf %50, %51 : vector<2x1024xf32>
    %c0_30 = arith.constant 0 : index
    %c0_31 = arith.constant 0 : index
    %c0_32 = arith.constant 0 : index
    %53 = vector.load %arg4[%c0_30, %c0_31, %c0_32] : memref<1x2x1024xf32, #tpu.memory_space<vmem>>, vector<1x2x1024xf32>
    %54 = vector.shape_cast %53 : vector<1x2x1024xf32> to vector<2x1024xf32>
    %55 = arith.addf %52, %54 : vector<2x1024xf32>
    %56 = vector.extract_strided_slice %55 {offsets = [0, 0], sizes = [2, 256], strides = [1, 1]} : vector<2x1024xf32> to vector<2x256xf32>
    %57 = arith.negf %56 : vector<2x256xf32>
    %58 = math.exp %57 : vector<2x256xf32>
    %cst_33 = arith.constant 1.000000e+00 : f32
    %59 = vector.broadcast %cst_33 : f32 to vector<2x256xf32>
    %60 = arith.addf %59, %58 : vector<2x256xf32>
    %61 = arith.divf %59, %60 : vector<2x256xf32>
    %62 = vector.extract_strided_slice %55 {offsets = [0, 256], sizes = [2, 256], strides = [1, 1]} : vector<2x1024xf32> to vector<2x256xf32>
    %63 = arith.negf %62 : vector<2x256xf32>
    %64 = math.exp %63 : vector<2x256xf32>
    %cst_34 = arith.constant 1.000000e+00 : f32
    %65 = vector.broadcast %cst_34 : f32 to vector<2x256xf32>
    %66 = arith.addf %65, %64 : vector<2x256xf32>
    %67 = arith.divf %65, %66 : vector<2x256xf32>
    %68 = vector.extract_strided_slice %55 {offsets = [0, 512], sizes = [2, 256], strides = [1, 1]} : vector<2x1024xf32> to vector<2x256xf32>
    %69 = math.tanh %68 : vector<2x256xf32>
    %70 = vector.extract_strided_slice %55 {offsets = [0, 768], sizes = [2, 256], strides = [1, 1]} : vector<2x1024xf32> to vector<2x256xf32>
    %71 = arith.negf %70 : vector<2x256xf32>
    %72 = math.exp %71 : vector<2x256xf32>
    %cst_35 = arith.constant 1.000000e+00 : f32
    %73 = vector.broadcast %cst_35 : f32 to vector<2x256xf32>
    %74 = arith.addf %73, %72 : vector<2x256xf32>
    %75 = arith.divf %73, %74 : vector<2x256xf32>
    %76 = arith.mulf %67, %4 : vector<2x256xf32>
    %77 = arith.mulf %61, %69 : vector<2x256xf32>
    %78 = arith.addf %76, %77 : vector<2x256xf32>
    %79 = math.tanh %78 : vector<2x256xf32>
    %80 = arith.mulf %75, %79 : vector<2x256xf32>
    %c0_36 = arith.constant 0 : index
    %c0_37 = arith.constant 0 : index
    %81 = vector.load %arg16[%c0_36, %c0_37] : memref<2x256xf32, #tpu.memory_space<vmem>>, vector<2x256xf32>
    tpu.vector_store %arg16[%c0_36, %c0_37], %80 {strides = array<i32>} : memref<2x256xf32, #tpu.memory_space<vmem>>, vector<2x256xf32>,
    %c0_38 = arith.constant 0 : index
    %c0_39 = arith.constant 0 : index
    %82 = vector.load %arg17[%c0_38, %c0_39] : memref<2x256xf32, #tpu.memory_space<vmem>>, vector<2x256xf32>
    tpu.vector_store %arg17[%c0_38, %c0_39], %78 {strides = array<i32>} : memref<2x256xf32, #tpu.memory_space<vmem>>, vector<2x256xf32>,
    %c0_40 = arith.constant 0 : index
    %c0_41 = arith.constant 0 : index
    %83 = vector.load %arg11[%c0_40, %c0_41] : memref<2x256xf32, #tpu.memory_space<vmem>>, vector<2x256xf32>
    tpu.vector_store %arg11[%c0_40, %c0_41], %80 {strides = array<i32>} : memref<2x256xf32, #tpu.memory_space<vmem>>, vector<2x256xf32>,
    %c0_42 = arith.constant 0 : index
    %c0_43 = arith.constant 0 : index
    %84 = vector.load %arg12[%c0_42, %c0_43] : memref<2x256xf32, #tpu.memory_space<vmem>>, vector<2x256xf32>
    tpu.vector_store %arg12[%c0_42, %c0_43], %78 {strides = array<i32>} : memref<2x256xf32, #tpu.memory_space<vmem>>, vector<2x256xf32>,
    %85 = arith.truncf %80 : vector<2x256xf32> to vector<2x256xbf16>
    %c0_44 = arith.constant 0 : index
    %c0_45 = arith.constant 0 : index
    %86 = vector.load %arg8[%c0_44, %c0_45] : memref<256x128xbf16, #tpu.memory_space<vmem>>, vector<256x128xbf16>
    %cst_46 = arith.constant dense<0.000000e+00> : vector<2x128xf32>
    %87 = tpu.matmul %85, %86, %cst_46 {dimension_numbers = #tpu.dot_dimension_numbers<[1], [0], [0], [1], [0, 0, 1, 1], [], []>} : vector<2x256xbf16>, vector<256x128xbf16>, vector<2x128xf32> -> vector<2x128xf32>
    %88 = vector.broadcast %8 : vector<1x128xf32> to vector<2x128xf32>
    %89 = arith.addf %87, %88 : vector<2x128xf32>
    %c0_47 = arith.constant 0 : index
    %c0_48 = arith.constant 0 : index
    %c0_49 = arith.constant 0 : index
    %90 = vector.load %arg10[%c0_47, %c0_48, %c0_49] : memref<1x2x128xf32, #tpu.memory_space<vmem>>, vector<1x2x128xf32>
    %91 = vector.shape_cast %90 : vector<1x2x128xf32> to vector<2x128xf32>
    %92 = vector.shape_cast %89 : vector<2x128xf32> to vector<1x2x128xf32>
    tpu.vector_store %arg10[%c0_47, %c0_48, %c0_49], %92 {strides = array<i32>} : memref<1x2x128xf32, #tpu.memory_space<vmem>>, vector<1x2x128xf32>,
    return
  }
  func.func @transform_0(%arg0: i32) -> (i32, i32) {
    %c0_i32 = arith.constant 0 : i32
    %c0_i32_0 = arith.constant 0 : i32
    %c0_i32_1 = arith.constant 0 : i32
    return %c0_i32, %c0_i32_0 : i32, i32
  }
  func.func @transform_1(%arg0: i32) -> (i32, i32) {
    %c0_i32 = arith.constant 0 : i32
    %c0_i32_0 = arith.constant 0 : i32
    %c0_i32_1 = arith.constant 0 : i32
    return %c0_i32, %c0_i32_0 : i32, i32
  }
  func.func @transform_2(%arg0: i32) -> (i32, i32) {
    %c0_i32 = arith.constant 0 : i32
    %c0_i32_0 = arith.constant 0 : i32
    %c0_i32_1 = arith.constant 0 : i32
    return %c0_i32, %c0_i32_0 : i32, i32
  }
  func.func @transform_3(%arg0: i32) -> (i32, i32, i32) {
    %c0_i32 = arith.constant 0 : i32
    %c0_i32_0 = arith.constant 0 : i32
    %c0_i32_1 = arith.constant 0 : i32
    return %arg0, %c0_i32, %c0_i32_0 : i32, i32, i32
  }
  func.func @transform_4(%arg0: i32) -> (i32, i32) {
    %c0_i32 = arith.constant 0 : i32
    %c0_i32_0 = arith.constant 0 : i32
    %c0_i32_1 = arith.constant 0 : i32
    return %c0_i32, %c0_i32_0 : i32, i32
  }
  func.func @transform_5(%arg0: i32) -> (i32, i32) {
    %c0_i32 = arith.constant 0 : i32
    %c0_i32_0 = arith.constant 0 : i32
    %c0_i32_1 = arith.constant 0 : i32
    return %c0_i32, %c0_i32_0 : i32, i32
  }
  func.func @transform_6(%arg0: i32) -> (i32, i32) {
    %c0_i32 = arith.constant 0 : i32
    %c0_i32_0 = arith.constant 0 : i32
    %c0_i32_1 = arith.constant 0 : i32
    return %c0_i32, %c0_i32_0 : i32, i32
  }
  func.func @transform_7(%arg0: i32) -> (i32, i32) {
    %c0_i32 = arith.constant 0 : i32
    %c0_i32_0 = arith.constant 0 : i32
    %c0_i32_1 = arith.constant 0 : i32
    return %c0_i32, %c0_i32_0 : i32, i32
  }
  func.func @transform_8(%arg0: i32) -> (i32, i32) {
    %c0_i32 = arith.constant 0 : i32
    %c0_i32_0 = arith.constant 0 : i32
    %c0_i32_1 = arith.constant 0 : i32
    return %c0_i32, %c0_i32_0 : i32, i32
  }
  func.func @transform_9(%arg0: i32) -> (i32, i32, i32) {
    %c0_i32 = arith.constant 0 : i32
    %c0_i32_0 = arith.constant 0 : i32
    %c0_i32_1 = arith.constant 0 : i32
    return %arg0, %c0_i32, %c0_i32_0 : i32, i32, i32
  }
  func.func @transform_10(%arg0: i32) -> (i32, i32) {
    %c0_i32 = arith.constant 0 : i32
    %c0_i32_0 = arith.constant 0 : i32
    %c0_i32_1 = arith.constant 0 : i32
    return %c0_i32, %c0_i32_0 : i32, i32
  }
  func.func @transform_11(%arg0: i32) -> (i32, i32) {
    %c0_i32 = arith.constant 0 : i32
    %c0_i32_0 = arith.constant 0 : i32
    %c0_i32_1 = arith.constant 0 : i32
    return %c0_i32, %c0_i32_0 : i32, i32
  }
  func.func @transform_12(%arg0: i32) -> (i32, i32, i32) {
    %c0_i32 = arith.constant 0 : i32
    %c0_i32_0 = arith.constant 0 : i32
    %c0_i32_1 = arith.constant 0 : i32
    return %arg0, %c0_i32, %c0_i32_0 : i32, i32, i32
  }
}

</mosaic_0001>

<bundles_post_ra>
// kernel: lstm_attn_decoder_bert_decode.1
= control target key start
LH: loop header
LB: loop body
LE: loop exit
PB: predicated region body
PF: predicated region fallthrough
CT: control target
= control target key end

     0   :  { %s8698_s0 = inlined_call_operand.hbm [shape: f32[2,256], index: 0, kind: input, shape index: {}]   ;;  %s8699_s1 = inlined_call_operand.hbm [shape: f32[2,256], index: 1, kind: input, shape index: {}]   ;;  %s8700_s2 = inlined_call_operand.vmem [shape: bf16[16,768], index: 2, kind: input, shape index: {}]   ;;  %s8701_s3 = inlined_call_operand.vmem [shape: f32[8,2,1024], index: 3, kind: input, shape index: {}]   ;;  %s8702_s4 = inlined_call_operand.hbm [shape: bf16[768,256], index: 4, kind: input, shape index: {}]   ;;  %s8703_s5 = inlined_call_operand.hbm [shape: bf16[256,256], index: 5, kind: input, shape index: {}]   ;;  %s8704_s6 = inlined_call_operand.hbm [shape: bf16[1024,1024], index: 6, kind: input, shape index: {}]   ;;  %s8705_s7 = inlined_call_operand.hbm [shape: bf16[256,128], index: 7, kind: input, shape index: {}]   ;;  %s8706_s8 = inlined_call_operand.hbm [shape: f32[1,1664], index: 8, kind: input, shape index: {}]   ;;  %s8707_s9 = inlined_call_operand.hbm [shape: f32[8,2,128], index: 9, kind: output, shape index: {0}]   ;;  %s8708_s10 = inlined_call_operand.hbm [shape: f32[2,256], index: 10, kind: output, shape index: {1}]   ;;  %s8709_s11 = inlined_call_operand.hbm [shape: f32[2,256], index: 11, kind: output, shape index: {2}]   ;;  %s8710_s12 = inlined_call_operand.hbm [shape: f32[8,2,8], index: 12, kind: output, shape index: {3}]  }
   0x1   :  { %8726 = sst [smem:[#allocation38_spill]] %s8699_s1 }
   0x2   :  { %8727 = sst [smem:[#allocation39_spill]] %s8703_s5 }
   0x3   :  { %8728 = sst [smem:[#allocation40_spill]] %s8707_s9 }
   0x4   :  { %18 = vsyncpa [#allocation7], 0 }
   0x5   :  { %19 = vsyncpa [#allocation10], 0 }
   0x6   :  { %20 = vsyncpa [#allocation13], 0 }
   0x7   :  { %21 = vsyncpa [#allocation16], 0 }
   0x8   :  { %22 = vsyncpa [#allocation8], 0 }
   0x9   :  { %24 = vsyncpa [#allocation8 + $0x1], 0 }
   0xa   :  { %25 = vsyncpa [#allocation20], 0 }
   0xb   :  { %26 = vsyncpa [#allocation23], 0 }
   0xc   :  { %28 = vsyncpa [#allocation23 + $0x1], 0  ;;  %s8059_s21 = smov 0   ;;  %s8061_s22 = smov 0  }
   0xd   :  { %s8063_s23 = smov 0   ;;  %s8065_s24 = smov 0  }
   0xe LB: > { %8729 = sst [smem:[#allocation31_spill]] %s7959_s21  ;;  %s8080_s25 = sadd.s32 4294967295, %s7971_s24   ;;  %s7971_s24 = sphi %s8065_s24, %s8770_s24   ;;  %s7967_s23 = sphi %s8063_s23, %s8772_s23   ;;  %s7963_s22 = sphi %s8061_s22, %s8774_s22   ;;  %s7959_s21 = sphi %s8059_s21, %s8773_s21  }
   0xf   : > { %8730 = sst [smem:[#allocation32_spill]] %s7967_s23  ;;  %s6450_s26 = sadd.s32 4294967294, %s7971_s24  }
  0x10   : > { %8731 = sst [smem:[#allocation33_spill]] %s7971_s24  ;;  %s8084_s27 = sadd.s32 1, %s7971_s24  }
  0x11   : > { %8732 = sst [smem:[#allocation34_spill]] %s8084_s27  ;;  %s235_s28 = sadd.s32 1, %s7967_s23 }
  0x12   : > { %s232_s29 = ssub.s32 %s7971_s24, %s8084_s27  ;;  %p245_p0 = scmp.ne.s32.totalorder %s7967_s23, %s7963_s22 }
  0x13   : > { %p233_p1 = scmp.eq.s32.totalorder %s232_s29, 0  ;;  %p8715_p2 = scmp.eq.s32.totalorder %s8080_s25, 7 }
  0x14   : > { %p251_p3 = scmp.ne.s32.totalorder %s7963_s22, %s7959_s21  ;;  %p252_p4 = scmp.eq.s32.totalorder %s6450_s26, 7 }
  0x15   : > { %s8095_s30 = scalar_select %p233_p1, %s7967_s23, %s235_s28  }
  0x16   : > { %p8099_p5 = por %p8715_p2, %p245_p0  ;;  %p8103_p6 = por %p252_p4, %p251_p3 }
  0x17   : > { %8733 = sst [smem:[#allocation35_spill]] %s8095_s30  ;;  %p6451_p7 = scmp.ge.s32.totalorder %s7971_s24, 1 }
  0x18   : > { %s8734_s13 = scalar_select %p8099_p5, 1, 0 }
  0x19   : > { %s8736_s14 = scalar_select %p8103_p6, 1, 0 }
  0x1a   : > { %8735 = sst [smem:[#allocation36_spill]] %s8734_s13  ;;  %p327_p8 = scmp.lt.s32.totalorder %s7971_s24, 9 }
  0x1b   : > { %8737 = sst [smem:[#allocation37_spill]] %s8736_s14  ;;  %p8716_p10 = scmp.eq.s32.totalorder %s8080_s25, 0 }
  0x1c   : > { %p8111_p11 = pnand %p6451_p7, %p327_p8  ;;  %s7973_s16 = smov [#allocation9]  }
  0x1d   : > { %s351_s17 = sshll.u32 %s7973_s16, 4  ;;  %s7974_s19 = smov [#allocation12]   ;;  %s352_s17 = int_to_ptr.vmem [resolvable:$true] %s351_s17 }
  0x1e   : > { %s8738_s15 = scalar_select %p8111_p11, 1, 0 }
  0x1f   : > { %p7239_p12 = pneg %p8111_p11  ;;  %s377_s20 = sshll.u32 %s7974_s19, 4  ;;  %s8123_s20 = int_to_ptr.vmem [resolvable:$true] %s377_s20 }
  0x20   : > { %s7975_s26 = smov [#allocation15]   ;;  %s8740_s1 = sld [smem:[#allocation38_spill]] }
  0x21   : > { %p8119_p13 = pnand %p8716_p10, %p7239_p12  ;;  %s8125_s28 = sshll.u32 %s7975_s26, 4  ;;  %s404_s28 = int_to_ptr.vmem [resolvable:$true] %s8125_s28 }
  0x23   : > { %p8135_p1 = pneg %p8119_p13 }
  0x26   : > { %s7609_s16 = scalar_lea.hbm %s8740_s1, 64 }
  0x27   : > { %p7610_p0 = scmp.ne.s32.totalorder %s8740_s1, %s7609_s16  ;;  %p7616_p7 = scmp.lt.u32.totalorder %s7609_s16, %s8740_s1 }
  0x29   : > { %p7612_p3 = pnand %p8135_p1, %p7610_p0 }
  0x2b   : > { %p7613_p4 = pneg %p7612_p3 }
  0x2d   : > { %p7618_p8 = pnand %p7616_p7, %p7613_p4 }
  0x2f   : > { %7621 = shalt.err (!%p7618_p8)
}
  0x30   : > { %s7622_s30 = scalar_lea.vmem %s352_s17, 64  ;;  %p7630_p10 = scmp.lt.s32.totalorder %s352_s17, %s352_s17 }
  0x31   : > { %p7623_p12 = scmp.ne.s32.totalorder %s352_s17, %s7622_s30  ;;  %p7631_p6 = scmp.lt.s32.totalorder %s7622_s30, %s7622_s30 }
  0x33   : > { %p7625_p2 = pnand %p7623_p12, %p8135_p1  ;;  %p7632_p5 = por %p7631_p6, %p7630_p10 }
  0x35   : > { %p7626_p9 = pneg %p7625_p2 }
  0x37   : > { %p7633_p11 = pnand %p7632_p5, %p7626_p9 }
  0x39   : > { %7636 = shalt.err (!%p7633_p11)
}
  0x3a   : > { %7245 = dma.hbm_to_vmem [thread:$0]  (!%p8119_p13), %s8740_s1, 64, %s352_s17, [#allocation10]  }
  0x3b   : > { %s8742_s5 = sld [smem:[#allocation39_spill]] }
  0x41   : > { %s7637_s19 = scalar_lea.hbm %s8742_s5, 4096 }
  0x42   : > { %p7638_p2 = scmp.ne.s32.totalorder %s8742_s5, %s7637_s19  ;;  %p7644_p5 = scmp.lt.u32.totalorder %s7637_s19, %s8742_s5 }
  0x44   : > { %p7640_p0 = pnand %p7638_p2, %p8135_p1 }
  0x46   : > { %p7641_p6 = pneg %p7640_p0 }
  0x48   : > { %p7646_p9 = pnand %p7644_p5, %p7641_p6 }
  0x4a   : > { %7649 = shalt.err (!%p7646_p9)
}
  0x4b   : > { %s7650_s17 = scalar_lea.vmem %s8123_s20, 4096  ;;  %p7658_p4 = scmp.lt.s32.totalorder %s8123_s20, %s8123_s20 }
  0x4c   : > { %p7651_p10 = scmp.ne.s32.totalorder %s8123_s20, %s7650_s17  ;;  %p7659_p7 = scmp.lt.s32.totalorder %s7650_s17, %s7650_s17 }
  0x4e   : > { %p7653_p11 = pnand %p7651_p10, %p8135_p1  ;;  %p7660_p8 = por %p7659_p7, %p7658_p4 }
  0x50   : > { %p7654_p3 = pneg %p7653_p11 }
  0x52   : > { %p7661_p12 = pnand %p7660_p8, %p7654_p3 }
  0x54   : > { %7664 = shalt.err (!%p7661_p12)
}
  0x55   : > { %s8721_s21 = smov 128   ;;  %s8722_s24 = smov 8  }
  0x56   : > { %7251 = dma.hbm_to_vmem [thread:$0]  (!%p8119_p13), %s8742_s5, 4096, %s8123_s20, [#allocation13], %s8721_s21, %s8721_s21, %s8722_s24  }
  0x57   : > { %s7665_s19 = scalar_lea.hbm %s8705_s7, 2048 }
  0x58   : > { %p7666_p2 = scmp.ne.s32.totalorder %s8705_s7, %s7665_s19  ;;  %p7672_p5 = scmp.lt.u32.totalorder %s7665_s19, %s8705_s7 }
  0x5a   : > { %p7668_p0 = pnand %p7666_p2, %p8135_p1 }
  0x5c   : > { %p7669_p6 = pneg %p7668_p0 }
  0x5e   : > { %p7674_p9 = pnand %p7672_p5, %p7669_p6 }
  0x60   : > { %7677 = shalt.err (!%p7674_p9)
}
  0x61   : > { %s7678_s23 = scalar_lea.vmem %s404_s28, 2048  ;;  %p7686_p4 = scmp.lt.s32.totalorder %s404_s28, %s404_s28 }
  0x62   : > { %p7679_p10 = scmp.ne.s32.totalorder %s404_s28, %s7678_s23  ;;  %p7687_p7 = scmp.lt.s32.totalorder %s7678_s23, %s7678_s23 }
  0x64   : > { %p7681_p11 = pnand %p7679_p10, %p8135_p1  ;;  %p7688_p8 = por %p7687_p7, %p7686_p4 }
  0x66   : > { %p7682_p3 = pneg %p7681_p11 }
  0x68   : > { %p7689_p12 = pnand %p7688_p8, %p7682_p3 }
  0x6a   : > { %7692 = shalt.err (!%p7689_p12)
}
  0x6b   : > { %s7978_s20 = smov 64   ;;  %s7979_s27 = smov 4  }
  0x6c   : > { %7257 = dma.hbm_to_vmem [thread:$0]  (!%p8119_p13), %s8705_s7, 2048, %s404_s28, [#allocation16], %s7978_s20, %s7978_s20, %s7979_s27  }
  0x6d   : > { %s7980_s16 = smov [#allocation6]   ;;  %s7981_s26 = smov [#allocation11]  }
  0x6e   : > { %s340_s19 = sshll.u32 %s7980_s16, 4  ;;  %s364_s30 = sshll.u32 %s7981_s26, 4  ;;  %s341_s19 = int_to_ptr.vmem [resolvable:$true] %s340_s19  ;;  %s365_s30 = int_to_ptr.vmem [resolvable:$true] %s364_s30 }
  0x6f   : > { %s7693_s23 = scalar_lea.hbm %s8698_s0, 64 }
  0x70   : > { %p7694_p2 = scmp.ne.s32.totalorder %s8698_s0, %s7693_s23  ;;  %p7700_p5 = scmp.lt.u32.totalorder %s7693_s23, %s8698_s0 }
  0x72   : > { %p7696_p0 = pnand %p7694_p2, %p8135_p1 }
  0x74   : > { %p7697_p6 = pneg %p7696_p0 }
  0x76   : > { %p7702_p9 = pnand %p7700_p5, %p7697_p6 }
  0x78   : > { %7705 = shalt.err (!%p7702_p9)
}
  0x79   : > { %s7706_s28 = scalar_lea.vmem %s341_s19, 64  ;;  %p7714_p4 = scmp.lt.s32.totalorder %s341_s19, %s341_s19 }
  0x7a   : > { %p7707_p10 = scmp.ne.s32.totalorder %s341_s19, %s7706_s28  ;;  %p7715_p7 = scmp.lt.s32.totalorder %s7706_s28, %s7706_s28 }
  0x7c   : > { %p7709_p11 = pnand %p7707_p10, %p8135_p1  ;;  %p7716_p8 = por %p7715_p7, %p7714_p4 }
  0x7e   : > { %p7710_p3 = pneg %p7709_p11 }
  0x80   : > { %p7717_p12 = pnand %p7716_p8, %p7710_p3 }
  0x82   : > { %7720 = shalt.err (!%p7717_p12)
}
  0x83   : > { %7242 = dma.hbm_to_vmem [thread:$0]  (!%p8119_p13), %s8698_s0, 64, %s341_s19, [#allocation7]  }
  0x84   : > { %s7721_s24 = scalar_lea.hbm %s8702_s4, 12288 }
  0x85   : > { %p7722_p2 = scmp.ne.s32.totalorder %s8702_s4, %s7721_s24  ;;  %p7728_p5 = scmp.lt.u32.totalorder %s7721_s24, %s8702_s4 }
  0x87   : > { %p7724_p0 = pnand %p7722_p2, %p8135_p1 }
  0x89   : > { %p7725_p6 = pneg %p7724_p0 }
  0x8b   : > { %p7730_p9 = pnand %p7728_p5, %p7725_p6 }
  0x8d   : > { %7733 = shalt.err (!%p7730_p9)
}
  0x8e   : > { %s7734_s16 = scalar_lea.vmem %s365_s30, 12288  ;;  %p7742_p4 = scmp.lt.s32.totalorder %s365_s30, %s365_s30 }
  0x8f   : > { %p7735_p10 = scmp.ne.s32.totalorder %s365_s30, %s7734_s16  ;;  %p7743_p7 = scmp.lt.s32.totalorder %s7734_s16, %s7734_s16 }
  0x91   : > { %p7737_p11 = pnand %p7735_p10, %p8135_p1  ;;  %p7744_p8 = por %p7743_p7, %p7742_p4 }
  0x93   : > { %p7738_p3 = pneg %p7737_p11 }
  0x95   : > { %p7745_p12 = pnand %p7744_p8, %p7738_p3 }
  0x97   : > { %7748 = shalt.err (!%p7745_p12)
}
  0x98   : > { %s8743_s19 = smov 8   ;;  %s8744_s26 = smov 128  }
  0x99   : > { %7248 = dma.hbm_to_vmem [thread:$0]  (!%p8119_p13), %s8702_s4, 12288, %s365_s30, [#allocation10], %s8744_s26, %s8744_s26, %s8743_s19  }
  0x9a   : > { %s7982_s28 = smov [#allocation14]   ;;  %s7749_s13 = scalar_lea.hbm %s8704_s6, 65536 }
  0x9b   : > { %s390_s5 = sshll.u32 %s7982_s28, 4  ;;  %p7750_p2 = scmp.ne.s32.totalorder %s8704_s6, %s7749_s13  ;;  %s391_s5 = int_to_ptr.vmem [resolvable:$true] %s390_s5 }
  0x9c   : > { %p7756_p5 = scmp.lt.u32.totalorder %s7749_s13, %s8704_s6 }
  0x9d   : > { %p7752_p0 = pnand %p7750_p2, %p8135_p1 }
  0x9f   : > { %p7753_p6 = pneg %p7752_p0 }
  0xa1   : > { %p7758_p9 = pnand %p7756_p5, %p7753_p6 }
  0xa3   : > { %7761 = shalt.err (!%p7758_p9)
}
  0xa4   : > { %s7762_s30 = scalar_lea.vmem %s391_s5, 65536  ;;  %p7770_p4 = scmp.lt.s32.totalorder %s391_s5, %s391_s5 }
  0xa5   : > { %p7763_p10 = scmp.ne.s32.totalorder %s391_s5, %s7762_s30  ;;  %p7771_p7 = scmp.lt.s32.totalorder %s7762_s30, %s7762_s30 }
  0xa7   : > { %p7765_p11 = pnand %p7763_p10, %p8135_p1  ;;  %p7772_p8 = por %p7771_p7, %p7770_p4 }
  0xa9   : > { %p7766_p3 = pneg %p7765_p11 }
  0xab   : > { %p7773_p12 = pnand %p7772_p8, %p7766_p3 }
  0xad   : > { %7776 = shalt.err (!%p7773_p12)
}
  0xae   : > { %s7983_s29 = smov 512   ;;  %s7984_s16 = smov 32  }
  0xaf   : > { %7254 = dma.hbm_to_vmem [thread:$0]  (!%p8119_p13), %s8704_s6, 65536, %s391_s5, [#allocation13], %s7983_s29, %s7983_s29, %s7984_s16  }
  0xb0   : > { %s7985_s17 = smov [#allocation17]   ;;  %s7777_s9 = scalar_lea.hbm %s8706_s8, 208 }
  0xb1   : > { %s417_s23 = sshll.u32 %s7985_s17, 4  ;;  %p7778_p2 = scmp.ne.s32.totalorder %s8706_s8, %s7777_s9  ;;  %s418_s23 = int_to_ptr.vmem [resolvable:$true] %s417_s23 }
  0xb2   : > { %p7784_p5 = scmp.lt.u32.totalorder %s7777_s9, %s8706_s8 }
  0xb3   : > { %p7780_p0 = pnand %p7778_p2, %p8135_p1 }
  0xb5   : > { %p7781_p6 = pneg %p7780_p0 }
  0xb7   : > { %p7786_p9 = pnand %p7784_p5, %p7781_p6 }
  0xb9   : > { %7789 = shalt.err (!%p7786_p9)
}
  0xba   : > { %s7790_s5 = scalar_lea.vmem %s418_s23, 208  ;;  %s7797_s1 = scalar_lea.vmem %s418_s23, 224 }
  0xbb   : > { %p7791_p10 = scmp.ne.s32.totalorder %s418_s23, %s7790_s5  ;;  %p7798_p4 = scmp.lt.s32.totalorder %s418_s23, %s418_s23 }
  0xbc   : > { %p7799_p7 = scmp.lt.s32.totalorder %s7797_s1, %s7790_s5 }
  0xbd   : > { %p7793_p11 = pnand %p7791_p10, %p8135_p1 }
  0xbe   : > { %p7800_p8 = por %p7799_p7, %p7798_p4 }
  0xbf   : > { %p7794_p3 = pneg %p7793_p11 }
  0xc1   : > { %p7801_p12 = pnand %p7800_p8, %p7794_p3 }
  0xc3   : > { %7804 = shalt.err (!%p7801_p12)
}
  0xc4   : > { %7260 = dma.hbm_to_vmem [thread:$0]  (!%p8119_p13), %s8706_s8, 208, %s418_s23, [#allocation16]  }
  0xc5   : > { %p8745_p2 = scmp.ne.s32.totalorder %s8738_s15, 0 }
  0xc6   : > { %p8746_p0 = scmp.eq.s32.totalorder (!%p8745_p2), %s8080_s25, 0 }
  0xc7   : > { %438 = sbr.rel (%p8745_p2) target bundleno = 2605 (0xa2d), region = 56 }
  0xce   : > { %7930 = dma.done.wait (%p8746_p0), [#allocation7], 64   ;;  %p8747_p1 = pmov %p8746_p0 }
  0xcf   : > { %p8748_p6 = pmov %p8746_p0 }
  0xd0   : > { %7932 = vsyncadd (%p8747_p1), [#allocation7], 4294967232 }
  0xd1   : > { %7934 = dma.done.wait (%p8748_p6), [#allocation10], 12352   ;;  %p8749_p5 = pmov %p8746_p0 }
  0xd2   : > { %p8750_p9 = pmov %p8746_p0 }
  0xd3   : > { %7936 = vsyncadd (%p8749_p5), [#allocation10], 4294954944 }
  0xd4   : > { %7938 = dma.done.wait (%p8750_p9), [#allocation13], 69632   ;;  %p8751_p13 = pmov %p8746_p0 }
  0xd5   : > { %p8752_p10 = pmov %p8746_p0 }
  0xd6   : > { %7940 = vsyncadd (%p8751_p13), [#allocation13], 4294897664 }
  0xd7   : > { %7942 = dma.done.wait (%p8752_p10), [#allocation16], 2256   ;;  %p8753_p11 = pmov %p8746_p0 }
  0xd8   : > { %s8290_s14 = sand.u32 1, %s7963_s22   ;;  %p509_p3 = scmp.lt.s32.totalorder %s8080_s25, 7 }
  0xd9   : > { %7944 = vsyncadd (%p8753_p11), [#allocation16], 4294965040  ;;  %s6468_s15 = sshll.u32 %s8290_s14, 1  ;;  %p8754_p4 = scmp.ne.s32.totalorder %s8080_s25, 0 }
  0xda   : > { %s510_s18 = scalar_select %p509_p3, %s8080_s25, 7 }
  0xdb   : > { %s8300_s23 = scalar_lea.vmem [#allocation18], %s6468_s15  ;;  %s8302_s28 = scalar_lea.vmem [#allocation22], %s6468_s15  ;;  %v7338_v0 = vld [vmem:[#allocation11 + $0x104] ss:$8 sps:$4 sm:$0xff] (!%p8754_p4)   ;;  %v7340_v1 = vld [vmem:[#allocation11 + $0x100] ss:$8 sps:$4 sm:$0xff] (!%p8754_p4)  }
  0xdc   : > { %s7168_s16 = sshll.u32 %s510_s18, 4  ;;  %518 = sbr.rel (%p8754_p4) target bundleno = 566 (0x236), region = 88  ;;  %1178 = vmatprep.subr.bf16.mxu0 (!%p8754_p4), %v7338_v0  ;;  %v7341_v2 = vld [vmem:[#allocation11 + $0x114] ss:$8 sps:$4 sm:$0xff] (!%p8754_p4)   ;;  %v7343_v3 = vld [vmem:[#allocation11 + $0x110] ss:$8 sps:$4 sm:$0xff] (!%p8754_p4)  }
  0xdd   : > { %s8298_s17 = scalar_lea.vmem %s8701_s3, %s7168_s16  ;;  %1179 = vmatpush1.bf16.msra.mxu0 (!%p8754_p4), %v7340_v1  ;;  %v7344_v4 = vld [vmem:[#allocation11 + $0x124] ss:$8 sps:$4 sm:$0xff] (!%p8754_p4)   ;;  %v7346_v5 = vld [vmem:[#allocation11 + $0x120] ss:$8 sps:$4 sm:$0xff] (!%p8754_p4)   ;;  %v7347_v6 = vld [vmem:[#allocation11 + $0x134] ss:$8 sps:$4 sm:$0xff] (!%p8754_p4)  }
  0xde   : > { %1180 = vmatprep.subr.bf16.mxu0 (!%p8754_p4), %v7341_v2  ;;  %v7349_v7 = vld [vmem:[#allocation11 + $0x130] ss:$8 sps:$4 sm:$0xff] (!%p8754_p4)   ;;  %v7350_v8 = vld [vmem:[#allocation11 + $0x144] ss:$8 sps:$4 sm:$0xff] (!%p8754_p4)   ;;  %v7352_v9 = vld [vmem:[#allocation11 + $0x140] ss:$8 sps:$4 sm:$0xff] (!%p8754_p4)  }
  0xdf   : > { %v7353_v10 = vld [vmem:[#allocation11 + $0x154] ss:$8 sps:$4 sm:$0xff] (!%p8754_p4)   ;;  %v7355_v11 = vld [vmem:[#allocation11 + $0x150] ss:$8 sps:$4 sm:$0xff] (!%p8754_p4)   ;;  %v7356_v12 = vld [vmem:[#allocation11 + $0x164] ss:$8 sps:$4 sm:$0xff] (!%p8754_p4)  }
  0xe0   : > { %v519_v13 = vld [vmem:[#allocation6] sm:$0xf] (!%p8754_p4)  ;;  %v521_v14 = vld [vmem:[#allocation9] sm:$0xf] (!%p8754_p4)  ;;  %v7358_v15 = vld [vmem:[#allocation11 + $0x160] ss:$8 sps:$4 sm:$0xff] (!%p8754_p4)  }
  0xe1   : > { %1181 = vmatpush1.bf16.msra.mxu0 (!%p8754_p4), %v7343_v3  ;;  %520 = vst [vmem:[#allocation4] sm:$0xf] (!%p8754_p4), %v519_v13  ;;  %522 = vst [vmem:[#allocation5] sm:$0xf] (!%p8754_p4), %v521_v14  ;;  %v7385_v16 = vld [vmem:[#allocation11 + $0x4] ss:$8 sps:$4 sm:$0xff] (!%p8754_p4)  }
  0xe2   : > { %1182 = vmatprep.subr.bf16.mxu0 (!%p8754_p4), %v7344_v4  ;;  %v7388_v17 = vld [vmem:[#allocation11] ss:$8 sps:$4 sm:$0xff] (!%p8754_p4)   ;;  %v7359_v18 = vld [vmem:[#allocation11 + $0x174] ss:$8 sps:$4 sm:$0xff] (!%p8754_p4)   ;;  %1135 = vmatprep.subr.bf16.mxu1 (!%p8754_p4), %v7385_v16  ;;  %v7361_v20 = vld [vmem:[#allocation11 + $0x170] ss:$8 sps:$4 sm:$0xff] (!%p8754_p4)  }
  0xe3   : > { %v7391_v19 = vld [vmem:[%s8700_s2 + $0xc] ss:$24 sps:$4 sm:$0xff]   ;;  %1136 = vmatpush1.bf16.msra.mxu1 %v7388_v17  ;;  %v7397_v22 = vld [vmem:[#allocation11 + $0x10] ss:$8 sps:$4 sm:$0xff]   ;;  %v7403_v25 = vld [vmem:[#allocation11 + $0x20] ss:$8 sps:$4 sm:$0xff]  }
  0xe4   : > { %1210 = vmatprep.mubr.bf16.mxu0 %v7391_v19  ;;  %v7395_v21 = vld [vmem:[#allocation11 + $0x14] ss:$8 sps:$4 sm:$0xff]   ;;  %v7362_v23 = vld [vmem:[#allocation11 + $0x184] ss:$8 sps:$4 sm:$0xff]   ;;  %v7364_v26 = vld [vmem:[#allocation11 + $0x180] ss:$8 sps:$4 sm:$0xff]  }
  0xe5   : > { %1183 = vmatpush1.bf16.msra.mxu0 %v7346_v5  ;;  %1137 = vmatprep.subr.bf16.mxu1 %v7395_v21  ;;  %v7401_v24 = vld [vmem:[#allocation11 + $0x24] ss:$8 sps:$4 sm:$0xff]   ;;  %v7365_v27 = vld [vmem:[#allocation11 + $0x194] ss:$8 sps:$4 sm:$0xff]   ;;  %v7409_v29 = vld [vmem:[#allocation11 + $0x30] ss:$8 sps:$4 sm:$0xff]  }
  0xe6   : > { %1184 = vmatprep.subr.bf16.mxu0 %v7347_v6  ;;  %v7407_v28 = vld [vmem:[#allocation11 + $0x34] ss:$8 sps:$4 sm:$0xff]   ;;  %v7413_v30 = vld [vmem:[#allocation11 + $0x44] ss:$8 sps:$4 sm:$0xff]   ;;  %v7367_v31 = vld [vmem:[#allocation11 + $0x190] ss:$8 sps:$4 sm:$0xff]  }
  0xe7   : > { %1138 = vmatpush1.bf16.msra.mxu1 %v7397_v22  ;;  %v7368_v32 = vld [vmem:[#allocation11 + $0x1a4] ss:$8 sps:$4 sm:$0xff]   ;;  %v7415_v33 = vld [vmem:[#allocation11 + $0x40] ss:$8 sps:$4 sm:$0xff]   ;;  %v7419_v34 = vld [vmem:[#allocation11 + $0x54] ss:$8 sps:$4 sm:$0xff]  }
  0xe8   : > { %1139 = vmatprep.subr.bf16.mxu1 %v7401_v24  ;;  %v7370_v35 = vld [vmem:[#allocation11 + $0x1a0] ss:$8 sps:$4 sm:$0xff]   ;;  %v7371_v36 = vld [vmem:[#allocation11 + $0x1b4] ss:$8 sps:$4 sm:$0xff]   ;;  %v7421_v37 = vld [vmem:[#allocation11 + $0x50] ss:$8 sps:$4 sm:$0xff]  }
  0xe9   : > { %1185 = vmatpush1.bf16.msra.mxu0 %v7349_v7  ;;  %v7425_v38 = vld [vmem:[#allocation11 + $0x64] ss:$8 sps:$4 sm:$0xff]   ;;  %v7373_v39 = vld [vmem:[#allocation11 + $0x1b0] ss:$8 sps:$4 sm:$0xff]   ;;  %v7427_v41 = vld [vmem:[#allocation11 + $0x60] ss:$8 sps:$4 sm:$0xff]  }
  0xea   : > { %1186 = vmatprep.subr.bf16.mxu0 %v7350_v8  ;;  %v7374_v40 = vld [vmem:[#allocation11 + $0x1c4] ss:$8 sps:$4 sm:$0xff]   ;;  %v7431_v42 = vld [vmem:[#allocation11 + $0x74] ss:$8 sps:$4 sm:$0xff]   ;;  %v7376_v43 = vld [vmem:[#allocation11 + $0x1c0] ss:$8 sps:$4 sm:$0xff]  }
  0xeb   : > { %1140 = vmatpush1.bf16.msra.mxu1 %v7403_v25  ;;  %v7377_v44 = vld [vmem:[#allocation11 + $0x1d4] ss:$8 sps:$4 sm:$0xff]   ;;  %v7433_v45 = vld [vmem:[#allocation11 + $0x70] ss:$8 sps:$4 sm:$0xff]   ;;  %v7437_v46 = vld [vmem:[#allocation11 + $0x84] ss:$8 sps:$4 sm:$0xff]  }
  0xec   : > { %1141 = vmatprep.subr.bf16.mxu1 %v7407_v28  ;;  %v7379_v47 = vld [vmem:[#allocation11 + $0x1d0] ss:$8 sps:$4 sm:$0xff]   ;;  %v7380_v48 = vld [vmem:[#allocation11 + $0x1e4] ss:$8 sps:$4 sm:$0xff]   ;;  %v7439_v49 = vld [vmem:[#allocation11 + $0x80] ss:$8 sps:$4 sm:$0xff]  }
  0xed   : > { %1187 = vmatpush1.bf16.msra.mxu0 %v7352_v9  ;;  %v7443_v50 = vld [vmem:[#allocation11 + $0x94] ss:$8 sps:$4 sm:$0xff]   ;;  %v7382_v51 = vld [vmem:[#allocation11 + $0x1e0] ss:$8 sps:$4 sm:$0xff]   ;;  %v7445_v53 = vld [vmem:[#allocation11 + $0x90] ss:$8 sps:$4 sm:$0xff]  }
  0xee   : > { %1188 = vmatprep.subr.bf16.mxu0 %v7353_v10  ;;  %v7383_v52 = vld [vmem:[#allocation11 + $0x1f4] ss:$8 sps:$4 sm:$0xff]   ;;  %v7449_v54 = vld [vmem:[#allocation11 + $0xa4] ss:$8 sps:$4 sm:$0xff]   ;;  %v7387_v55 = vld [vmem:[#allocation11 + $0x1f0] ss:$8 sps:$4 sm:$0xff]  }
  0xef   : > { %1142 = vmatpush1.bf16.msra.mxu1 %v7409_v29  ;;  %v7394_v56 = vld [vmem:[#allocation11 + $0x204] ss:$8 sps:$4 sm:$0xff]   ;;  %v7389_v57 = vld [vmem:[%s8700_s2 + $0x8] ss:$24 sps:$4 sm:$0xff]   ;;  %v7455_v59 = vld [vmem:[#allocation11 + $0xb4] ss:$8 sps:$4 sm:$0xff]  }
  0xf0   : > { %1143 = vmatprep.subr.bf16.mxu1 %v7413_v30  ;;  %v7451_v58 = vld [vmem:[#allocation11 + $0xa0] ss:$8 sps:$4 sm:$0xff]   ;;  %v7400_v61 = vld [vmem:[#allocation11 + $0x214] ss:$8 sps:$4 sm:$0xff]   ;;  %v7457_v62 = vld [vmem:[#allocation11 + $0xb0] ss:$8 sps:$4 sm:$0xff]  }
  0xf1   : > { %1189 = vmatpush1.bf16.msra.mxu0 %v7355_v11  ;;  %v7392_v60 = vld [vmem:[#allocation11 + $0x200] ss:$8 sps:$4 sm:$0xff]   ;;  %v7484_v63 = vld [vmem:[%s8700_s2 + $0x4] ss:$24 sps:$4 sm:$0xff]   ;;  %v7398_v1 = vld [vmem:[#allocation11 + $0x210] ss:$8 sps:$4 sm:$0xff]  }
  0xf2   : > { %1190 = vmatprep.subr.bf16.mxu0 %v7356_v12  ;;  %v7461_v0 = vld [vmem:[#allocation11 + $0xc4] ss:$8 sps:$4 sm:$0xff]   ;;  %1167 = vmatprep.mubr.bf16.mxu1 %v7484_v63  ;;  %v7490_v3 = vld [vmem:[%s8700_s2 + $0x14] ss:$24 sps:$4 sm:$0xff]   ;;  %v7463_v4 = vld [vmem:[#allocation11 + $0xc0] ss:$8 sps:$4 sm:$0xff]  }
  0xf3   : > { %1144 = vmatpush1.bf16.msra.mxu1 %v7415_v33  ;;  %v7406_v2 = vld [vmem:[#allocation11 + $0x224] ss:$8 sps:$4 sm:$0xff]   ;;  %v7467_v5 = vld [vmem:[#allocation11 + $0xd4] ss:$8 sps:$4 sm:$0xff]   ;;  %v7404_v6 = vld [vmem:[#allocation11 + $0x220] ss:$8 sps:$4 sm:$0xff]  }
  0xf4   : > { %1145 = vmatprep.subr.bf16.mxu1 %v7419_v34  ;;  %v7412_v7 = vld [vmem:[#allocation11 + $0x234] ss:$8 sps:$4 sm:$0xff]   ;;  %v7469_v8 = vld [vmem:[#allocation11 + $0xd0] ss:$8 sps:$4 sm:$0xff]   ;;  %v7473_v9 = vld [vmem:[#allocation11 + $0xe4] ss:$8 sps:$4 sm:$0xff]  }
  0xf5   : > { %1191 = vmatpush1.bf16.msra.mxu0 %v7358_v15  ;;  %v7410_v10 = vld [vmem:[#allocation11 + $0x230] ss:$8 sps:$4 sm:$0xff]   ;;  %v7418_v11 = vld [vmem:[#allocation11 + $0x244] ss:$8 sps:$4 sm:$0xff]   ;;  %v7475_v12 = vld [vmem:[#allocation11 + $0xe0] ss:$8 sps:$4 sm:$0xff]  }
  0xf6   : > { %1192 = vmatprep.subr.bf16.mxu0 %v7359_v18  ;;  %v7479_v13 = vld [vmem:[#allocation11 + $0xf4] ss:$8 sps:$4 sm:$0xff]   ;;  %v7416_v14 = vld [vmem:[#allocation11 + $0x240] ss:$8 sps:$4 sm:$0xff]   ;;  %v7481_v16 = vld [vmem:[#allocation11 + $0xf0] ss:$8 sps:$4 sm:$0xff]  }
  0xf7   : > { %1146 = vmatpush1.bf16.msra.mxu1 %v7421_v37  ;;  %v7424_v15 = vld [vmem:[#allocation11 + $0x254] ss:$8 sps:$4 sm:$0xff]   ;;  %v7422_v17 = vld [vmem:[#allocation11 + $0x250] ss:$8 sps:$4 sm:$0xff]   ;;  %v7430_v18 = vld [vmem:[#allocation11 + $0x264] ss:$8 sps:$4 sm:$0xff]  }
  0xf8   : > { %1147 = vmatprep.subr.bf16.mxu1 %v7425_v38  ;;  %v7482_v19 = vld [vmem:[%s8700_s2] ss:$24 sps:$4 sm:$0xff]   ;;  %v7436_v21 = vld [vmem:[#allocation11 + $0x274] ss:$8 sps:$4 sm:$0xff]   ;;  %v7434_v22 = vld [vmem:[#allocation11 + $0x270] ss:$8 sps:$4 sm:$0xff]  }
  0xf9   : > { %1193 = vmatpush1.bf16.msra.mxu0 %v7361_v20  ;;  %v7428_v20 = vld [vmem:[#allocation11 + $0x260] ss:$8 sps:$4 sm:$0xff]   ;;  %v7448_v25 = vld [vmem:[#allocation11 + $0x294] ss:$8 sps:$4 sm:$0xff]   ;;  %v7458_v30 = vld [vmem:[#allocation11 + $0x2b0] ss:$8 sps:$4 sm:$0xff]  }
  0xfa   : > { %1194 = vmatprep.subr.bf16.mxu0 %v7362_v23  ;;  %v7442_v23 = vld [vmem:[#allocation11 + $0x284] ss:$8 sps:$4 sm:$0xff]   ;;  %v7440_v24 = vld [vmem:[#allocation11 + $0x280] ss:$8 sps:$4 sm:$0xff]   ;;  %v7460_v29 = vld [vmem:[#allocation11 + $0x2b4] ss:$8 sps:$4 sm:$0xff]  }
  0xfb   : > { %1148 = vmatpush1.bf16.msra.mxu1 %v7427_v41  ;;  %v7452_v28 = vld [vmem:[#allocation11 + $0x2a0] ss:$8 sps:$4 sm:$0xff]   ;;  %v7472_v33 = vld [vmem:[#allocation11 + $0x2d4] ss:$8 sps:$4 sm:$0xff]   ;;  %v7470_v34 = vld [vmem:[#allocation11 + $0x2d0] ss:$8 sps:$4 sm:$0xff]  }
  0xfc   : > { %1149 = vmatprep.subr.bf16.mxu1 %v7431_v42  ;;  %v7487_v37 = vld [vmem:[#allocation11 + $0x2f4] ss:$8 sps:$4 sm:$0xff]   ;;  %v7485_v38 = vld [vmem:[#allocation11 + $0x2f0] ss:$8 sps:$4 sm:$0xff]  }
  0xfd   : > { %1195 = vmatpush1.bf16.msra.mxu0 %v7364_v26  ;;  %v7446_v26 = vld [vmem:[#allocation11 + $0x290] ss:$8 sps:$4 sm:$0xff]  }
  0xfe   : > { %1196 = vmatprep.subr.bf16.mxu0 %v7365_v27  ;;  %v7454_v27 = vld [vmem:[#allocation11 + $0x2a4] ss:$8 sps:$4 sm:$0xff]  }
  0xff   : > { %1150 = vmatpush1.bf16.msra.mxu1 %v7433_v45 }
 0x100   : > { %1151 = vmatprep.subr.bf16.mxu1 %v7437_v46 }
 0x101   : > { %1197 = vmatpush1.bf16.msra.mxu0 %v7367_v31  ;;  %v7466_v31 = vld [vmem:[#allocation11 + $0x2c4] ss:$8 sps:$4 sm:$0xff]  }
 0x102   : > { %1198 = vmatprep.subr.bf16.mxu0 %v7368_v32  ;;  %v7464_v32 = vld [vmem:[#allocation11 + $0x2c0] ss:$8 sps:$4 sm:$0xff]  }
 0x103   : > { %1152 = vmatpush1.bf16.msra.mxu1 %v7439_v49 }
 0x104   : > { %1153 = vmatprep.subr.bf16.mxu1 %v7443_v50 }
 0x105   : > { %1199 = vmatpush1.bf16.msra.mxu0 %v7370_v35  ;;  %v7478_v35 = vld [vmem:[#allocation11 + $0x2e4] ss:$8 sps:$4 sm:$0xff]  }
 0x106   : > { %1200 = vmatprep.subr.bf16.mxu0 %v7371_v36  ;;  %v7476_v36 = vld [vmem:[#allocation11 + $0x2e0] ss:$8 sps:$4 sm:$0xff]  }
 0x107   : > { %1154 = vmatpush1.bf16.msra.mxu1 %v7445_v53 }
 0x108   : > { %1155 = vmatprep.subr.bf16.mxu1 %v7449_v54 }
 0x109   : > { %1201 = vmatpush1.bf16.msra.mxu0 %v7373_v39  ;;  %v7488_v39 = vld [vmem:[%s8700_s2 + $0x10] ss:$24 sps:$4 sm:$0xff]  }
 0x10a   : > { %1202 = vmatprep.subr.bf16.mxu0 %v7374_v40 }
 0x10b   : > { %1156 = vmatpush1.bf16.msra.mxu1 %v7451_v58 }
 0x10c   : > { %1157 = vmatprep.subr.bf16.mxu1 %v7455_v59 }
 0x10d   : > { %1203 = vmatpush1.bf16.msra.mxu0 %v7376_v43 }
 0x10e   : > { %1204 = vmatprep.subr.bf16.mxu0 %v7377_v44 }
 0x10f   : > { %1158 = vmatpush1.bf16.msra.mxu1 %v7457_v62 }
 0x110   : > { %1159 = vmatprep.subr.bf16.mxu1 %v7461_v0 }
 0x111   : > { %1205 = vmatpush1.bf16.msra.mxu0 %v7379_v47 }
 0x112   : > { %1206 = vmatprep.subr.bf16.mxu0 %v7380_v48 }
 0x113   : > { %1160 = vmatpush1.bf16.msra.mxu1 %v7463_v4 }
 0x114   : > { %1161 = vmatprep.subr.bf16.mxu1 %v7467_v5 }
 0x115   : > { %1207 = vmatpush1.bf16.msra.mxu0 %v7382_v51 }
 0x116   : > { %1208 = vmatprep.subr.bf16.mxu0 %v7383_v52 }
 0x117   : > { %1162 = vmatpush1.bf16.msra.mxu1 %v7469_v8 }
 0x118   : > { %1163 = vmatprep.subr.bf16.mxu1 %v7473_v9 }
 0x119   : > { %1209 = vmatpush1.bf16.msra.mxu0 %v7387_v55 }
 0x11a   : > { %1221 = vmatprep.subr.bf16.mxu0 %v7394_v56 }
 0x11b   : > { %1164 = vmatpush1.bf16.msra.mxu1 %v7475_v12 }
 0x11c   : > { %1211 = vmatmul.mubr.bf16.vlgmr.msra.gmra.mrb[0].mxu0 %v7389_v57  ;;  %1165 = vmatprep.subr.bf16.mxu1 %v7479_v13 }
 0x11d   : > { %1222 = vmatpush1.bf16.msra.mxu0 %v7392_v60  ;;  %1253 = vmatprep.mubr.bf16.mxu0 %v7490_v3 }
 0x11e   : > { %1223 = vmatprep.subr.bf16.mxu0 %v7400_v61 }
 0x11f   : > { %1166 = vmatpush1.bf16.msra.mxu1 %v7481_v16 }
 0x121   : > { %1224 = vmatpush1.bf16.msra.mxu0 %v7398_v1 }
 0x122   : > { %1225 = vmatprep.subr.bf16.mxu0 %v7406_v2  ;;  %1168 = vmatmul.mubr.bf16.vlgmr.msra.gmra.mrb[0].mxu1 %v7482_v19 }
 0x125   : > { %1226 = vmatpush1.bf16.msra.mxu0 %v7404_v6 }
 0x126   : > { %1227 = vmatprep.subr.bf16.mxu0 %v7412_v7 }
 0x129   : > { %1228 = vmatpush1.bf16.msra.mxu0 %v7410_v10 }
 0x12a   : > { %1229 = vmatprep.subr.bf16.mxu0 %v7418_v11 }
 0x12d   : > { %1230 = vmatpush1.bf16.msra.mxu0 %v7416_v14 }
 0x12e   : > { %1231 = vmatprep.subr.bf16.mxu0 %v7424_v15 }
 0x131   : > { %1232 = vmatpush1.bf16.msra.mxu0 %v7422_v17 }
 0x132   : > { %1233 = vmatprep.subr.bf16.mxu0 %v7430_v18 }
 0x135   : > { %1234 = vmatpush1.bf16.msra.mxu0 %v7428_v20 }
 0x136   : > { %1235 = vmatprep.subr.bf16.mxu0 %v7436_v21 }
 0x139   : > { %1236 = vmatpush1.bf16.msra.mxu0 %v7434_v22 }
 0x13a   : > { %1237 = vmatprep.subr.bf16.mxu0 %v7442_v23 }
 0x13d   : > { %1238 = vmatpush1.bf16.msra.mxu0 %v7440_v24 }
 0x13e   : > { %1239 = vmatprep.subr.bf16.mxu0 %v7448_v25 }
 0x141   : > { %1240 = vmatpush1.bf16.msra.mxu0 %v7446_v26 }
 0x142   : > { %1241 = vmatprep.subr.bf16.mxu0 %v7454_v27 }
 0x145   : > { %1242 = vmatpush1.bf16.msra.mxu0 %v7452_v28 }
 0x146   : > { %1243 = vmatprep.subr.bf16.mxu0 %v7460_v29 }
 0x149   : > { %1244 = vmatpush1.bf16.msra.mxu0 %v7458_v30 }
 0x14a   : > { %1245 = vmatprep.subr.bf16.mxu0 %v7466_v31 }
 0x14d   : > { %1246 = vmatpush1.bf16.msra.mxu0 %v7464_v32 }
 0x14e   : > { %1247 = vmatprep.subr.bf16.mxu0 %v7472_v33 }
 0x151   : > { %1248 = vmatpush1.bf16.msra.mxu0 %v7470_v34 }
 0x152   : > { %1249 = vmatprep.subr.bf16.mxu0 %v7478_v35 }
 0x155   : > { %1250 = vmatpush1.bf16.msra.mxu0 %v7476_v36 }
 0x156   : > { %1251 = vmatprep.subr.bf16.mxu0 %v7487_v37 }
 0x159   : > { %1252 = vmatpush1.bf16.msra.mxu0 %v7485_v38 }
 0x15c   : > { %1254 = vmatmul.mubr.bf16.vlgmr.msra.gmra.mrb[0].mxu0 %v7488_v39 }
 0x1f5   : > { %v1169_v40 = vpop.f32.mrb[0].mxu1 }
 0x1f6   : > { %v1171_v41 = vpop.f32.mrb[1].mxu1 }
 0x1f7   : > { %v1173_v42 = vpop.f32.mrb[2].mxu1 }
 0x1f8   : > { %v1175_v43 = vpop.f32.mrb[3].mxu1 }
 0x22f   : > { %v1255_v44 = vpop.f32.mrb[0].mxu0 }
 0x230   : > { %v7191_v45 = vadd.f32 %v1255_v44, %v1169_v40  ;;  %v1257_v46 = vpop.f32.mrb[1].mxu0 }
 0x231   : > { %v7192_v47 = vadd.f32 %v1257_v46, %v1171_v41  ;;  %v1259_v48 = vpop.f32.mrb[2].mxu0 }
 0x232   : > { %1264 = vst [vmem:[#allocation2] sm:$0xff] %v7191_v45  ;;  %v7193_v49 = vadd.f32 %v1259_v48, %v1173_v42  ;;  %v1261_v50 = vpop.f32.mrb[3].mxu0 }
 0x233   : > { %1265 = vst [vmem:[#allocation2 + $0x8] sm:$0xff] %v7192_v47  ;;  %v7194_v51 = vadd.f32 %v1261_v50, %v1175_v43 }
 0x234   : > { %1266 = vst [vmem:[#allocation2 + $0x10] sm:$0xff] %v7193_v49 }
 0x235   : > { %1267 = vst [vmem:[#allocation2 + $0x18] sm:$0xff] %v7194_v51 }
 0x236 PF: > { %v7493_v52 = vld [vmem:[#allocation12 + $0x4] ss:$8 sps:$4 sm:$0xff]   ;;  %v7495_v53 = vld [vmem:[#allocation12] ss:$8 sps:$4 sm:$0xff]   ;;  %v7496_v54 = vld [vmem:[#allocation12 + $0x14] ss:$8 sps:$4 sm:$0xff]   ;;  %v1530_v1 = vlaneseq }
 0x237   : > { %1479 = vmatprep.subr.bf16.mxu0 %v7493_v52  ;;  %v7498_v55 = vld [vmem:[#allocation12 + $0x10] ss:$8 sps:$4 sm:$0xff]   ;;  %v7499_v56 = vld [vmem:[#allocation12 + $0x24] ss:$8 sps:$4 sm:$0xff]   ;;  %v7501_v57 = vld [vmem:[#allocation12 + $0x20] ss:$8 sps:$4 sm:$0xff]  }
 0x238   : > { %1480 = vmatpush1.bf16.msra.mxu0 %v7495_v53  ;;  %v7502_v58 = vld [vmem:[#allocation12 + $0x34] ss:$8 sps:$4 sm:$0xff]   ;;  %v7504_v59 = vld [vmem:[#allocation12 + $0x30] ss:$8 sps:$4 sm:$0xff]   ;;  %v7505_v60 = vld [vmem:[#allocation12 + $0x44] ss:$8 sps:$4 sm:$0xff]  }
 0x239   : > { %1481 = vmatprep.subr.bf16.mxu0 %v7496_v54  ;;  %v7507_v61 = vld [vmem:[#allocation12 + $0x40] ss:$8 sps:$4 sm:$0xff]   ;;  %v7508_v62 = vld [vmem:[#allocation12 + $0x54] ss:$8 sps:$4 sm:$0xff]   ;;  %v7986_v63 = vmov 1966171168  }
 0x23a   : > { %v1528_v0 = vunpack.c.l.s4 %v7986_v63  ;;  %v7510_v2 = vld [vmem:[#allocation12 + $0x50] ss:$8 sps:$4 sm:$0xff]   ;;  %v7511_v3 = vld [vmem:[#allocation12 + $0x64] ss:$8 sps:$4 sm:$0xff]   ;;  %v8325_v5 = vshrl.u32 %v1530_v1, 7  ;;  %vm1625_vm0 = vcmask 1041409  }
 0x23b   : > { %v7513_v6 = vld [vmem:[#allocation12 + $0x60] ss:$8 sps:$4 sm:$0xff]   ;;  %v6575_v7 = vld.sshfl [vmem:[#allocation4] sm:$0x33 pattern:$0x76325410] }
 0x23c   : > { %1482 = vmatpush1.bf16.msra.mxu0 %v7498_v55  ;;  %v1529_v4 = vunpack.c.0.s8 %v1528_v0  ;;  %v7514_v8 = vld [vmem:[#allocation12 + $0x74] ss:$8 sps:$4 sm:$0xff]   ;;  %v1282_v9 = vcombine.high %v6575_v7, %v6575_v7  ;;  %v7516_v13 = vld [vmem:[#allocation12 + $0x70] ss:$8 sps:$4 sm:$0xff]   ;;  %v7517_v14 = vld [vmem:[#allocation12 + $0x84] ss:$8 sps:$4 sm:$0xff]   ;;  %v1285_v31 = vpack.c.bf16 %v6575_v7, %v6575_v7 }
 0x23d   : > { %1483 = vmatprep.subr.bf16.mxu0 %v7499_v56  ;;  %v7519_v16 = vld [vmem:[#allocation12 + $0x80] ss:$8 sps:$4 sm:$0xff]   ;;  %v7520_v17 = vld [vmem:[#allocation12 + $0x94] ss:$8 sps:$4 sm:$0xff]   ;;  %v7522_v18 = vld [vmem:[#allocation12 + $0x90] ss:$8 sps:$4 sm:$0xff]  }
 0x23e   : > { %v1286_v10 = vpack.c.bf16 %v1282_v9, %v1282_v9  ;;  %v8328_v11 = vsub.s32 %v1529_v4, %v8325_v5  ;;  %v6616_v12 = vpack.c.bf16 %v1282_v9, %v6575_v7  ;;  %v7523_v19 = vld [vmem:[#allocation12 + $0xa4] ss:$8 sps:$4 sm:$0xff]   ;;  %v7525_v20 = vld [vmem:[#allocation12 + $0xa0] ss:$8 sps:$4 sm:$0xff]   ;;  %v7526_v21 = vld [vmem:[#allocation12 + $0xb4] ss:$8 sps:$4 sm:$0xff]  }
 0x23f   : > { %v7528_v22 = vld [vmem:[#allocation12 + $0xb0] ss:$8 sps:$4 sm:$0xff]   ;;  %v7529_v23 = vld [vmem:[#allocation12 + $0xc4] ss:$8 sps:$4 sm:$0xff]   ;;  %v7531_v24 = vld [vmem:[#allocation12 + $0xc0] ss:$8 sps:$4 sm:$0xff]  }
 0x240   : > { %1484 = vmatpush1.bf16.msra.mxu0 %v7501_v57  ;;  %1511 = vmatprep.mubr.bf16.mxu0 %v1286_v10  ;;  %v2061_v15 = vrot.slane %v6616_v12, %v8328_v11  ;;  %v7532_v25 = vld [vmem:[#allocation12 + $0xd4] ss:$8 sps:$4 sm:$0xff]   ;;  %v7534_v26 = vld [vmem:[#allocation12 + $0xd0] ss:$8 sps:$4 sm:$0xff]   ;;  %v7535_v27 = vld [vmem:[#allocation12 + $0xe4] ss:$8 sps:$4 sm:$0xff]  }
 0x241   : > { %1485 = vmatprep.subr.bf16.mxu0 %v7502_v58  ;;  %v7537_v28 = vld [vmem:[#allocation12 + $0xe0] ss:$8 sps:$4 sm:$0xff]   ;;  %v7538_v29 = vld [vmem:[#allocation12 + $0xf4] ss:$8 sps:$4 sm:$0xff]   ;;  %v7540_v30 = vld [vmem:[#allocation12 + $0xf0] ss:$8 sps:$4 sm:$0xff]  }
 0x242   : > { %6617 = vst.sshfl [vmem:[#allocation3 + $0x6] sm:$0x5 pattern:$0x73625140] %v2061_v15  ;;  %v1270_v37 = vld [vmem:[#allocation17] sm:$0x3] }
 0x243   : > { %v8333_v39 = vsub.s32 0, %v8325_v5  ;;  %v8336_v40 = vsub.s32 1, %v8325_v5  ;;  %v1520_v43 = vld [vmem:[#allocation2] sm:$0xff]  ;;  %v1521_v44 = vld [vmem:[#allocation2 + $0x8] sm:$0xff]  ;;  %v1522_v50 = vld [vmem:[#allocation2 + $0x10] sm:$0xff]  ;;  %vm1628_vm1 = vcmask 58368  }
 0x244   : > { %1486 = vmatpush1.bf16.msra.mxu0 %v7504_v59  ;;  %v1523_v51 = vld [vmem:[#allocation2 + $0x18] sm:$0xff]  ;;  %p8755_p8 = scmp.eq.s32.totalorder %s8080_s25, 7 }
 0x245   : > { %1487 = vmatprep.subr.bf16.mxu0 %v7505_v60  ;;  %v1577_v45 = vrot.slane %v1270_v37, %v8333_v39  ;;  %v1581_v49 = vrot.slane %v1270_v37, %v8336_v40  ;;  %v2072_v37 = vld [vmem:[#allocation14] sm:$0xff] }
 0x248   : > { %1488 = vmatpush1.bf16.msra.mxu0 %v7507_v61 }
 0x249   : > { %1489 = vmatprep.subr.bf16.mxu0 %v7508_v62  ;;  %v1271_v62 = vld [vmem:[#allocation17 + $0x2] sm:$0x3] }
 0x24a   : > { %v1596_v63 = vrot.slane %v1271_v62, %v8333_v39  ;;  %v1600_v0 = vrot.slane %v1271_v62, %v8336_v40  ;;  %v2088_v62 = vld [vmem:[#allocation14 + $0x80] sm:$0xff] }
 0x24c   : > { %1490 = vmatpush1.bf16.msra.mxu0 %v7510_v2 }
 0x24d   : > { %1491 = vmatprep.subr.bf16.mxu0 %v7511_v3 }
 0x250   : > { %1492 = vmatpush1.bf16.msra.mxu0 %v7513_v6 }
 0x251   : > { %1493 = vmatprep.subr.bf16.mxu0 %v7514_v8 }
 0x254   : > { %1494 = vmatpush1.bf16.msra.mxu0 %v7516_v13 }
 0x255   : > { %1495 = vmatprep.subr.bf16.mxu0 %v7517_v14  ;;  %v1616_v14 = vand.u32 127, %v1530_v1 }
 0x258   : > { %1496 = vmatpush1.bf16.msra.mxu0 %v7519_v16  ;;  %v8350_v16 = vsub.s32 %v1616_v14, %v8325_v5  ;;  %v2228_v14 = vld [vmem:[#allocation14 + $0x4e0] sm:$0xff] }
 0x259   : > { %1497 = vmatprep.subr.bf16.mxu0 %v7520_v17 }
 0x25c   : > { %1498 = vmatpush1.bf16.msra.mxu0 %v7522_v18 }
 0x25d   : > { %1499 = vmatprep.subr.bf16.mxu0 %v7523_v19 }
 0x260   : > { %1500 = vmatpush1.bf16.msra.mxu0 %v7525_v20 }
 0x261   : > { %1501 = vmatprep.subr.bf16.mxu0 %v7526_v21 }
 0x264   : > { %1502 = vmatpush1.bf16.msra.mxu0 %v7528_v22  ;;  %v7987_v22 = vmov 0  }
 0x265   : > { %1503 = vmatprep.subr.bf16.mxu0 %v7529_v23  ;;  %7492 = vset.pattern.permute.xlu0 %v7987_v22 }
 0x266   : > { %7491 = vset.pattern.permute.xlu1 %v7987_v22  ;;  %v2232_v22 = vld [vmem:[#allocation14 + $0x500] sm:$0xff] }
 0x268   : > { %1504 = vmatpush1.bf16.msra.mxu0 %v7531_v24 }
 0x269   : > { %1505 = vmatprep.subr.bf16.mxu0 %v7532_v25 }
 0x26c   : > { %1506 = vmatpush1.bf16.msra.mxu0 %v7534_v26 }
 0x26d   : > { %1507 = vmatprep.subr.bf16.mxu0 %v7535_v27 }
 0x270   : > { %1508 = vmatpush1.bf16.msra.mxu0 %v7537_v28 }
 0x271   : > { %1509 = vmatprep.subr.bf16.mxu0 %v7538_v29 }
 0x274   : > { %1510 = vmatpush1.bf16.msra.mxu0 %v7540_v30 }
 0x277   : > { %1512 = vmatmul.mubr.bf16.vlgmr.msra.gmra.mrb[0].mxu0 %v1285_v31 }
 0x34a   : > { %v1513_v32 = vpop.f32.mrb[0].mxu0 }
 0x34b   : > { %v1515_v33 = vpop.f32.mrb[1].mxu0 }
 0x34c   : > { %v1526_v34 = vcombine.low %v1513_v32, %v1515_v33  ;;  %v1517_v35 = vpop.f32.mrb[2].mxu0 }
 0x34d   : > { %v1518_v36 = vpop.f32.mrb[3].mxu0 }
 0x34e   : > { %v1533_v38 = vrot.slane %v1526_v34, %v8328_v11 }
 0x350   : > { %v1534_v41 = vcombine.high %v1533_v38, %v1533_v38  ;;  %v1541_v42 = vrot.slane %v1533_v38, %v8328_v11  ;;  %v2076_v38 = vld [vmem:[#allocation14 + $0x20] sm:$0xff] }
 0x352   : > { %v1548_v46 = vrot.slane %v1534_v41, %v8328_v11  ;;  %v1552_v47 = vrot.slane %v1541_v42, %v8333_v39  ;;  %v1556_v48 = vrot.slane %v1541_v42, %v8336_v40  ;;  %v2200_v41 = vld [vmem:[#allocation14 + $0x400] sm:$0xff]  ;;  %v6619_v42 = vcombine.high %v2072_v37, %v2076_v38 }
 0x354   : > { %v1560_v52 = vrot.slane %v1548_v46, %v8333_v39  ;;  %v1564_v53 = vrot.slane %v1548_v46, %v8336_v40  ;;  %v1569_v54 = vadd.f32 %v1552_v47, %v1520_v43  ;;  %v1570_v55 = vadd.f32 %v1556_v48, %v1521_v44  ;;  %v2204_v44 = vld [vmem:[#allocation14 + $0x420] sm:$0xff]  ;;  %5243 = vmatprep.subr.bf16.mxu1 %v6619_v42 }
 0x355   : > { %v6618_v43 = vcombine.low %v2072_v37, %v2076_v38  ;;  %v6747_v46 = vcombine.high %v2200_v41, %v2204_v44  ;;  %v2248_v37 = vld [vmem:[#allocation14 + $0x580] sm:$0xff] }
 0x356   : > { %v1571_v56 = vadd.f32 %v1560_v52, %v1522_v50  ;;  %v1572_v57 = vadd.f32 %v1564_v53, %v1523_v51  ;;  %v1584_v58 = vadd.f32 %v1577_v45, %v1569_v54  ;;  %v1585_v59 = vadd.f32 %v1581_v49, %v1570_v55  ;;  %v2080_v53 = vld [vmem:[#allocation14 + $0x40] sm:$0xff] }
 0x357   : > { %5244 = vmatpush1.bf16.msra.mxu1 %v6618_v43  ;;  %5284 = vmatprep.subr.bf16.mxu0 %v6747_v46  ;;  %v2084_v54 = vld [vmem:[#allocation14 + $0x60] sm:$0xff] }
 0x358   : > { %v1586_v60 = vadd.f32 %v1577_v45, %v1571_v56  ;;  %v1587_v61 = vadd.f32 %v1581_v49, %v1572_v57  ;;  %7560 = vtanh.f32 %v1584_v58  ;;  %v6746_v45 = vcombine.low %v2200_v41, %v2204_v44  ;;  %v2208_v57 = vld [vmem:[#allocation14 + $0x440] sm:$0xff] }
 0x359   : > { %7562 = vtanh.f32 %v1585_v59  ;;  %v6627_v55 = vcombine.high %v2080_v53, %v2084_v54  ;;  %v6626_v56 = vcombine.low %v2080_v53, %v2084_v54  ;;  %v2212_v58 = vld [vmem:[#allocation14 + $0x460] sm:$0xff] }
 0x35a   : > { %7564 = vtanh.f32 %v1586_v60  ;;  %5285 = vmatpush1.bf16.msra.mxu0 %v6746_v45  ;;  %v6755_v60 = vcombine.high %v2208_v57, %v2212_v58  ;;  %v2252_v38 = vld [vmem:[#allocation14 + $0x5a0] sm:$0xff] }
 0x35b   : > { %7566 = vtanh.f32 %v1587_v61  ;;  %5245 = vmatprep.subr.bf16.mxu1 %v6627_v55  ;;  %v6754_v61 = vcombine.low %v2208_v57, %v2212_v58  ;;  %v6795_v41 = vcombine.high %v2248_v37, %v2252_v38  ;;  %v6794_v42 = vcombine.low %v2248_v37, %v2252_v38  ;;  %v2128_v43 = vld [vmem:[#allocation14 + $0x1c0] sm:$0xff] }
 0x35c   : > { %5246 = vmatpush1.bf16.msra.mxu1 %v6626_v56  ;;  %5286 = vmatprep.subr.bf16.mxu0 %v6755_v60  ;;  %v2132_v44 = vld [vmem:[#allocation14 + $0x1e0] sm:$0xff] }
 0x35d   : > { %v6675_v45 = vcombine.high %v2128_v43, %v2132_v44  ;;  %v6674_v46 = vcombine.low %v2128_v43, %v2132_v44  ;;  %v2264_v55 = vld [vmem:[#allocation14 + $0x600] sm:$0xff] }
 0x35e   : > { %5287 = vmatpush1.bf16.msra.mxu0 %v6754_v61  ;;  %v2268_v56 = vld [vmem:[#allocation14 + $0x620] sm:$0xff] }
 0x35f   : > { %v6811_v57 = vcombine.high %v2264_v55, %v2268_v56  ;;  %v6810_v58 = vcombine.low %v2264_v55, %v2268_v56  ;;  %v2148_v60 = vld [vmem:[#allocation14 + $0x260] sm:$0xff] }
 0x360   : > { %v2184_v37 = vld [vmem:[#allocation14 + $0x380] sm:$0xff] }
 0x361   : > { %v2188_v38 = vld [vmem:[#allocation14 + $0x3a0] sm:$0xff] }
 0x362   : > { %v7561_v2 = vpop.eup %7560  ;;  %v2316_v43 = vld [vmem:[#allocation14 + $0x7a0] sm:$0xff] }
 0x363   : > { %v7563_v3 = vpop.eup %7562  ;;  %v1603_v4 = vmul.f32 %v7561_v2, %v1596_v63  ;;  %v8364_v56 = vld [vmem:[#allocation14 + $0x800] sm:$0xff] }
 0x364   : > { %v7565_v6 = vpop.eup %7564  ;;  %v1604_v7 = vmul.f32 %v7563_v3, %v1600_v0  ;;  %v2216_v3 = vld [vmem:[#allocation14 + $0x480] sm:$0xff] }
 0x365   : > { %v7567_v8 = vpop.eup %7566  ;;  %v1605_v10 = vmul.f32 %v7565_v6, %v1596_v63  ;;  %v2092_v63 = vld [vmem:[#allocation14 + $0xa0] sm:$0xff] }
 0x366   : > { %v1607_v9 = vadd.f32 %v1604_v7, %v1603_v4  ;;  %v1606_v12 = vmul.f32 %v7567_v8, %v1600_v0  ;;  %v6635_v0 = vcombine.high %v2088_v62, %v2092_v63  ;;  %v6634_v2 = vcombine.low %v2088_v62, %v2092_v63  ;;  %v2220_v4 = vld [vmem:[#allocation14 + $0x4a0] sm:$0xff] }
 0x367   : > { %v6763_v6 = vcombine.high %v2216_v3, %v2220_v4  ;;  %v6762_v7 = vcombine.low %v2216_v3, %v2220_v4  ;;  %v2096_v8 = vld [vmem:[#allocation14 + $0xc0] sm:$0xff] }
 0x368   : > { %1608 = vadd.xlane.f32.xlu0 %v1607_v9  ;;  %v1610_v13 = vadd.f32 %v1606_v12, %v1605_v10  ;;  %5247 = vmatprep.subr.bf16.mxu1 %v6635_v0  ;;  %v2100_v9 = vld [vmem:[#allocation14 + $0xe0] sm:$0xff] }
 0x369   : > { %5248 = vmatpush1.bf16.msra.mxu1 %v6634_v2  ;;  %5288 = vmatprep.subr.bf16.mxu0 %v6763_v6  ;;  %v6643_v10 = vcombine.high %v2096_v8, %v2100_v9  ;;  %v6642_v12 = vcombine.low %v2096_v8, %v2100_v9  ;;  %v2272_v63 = vld [vmem:[#allocation14 + $0x640] sm:$0xff] }
 0x36a   : > { %5289 = vmatpush1.bf16.msra.mxu0 %v6762_v7  ;;  %v2276_v0 = vld [vmem:[#allocation14 + $0x660] sm:$0xff] }
 0x36b   : > { %5249 = vmatprep.subr.bf16.mxu1 %v6643_v10  ;;  %v6819_v2 = vcombine.high %v2272_v63, %v2276_v0  ;;  %v6818_v3 = vcombine.low %v2272_v63, %v2276_v0  ;;  %v2152_v4 = vld [vmem:[#allocation14 + $0x280] sm:$0xff] }
 0x36c   : > { %1611 = vadd.xlane.f32.xlu0 %v1610_v13  ;;  %v2224_v13 = vld [vmem:[#allocation14 + $0x4c0] sm:$0xff] }
 0x36d   : > { %5250 = vmatpush1.bf16.msra.mxu1 %v6642_v12  ;;  %v2156_v6 = vld [vmem:[#allocation14 + $0x2a0] sm:$0xff] }
 0x36e   : > { %v6699_v7 = vcombine.high %v2152_v4, %v2156_v6  ;;  %v6698_v8 = vcombine.low %v2152_v4, %v2156_v6  ;;  %v2280_v9 = vld [vmem:[#allocation14 + $0x680] sm:$0xff] }
 0x36f   : > { %v2284_v10 = vld [vmem:[#allocation14 + $0x6a0] sm:$0xff] }
 0x370   : > { %v6827_v12 = vcombine.high %v2280_v9, %v2284_v10  ;;  %v1707_v0 = vld [vmem:[%s8700_s2 + $0x18] sm:$0xff] }
 0x371   : > { %v1716_v4 = vunpack.c.l.bf16 %v1707_v0  ;;  %v1717_v6 = vunpack.c.h.bf16 %v1707_v0 }
 0x3f5   : > { %v1609_v15 = vpop.xlane.xlu0 %1608 }
 0x3f6   : > { %v1620_v18 = vrot.slane %v1609_v15, %v8350_v16 }
 0x3f9   : > { %v1612_v17 = vpop.xlane.xlu0 %1611 }
 0x3fa   : > { %v1624_v19 = vrot.slane %v1612_v17, %v8350_v16 }
 0x3fc   : > { %v1626_v20 = vsel %vm1625_vm0, %v1624_v19, %v1620_v18  ;;  %v2104_v18 = vld [vmem:[#allocation14 + $0x100] sm:$0xff] }
 0x3fd   : > { %v1629_v21 = vsel %vm1628_vm1, %v1626_v20, -inf  ;;  %v2108_v19 = vld [vmem:[#allocation14 + $0x120] sm:$0xff] }
 0x3fe   : > { %1630 = vmax.xlane.f32.xlu1 %v1629_v21  ;;  %v6651_v20 = vcombine.high %v2104_v18, %v2108_v19  ;;  %v6650_v21 = vcombine.low %v2104_v18, %v2108_v19  ;;  %v2288_v19 = vld [vmem:[#allocation14 + $0x6c0] sm:$0xff] }
 0x400   : > { %5251 = vmatprep.subr.bf16.mxu1 %v6651_v20  ;;  %v2292_v20 = vld [vmem:[#allocation14 + $0x6e0] sm:$0xff] }
 0x401   : > { %5252 = vmatpush1.bf16.msra.mxu1 %v6650_v21  ;;  %v6835_v21 = vcombine.high %v2288_v19, %v2292_v20 }
 0x48b   : > { %v1631_v1 = vpop.xlane.xlu1 %1630 }
 0x48c   : > { %v1636_v23 = vrot.slane %v1631_v1, %v8333_v39  ;;  %v1640_v24 = vrot.slane %v1631_v1, %v8336_v40  ;;  %v2236_v1 = vld [vmem:[#allocation14 + $0x520] sm:$0xff] }
 0x48e   : > { %v1643_v25 = vsub.f32 %v1609_v15, %v1636_v23  ;;  %v1644_v26 = vsub.f32 %v1612_v17, %v1640_v24  ;;  %v6771_v15 = vcombine.high %v2224_v13, %v2228_v14  ;;  %v6770_v17 = vcombine.low %v2224_v13, %v2228_v14  ;;  %v2160_v14 = vld [vmem:[#allocation14 + $0x2c0] sm:$0xff] }
 0x48f   : > { %v6779_v23 = vcombine.high %v2232_v22, %v2236_v1  ;;  %v6778_v24 = vcombine.low %v2232_v22, %v2236_v1  ;;  %v6826_v13 = vcombine.low %v2280_v9, %v2284_v10  ;;  %v6834_v22 = vcombine.low %v2288_v19, %v2292_v20  ;;  %v2168_v1 = vld [vmem:[#allocation14 + $0x300] sm:$0xff]  ;;  %v1704_v9 = vld [vmem:[%s8700_s2] sm:$0xff] }
 0x490   : > { %v1645_v27 = vmul.f32 1.442695, %v1643_v25  ;;  %v1647_v28 = vmul.f32 1.442695, %v1644_v26  ;;  %5290 = vmatprep.subr.bf16.mxu0 %v6771_v15  ;;  %v2112_v25 = vld [vmem:[#allocation14 + $0x140] sm:$0xff]  ;;  %v1711_v19 = vunpack.c.h.bf16 %v1704_v9 }
 0x491   : > { %5291 = vmatpush1.bf16.msra.mxu0 %v6770_v17  ;;  %v2116_v26 = vld [vmem:[#allocation14 + $0x160] sm:$0xff] }
 0x492   : > { %7568 = vpow2.f32 %v1645_v27  ;;  %5292 = vmatprep.subr.bf16.mxu0 %v6779_v23  ;;  %v6659_v27 = vcombine.high %v2112_v25, %v2116_v26  ;;  %v2164_v15 = vld [vmem:[#allocation14 + $0x2e0] sm:$0xff] }
 0x493   : > { %7570 = vpow2.f32 %v1647_v28  ;;  %v6658_v28 = vcombine.low %v2112_v25, %v2116_v26  ;;  %v6707_v17 = vcombine.high %v2160_v14, %v2164_v15  ;;  %v6706_v18 = vcombine.low %v2160_v14, %v2164_v15  ;;  %v2172_v23 = vld [vmem:[#allocation14 + $0x320] sm:$0xff] }
 0x494   : > { %5253 = vmatprep.subr.bf16.mxu1 %v6659_v27  ;;  %v6714_v25 = vcombine.low %v2168_v1, %v2172_v23  ;;  %v2296_v26 = vld [vmem:[#allocation14 + $0x700] sm:$0xff]  ;;  %v7988_v14 = vmov 1935823168  }
 0x495   : > { %5293 = vmatpush1.bf16.msra.mxu0 %v6778_v24  ;;  %5254 = vmatpush1.bf16.msra.mxu1 %v6658_v28  ;;  %v6715_v24 = vcombine.high %v2168_v1, %v2172_v23  ;;  %v2300_v27 = vld [vmem:[#allocation14 + $0x720] sm:$0xff]  ;;  %v8395_v15 = vunpack.c.l.s4 %v7988_v14  ;;  %v1706_v23 = vld [vmem:[%s8700_s2 + $0x10] sm:$0xff] }
 0x496   : > { %v2176_v28 = vld [vmem:[#allocation14 + $0x340] sm:$0xff] }
 0x49c   : > { %v7569_v29 = vpop.eup %7568 }
 0x49d   : > { %v7571_v30 = vpop.eup %7570  ;;  %1652 = vperm.xlu1 %7491, %v7569_v29  }
 0x49e   : > { %1655 = vperm.xlu0 %7492, %v7571_v30  }
 0x51c   : > { %v1653_v31 = vpop.permute.xlu1 %1652 }
 0x51d   : > { %v1656_v32 = vpop.permute.xlu0 %1655  ;;  %v1660_v33 = vrot.slane %v1653_v31, %v8350_v16 }
 0x51e   : > { %v1664_v34 = vrot.slane %v1656_v32, %v8350_v16 }
 0x520   : > { %v1665_v35 = vsel %vm1625_vm0, %v1664_v34, %v1660_v33  ;;  %v2120_v33 = vld [vmem:[#allocation14 + $0x180] sm:$0xff] }
 0x521   : > { %v1667_v36 = vsel %vm1628_vm1, %v1665_v35, 0.0  ;;  %v2124_v34 = vld [vmem:[#allocation14 + $0x1a0] sm:$0xff] }
 0x522   : > { %1668 = vadd.xlane.f32.xlu1 %v1667_v36  ;;  %v6667_v35 = vcombine.high %v2120_v33, %v2124_v34  ;;  %v6666_v36 = vcombine.low %v2120_v33, %v2124_v34  ;;  %v2308_v33 = vld [vmem:[#allocation14 + $0x760] sm:$0xff] }
 0x524   : > { %5255 = vmatprep.subr.bf16.mxu1 %v6667_v35 }
 0x525   : > { %5256 = vmatpush1.bf16.msra.mxu1 %v6666_v36 }
 0x526   : > { %5257 = vmatprep.subr.bf16.mxu1 %v6675_v45  ;;  %v2192_v45 = vld [vmem:[#allocation14 + $0x3c0] sm:$0xff] }
 0x529   : > { %5258 = vmatpush1.bf16.msra.mxu1 %v6674_v46  ;;  %v2196_v46 = vld [vmem:[#allocation14 + $0x3e0] sm:$0xff] }
 0x5af   : > { %v1669_v47 = vpop.xlane.xlu1 %1668 }
 0x5b0   : > { %v1678_v48 = vrot.slane %v1669_v47, %v8336_v40  ;;  %v1674_v49 = vrot.slane %v1669_v47, %v8333_v39  ;;  %v2256_v47 = vld [vmem:[#allocation14 + $0x5c0] sm:$0xff] }
 0x5b2   : > { %7572 = vrcp.f32 %v1678_v48  ;;  %v2260_v48 = vld [vmem:[#allocation14 + $0x5e0] sm:$0xff] }
 0x5b3   : > { %7574 = vrcp.f32 %v1674_v49  ;;  %v6803_v49 = vcombine.high %v2256_v47, %v2260_v48 }
 0x5bc   : > { %v7573_v50 = vpop.eup %7572 }
 0x5bd   : > { %v1684_v51 = vmul.f32 %v7573_v50, %v7571_v30  ;;  %v7575_v52 = vpop.eup %7574  ;;  %v2244_v30 = vld [vmem:[#allocation14 + $0x560] sm:$0xff]  ;;  %v6802_v50 = vcombine.low %v2256_v47, %v2260_v48  ;;  %v6730_v48 = vcombine.low %v2184_v37, %v2188_v38 }
 0x5be   : > { %v1682_v59 = vmul.f32 %v7575_v52, %v7569_v29  ;;  %v2240_v29 = vld [vmem:[#allocation14 + $0x540] sm:$0xff] }
 0x5bf   : > { %1691 = vperm.xlu0 %7492, %v1684_v51   ;;  %v6787_v31 = vcombine.high %v2240_v29, %v2244_v30  ;;  %v6786_v32 = vcombine.low %v2240_v29, %v2244_v30  ;;  %v2136_v51 = vld [vmem:[#allocation14 + $0x200] sm:$0xff]  ;;  %v6842_v29 = vcombine.low %v2296_v26, %v2300_v27  ;;  %v6843_v30 = vcombine.high %v2296_v26, %v2300_v27 }
 0x5c0   : > { %v2140_v52 = vld [vmem:[#allocation14 + $0x220] sm:$0xff] }
 0x5c1   : > { %5294 = vmatprep.subr.bf16.mxu0 %v6787_v31  ;;  %v6683_v53 = vcombine.high %v2136_v51, %v2140_v52  ;;  %v6682_v54 = vcombine.low %v2136_v51, %v2140_v52  ;;  %v2180_v31 = vld [vmem:[#allocation14 + $0x360] sm:$0xff]  ;;  %v6739_v51 = vcombine.high %v2192_v45, %v2196_v46 }
 0x5c2   : > { %5295 = vmatpush1.bf16.msra.mxu0 %v6786_v32  ;;  %v2304_v32 = vld [vmem:[#allocation14 + $0x740] sm:$0xff]  ;;  %v6723_v34 = vcombine.high %v2176_v28, %v2180_v31  ;;  %v6722_v35 = vcombine.low %v2176_v28, %v2180_v31 }
 0x5c3   : > { %1688 = vperm.xlu0 %7492, %v1682_v59   ;;  %5296 = vmatprep.subr.bf16.mxu0 %v6795_v41  ;;  %v2144_v59 = vld [vmem:[#allocation14 + $0x240] sm:$0xff]  ;;  %v6851_v36 = vcombine.high %v2304_v32, %v2308_v33  ;;  %v6850_v44 = vcombine.low %v2304_v32, %v2308_v33 }
 0x5c4   : > { %5259 = vmatprep.subr.bf16.mxu1 %v6683_v53  ;;  %v6691_v61 = vcombine.high %v2144_v59, %v2148_v60  ;;  %v6690_v62 = vcombine.low %v2144_v59, %v2148_v60  ;;  %v2312_v41 = vld [vmem:[#allocation14 + $0x780] sm:$0xff] }
 0x5c5   : > { %5260 = vmatpush1.bf16.msra.mxu1 %v6682_v54  ;;  %v6859_v47 = vcombine.high %v2312_v41, %v2316_v43  ;;  %v6858_v52 = vcombine.low %v2312_v41, %v2316_v43  ;;  %v6738_v54 = vcombine.low %v2192_v45, %v2196_v46  ;;  %v8372_v60 = vld [vmem:[#allocation14 + $0xc00] sm:$0xff] }
 0x5c6   : > { %5297 = vmatpush1.bf16.msra.mxu0 %v6794_v42  ;;  %5261 = vmatprep.subr.bf16.mxu1 %v6691_v61  ;;  %v6731_v42 = vcombine.high %v2184_v37, %v2188_v38  ;;  %v8374_v61 = vld [vmem:[#allocation14 + $0xc20] sm:$0xff] }
 0x5c7   : > { %5298 = vmatprep.subr.bf16.mxu0 %v6803_v49  ;;  %v2320_v49 = vld [vmem:[#allocation14 + $0x7c0] sm:$0xff]  ;;  %v7003_v63 = vcombine.high %v8372_v60, %v8374_v61 }
 0x5c9   : > { %5262 = vmatpush1.bf16.msra.mxu1 %v6690_v62  ;;  %v7002_v62 = vcombine.low %v8372_v60, %v8374_v61 }
 0x5ca   : > { %5299 = vmatpush1.bf16.msra.mxu0 %v6802_v50  ;;  %5263 = vmatprep.subr.bf16.mxu1 %v6699_v7  ;;  %v2324_v50 = vld [vmem:[#allocation14 + $0x7e0] sm:$0xff] }
 0x5cb   : > { %5300 = vmatprep.subr.bf16.mxu0 %v6811_v57  ;;  %v6867_v53 = vcombine.high %v2320_v49, %v2324_v50  ;;  %v6866_v55 = vcombine.low %v2320_v49, %v2324_v50  ;;  %v8366_v57 = vld [vmem:[#allocation14 + $0x820] sm:$0xff] }
 0x5cc   : > { %v6875_v59 = vcombine.high %v8364_v56, %v8366_v57 }
 0x5cd   : > { %5264 = vmatpush1.bf16.msra.mxu1 %v6698_v8 }
 0x5ce   : > { %5301 = vmatpush1.bf16.msra.mxu0 %v6810_v58  ;;  %5265 = vmatprep.subr.bf16.mxu1 %v6707_v17  ;;  %v6874_v58 = vcombine.low %v8364_v56, %v8366_v57  ;;  %v2352_v57 = vld [vmem:[#allocation14 + $0x8c0] sm:$0xff] }
 0x5cf   : > { %5302 = vmatprep.subr.bf16.mxu0 %v6819_v2  ;;  %v1708_v2 = vld [vmem:[%s8700_s2 + $0x20] sm:$0xff] }
 0x5d0   : > { %v1718_v7 = vunpack.c.l.bf16 %v1708_v2  ;;  %v1719_v8 = vunpack.c.h.bf16 %v1708_v2 }
 0x5d1   : > { %5266 = vmatpush1.bf16.msra.mxu1 %v6706_v18  ;;  %v1710_v18 = vunpack.c.l.bf16 %v1704_v9 }
 0x5d2   : > { %5303 = vmatpush1.bf16.msra.mxu0 %v6818_v3  ;;  %5267 = vmatprep.subr.bf16.mxu1 %v6715_v24  ;;  %v1709_v3 = vld [vmem:[%s8700_s2 + $0x28] sm:$0xff] }
 0x5d3   : > { %5304 = vmatprep.subr.bf16.mxu0 %v6827_v12  ;;  %v1720_v10 = vunpack.c.l.bf16 %v1709_v3  ;;  %v1721_v12 = vunpack.c.h.bf16 %v1709_v3 }
 0x5d5   : > { %5268 = vmatpush1.bf16.msra.mxu1 %v6714_v25 }
 0x5d6   : > { %5305 = vmatpush1.bf16.msra.mxu0 %v6826_v13  ;;  %5269 = vmatprep.subr.bf16.mxu1 %v6723_v34  ;;  %v1705_v13 = vld [vmem:[%s8700_s2 + $0x8] sm:$0xff]  ;;  %v1714_v34 = vunpack.c.l.bf16 %v1706_v23 }
 0x5d7   : > { %5306 = vmatprep.subr.bf16.mxu0 %v6835_v21  ;;  %v1712_v26 = vunpack.c.l.bf16 %v1705_v13  ;;  %v1713_v27 = vunpack.c.h.bf16 %v1705_v13 }
 0x5d9   : > { %5270 = vmatpush1.bf16.msra.mxu1 %v6722_v35  ;;  %v1715_v35 = vunpack.c.h.bf16 %v1706_v23 }
 0x5da   : > { %5307 = vmatpush1.bf16.msra.mxu0 %v6834_v22  ;;  %5271 = vmatprep.subr.bf16.mxu1 %v6731_v42 }
 0x5db   : > { %5308 = vmatprep.subr.bf16.mxu0 %v6843_v30 }
 0x5dd   : > { %5272 = vmatpush1.bf16.msra.mxu1 %v6730_v48 }
 0x5de   : > { %5309 = vmatpush1.bf16.msra.mxu0 %v6842_v29  ;;  %5273 = vmatprep.subr.bf16.mxu1 %v6739_v51 }
 0x5df   : > { %5310 = vmatprep.subr.bf16.mxu0 %v6851_v36 }
 0x5e1   : > { %5274 = vmatpush1.bf16.msra.mxu1 %v6738_v54 }
 0x5e2   : > { %5311 = vmatpush1.bf16.msra.mxu0 %v6850_v44  ;;  %5325 = vmatprep.subr.bf16.mxu1 %v6875_v59 }
 0x5e3   : > { %5312 = vmatprep.subr.bf16.mxu0 %v6859_v47 }
 0x5e6   : > { %5313 = vmatpush1.bf16.msra.mxu0 %v6858_v52 }
 0x5e7   : > { %5314 = vmatprep.subr.bf16.mxu0 %v6867_v53 }
 0x5ea   : > { %5315 = vmatpush1.bf16.msra.mxu0 %v6866_v55 }
 0x5eb   : > { %5366 = vmatprep.subr.bf16.mxu0 %v7003_v63 }
 0x63e   : > { %v8397_v17 = vpop.permute.xlu0 %1691 }
 0x63f   : > { %v1730_v20 = vmul.f32 %v1716_v4, %v8397_v17  ;;  %v1731_v21 = vmul.f32 %v1717_v6, %v8397_v17  ;;  %v1732_v22 = vmul.f32 %v1718_v7, %v8397_v17  ;;  %v1733_v1 = vmul.f32 %v1719_v8, %v8397_v17 }
 0x640   : > { %v1734_v24 = vmul.f32 %v1720_v10, %v8397_v17  ;;  %v1735_v25 = vmul.f32 %v1721_v12, %v8397_v17 }
 0x641   : > { %v1772_v28 = vrot.slane %v1730_v20, 4  ;;  %v1778_v29 = vrot.slane %v1731_v21, 4  ;;  %v1784_v30 = vrot.slane %v1732_v22, 4  ;;  %v1790_v31 = vrot.slane %v1733_v1, 4 }
 0x642   : > { %v1796_v32 = vrot.slane %v1734_v24, 4  ;;  %v1802_v33 = vrot.slane %v1735_v25, 4  ;;  %v8408_v36 = vpop.permute.xlu0 %1688 }
 0x643   : > { %v1773_v37 = vadd.f32 %v1772_v28, %v1730_v20  ;;  %v1779_v38 = vadd.f32 %v1778_v29, %v1731_v21  ;;  %v1785_v41 = vadd.f32 %v1784_v30, %v1732_v22  ;;  %v1791_v42 = vadd.f32 %v1790_v31, %v1733_v1 }
 0x644   : > { %v1797_v43 = vadd.f32 %v1796_v32, %v1734_v24  ;;  %v1803_v44 = vadd.f32 %v1802_v33, %v1735_v25  ;;  %v1724_v45 = vmul.f32 %v1710_v18, %v8408_v36  ;;  %v1725_v46 = vmul.f32 %v1711_v19, %v8408_v36 }
 0x645   : > { %v1774_v47 = vrot.slane %v1773_v37, 2  ;;  %v1780_v48 = vrot.slane %v1779_v38, 2  ;;  %v1786_v49 = vrot.slane %v1785_v41, 2  ;;  %v1792_v50 = vrot.slane %v1791_v42, 2 }
 0x646   : > { %v1798_v51 = vrot.slane %v1797_v43, 2  ;;  %v1804_v52 = vrot.slane %v1803_v44, 2  ;;  %v1726_v53 = vmul.f32 %v1712_v26, %v8408_v36  ;;  %v1727_v54 = vmul.f32 %v1713_v27, %v8408_v36 }
 0x647   : > { %v1775_v55 = vadd.f32 %v1774_v47, %v1773_v37  ;;  %v1781_v59 = vadd.f32 %v1780_v48, %v1779_v38  ;;  %v1787_v63 = vadd.f32 %v1786_v49, %v1785_v41  ;;  %v1793_v0 = vadd.f32 %v1792_v50, %v1791_v42 }
 0x648   : > { %v1799_v2 = vadd.f32 %v1798_v51, %v1797_v43  ;;  %v1805_v3 = vadd.f32 %v1804_v52, %v1803_v44  ;;  %v1728_v4 = vmul.f32 %v1714_v34, %v8408_v36  ;;  %v1729_v6 = vmul.f32 %v1715_v35, %v8408_v36 }
 0x649   : > { %v1776_v7 = vrot.slane %v1775_v55, 1  ;;  %v1782_v8 = vrot.slane %v1781_v59, 1  ;;  %v1788_v9 = vrot.slane %v1787_v63, 1  ;;  %v1794_v10 = vrot.slane %v1793_v0, 1 }
 0x64a   : > { %v1800_v12 = vrot.slane %v1799_v2, 1  ;;  %v1806_v13 = vrot.slane %v1805_v3, 1  ;;  %v1736_v14 = vrot.slane %v1724_v45, 4  ;;  %v1742_v18 = vrot.slane %v1725_v46, 4 }
 0x64b   : > { %v1777_v19 = vadd.f32 %v1776_v7, %v1775_v55  ;;  %v1783_v20 = vadd.f32 %v1782_v8, %v1781_v59  ;;  %v1789_v21 = vadd.f32 %v1788_v9, %v1787_v63  ;;  %v1795_v22 = vadd.f32 %v1794_v10, %v1793_v0 }
 0x64c   : > { %v1801_v1 = vadd.f32 %v1800_v12, %v1799_v2  ;;  %v1807_v23 = vadd.f32 %v1806_v13, %v1805_v3  ;;  %v1737_v24 = vadd.f32 %v1736_v14, %v1724_v45  ;;  %v1743_v25 = vadd.f32 %v1742_v18, %v1725_v46 }
 0x64d   : > { %v6611_v26 = vpack.c.bf16 %v1783_v20, %v1777_v19  ;;  %v6612_v27 = vpack.c.bf16 %v1795_v22, %v1789_v21  ;;  %v1748_v28 = vrot.slane %v1726_v53, 4  ;;  %v1754_v29 = vrot.slane %v1727_v54, 4 }
 0x64e   : > { %v6613_v30 = vpack.c.bf16 %v1807_v23, %v1801_v1  ;;  %v1738_v31 = vrot.slane %v1737_v24, 2  ;;  %v1744_v32 = vrot.slane %v1743_v25, 2  ;;  %v1760_v33 = vrot.slane %v1728_v4, 4 }
 0x64f   : > { %v1881_v34 = vrot.slane %v6611_v26, %v8328_v11  ;;  %v1888_v35 = vrot.slane %v6612_v27, %v8328_v11  ;;  %v1749_v37 = vadd.f32 %v1748_v28, %v1726_v53  ;;  %v1755_v38 = vadd.f32 %v1754_v29, %v1727_v54 }
 0x650   : > { %v1895_v41 = vrot.slane %v6613_v30, %v8328_v11  ;;  %v1739_v42 = vadd.f32 %v1738_v31, %v1737_v24  ;;  %v1745_v43 = vadd.f32 %v1744_v32, %v1743_v25  ;;  %v1761_v44 = vadd.f32 %v1760_v33, %v1728_v4 }
 0x651   : > { %v1896_v45 = vcombine.low %v1881_v34, %v1888_v35  ;;  %v1750_v46 = vrot.slane %v1749_v37, 2  ;;  %v1756_v47 = vrot.slane %v1755_v38, 2  ;;  %v1766_v48 = vrot.slane %v1729_v6, 4 }
 0x652   : > { %v1740_v49 = vrot.slane %v1739_v42, 1  ;;  %v1746_v50 = vrot.slane %v1745_v43, 1  ;;  %v1762_v51 = vrot.slane %v1761_v44, 2  ;;  %v1915_v53 = vunpack.c.0.s8 %v8395_v15 }
 0x653   : > { %v1903_v52 = vrot.slane %v1896_v45, %v8328_v11  ;;  %v1751_v55 = vadd.f32 %v1750_v46, %v1749_v37  ;;  %v1757_v59 = vadd.f32 %v1756_v47, %v1755_v38  ;;  %v1767_v63 = vadd.f32 %v1766_v48, %v1729_v6 }
 0x654   : > { %v1741_v54 = vadd.f32 %v1740_v49, %v1739_v42  ;;  %v1747_v0 = vadd.f32 %v1746_v50, %v1745_v43  ;;  %v1763_v2 = vadd.f32 %v1762_v51, %v1761_v44  ;;  %v1910_v3 = vrot.slane %v1895_v41, %v8328_v11 }
 0x655   : > { %v1752_v4 = vrot.slane %v1751_v55, 1  ;;  %v1758_v7 = vrot.slane %v1757_v59, 1  ;;  %v1768_v8 = vrot.slane %v1767_v63, 2  ;;  %v1918_v19 = vsub.s32 %v1915_v53, %v8325_v5 }
 0x656   : > { %v1764_v9 = vrot.slane %v1763_v2, 1  ;;  %v6608_v10 = vpack.c.bf16 %v1747_v0, %v1741_v54  ;;  %v1911_v12 = vcombine.low %v1903_v52, %v1910_v3  ;;  %v6615_v20 = vcombine.low %v1910_v3, %v1910_v3 }
 0x657   : > { %v1753_v13 = vadd.f32 %v1752_v4, %v1751_v55  ;;  %v1759_v14 = vadd.f32 %v1758_v7, %v1757_v59  ;;  %v1769_v18 = vadd.f32 %v1768_v8, %v1767_v63  ;;  %v1696_v7 = vrot.slane %v8408_v36, %v8350_v16 }
 0x658   : > { %v1765_v15 = vadd.f32 %v1764_v9, %v1763_v2  ;;  %v1841_v22 = vrot.slane %v6608_v10, %v8328_v11  ;;  %v1956_v1 = vrot.slane %v1911_v12, %v1918_v19  ;;  %v1963_v25 = vrot.slane %v6615_v20, %v1918_v19 }
 0x659   : > { %v1770_v6 = vrot.slane %v1769_v18, 1  ;;  %v6609_v21 = vpack.c.bf16 %v1759_v14, %v1753_v13  ;;  %v1700_v36 = vrot.slane %v8397_v17, %v8350_v16 }
 0x65a   : > { %v1964_v28 = vcombine.high %v1956_v1, %v1956_v1  ;;  %v1971_v31 = vrot.slane %v1956_v1, %v1918_v19  ;;  %v1985_v32 = vrot.slane %v1963_v25, %v1918_v19 }
 0x65b   : > { %v1771_v23 = vadd.f32 %v1770_v6, %v1769_v18  ;;  %v1848_v24 = vrot.slane %v6609_v21, %v8328_v11 }
 0x65c   : > { %v1978_v34 = vrot.slane %v1964_v28, %v1918_v19  ;;  %v1992_v38 = vunpack.c.l.b16 %v1971_v31  ;;  %v1993_v41 = vunpack.c.h.b16 %v1971_v31  ;;  %v1996_v42 = vunpack.c.l.b16 %v1985_v32 }
 0x65d   : > { %v6610_v26 = vpack.c.bf16 %v1771_v23, %v1765_v15  ;;  %v1856_v27 = vcombine.low %v1841_v22, %v1848_v24  ;;  %v1997_v43 = vunpack.c.h.b16 %v1985_v32  ;;  %v1701_v15 = vsel %vm1625_vm0, %v1700_v36, %v1696_v7  ;;  %v2336_v32 = vld [vmem:[#allocation14 + $0x840] sm:$0xff] }
 0x65e   : > { %v1994_v46 = vunpack.c.l.b16 %v1978_v34  ;;  %v1995_v47 = vunpack.c.h.b16 %v1978_v34  ;;  %v1998_v51 = vrot.slane %v1992_v38, 7  ;;  %v2000_v52 = vrot.slane %v1993_v41, 7  ;;  %1703 = vst.msk [vmem:[%s8302_s28] sm:$0x3] %vm1628_vm1, %v1701_v15  ;;  %v2468_v38 = vld [vmem:[#allocation14 + $0xc60] sm:$0xff] }
 0x65f   : > { %v1855_v29 = vrot.slane %v6610_v26, %v8328_v11  ;;  %v1863_v30 = vrot.slane %v1856_v27, %v8328_v11  ;;  %v2006_v55 = vrot.slane %v1996_v42, 7  ;;  %v2008_v59 = vrot.slane %v1997_v43, 7  ;;  %v2380_v36 = vld [vmem:[#allocation14 + $0x9a0] sm:$0xff] }
 0x660   : > { %v2002_v2 = vrot.slane %v1994_v46, 7  ;;  %v2004_v3 = vrot.slane %v1995_v47, 7 }
 0x661   : > { %v1870_v33 = vrot.slane %v1855_v29, %v8328_v11 }
 0x663   : > { %v1871_v35 = vcombine.low %v1863_v30, %v1870_v33  ;;  %v6614_v37 = vcombine.low %v1870_v33, %v1870_v33  ;;  %v2340_v33 = vld [vmem:[#allocation14 + $0x860] sm:$0xff] }
 0x664   : > { %v6883_v43 = vcombine.high %v2336_v32, %v2340_v33 }
 0x665   : > { %v1919_v44 = vrot.slane %v1871_v35, %v1918_v19  ;;  %v1926_v45 = vrot.slane %v6614_v37, %v1918_v19  ;;  %v2464_v37 = vld [vmem:[#allocation14 + $0xc40] sm:$0xff] }
 0x666   : > { %v7011_v47 = vcombine.high %v2464_v37, %v2468_v38  ;;  %v7010_v56 = vcombine.low %v2464_v37, %v2468_v38 }
 0x667   : > { %v1927_v48 = vcombine.high %v1919_v44, %v1919_v44  ;;  %v1934_v49 = vrot.slane %v1919_v44, %v1918_v19  ;;  %v1948_v50 = vrot.slane %v1926_v45, %v1918_v19  ;;  %v2344_v44 = vld [vmem:[#allocation14 + $0x880] sm:$0xff] }
 0x668   : > { %v2348_v45 = vld [vmem:[#allocation14 + $0x8a0] sm:$0xff] }
 0x669   : > { %v1941_v63 = vrot.slane %v1927_v48, %v1918_v19  ;;  %v1986_v53 = vunpack.c.l.b16 %v1934_v49  ;;  %v1987_v54 = vunpack.c.h.b16 %v1934_v49  ;;  %v1990_v0 = vunpack.c.l.b16 %v1948_v50 }
 0x66a   : > { %v1991_v4 = vunpack.c.h.b16 %v1948_v50  ;;  %v6882_v48 = vcombine.low %v2336_v32, %v2340_v33  ;;  %v2472_v50 = vld [vmem:[#allocation14 + $0xc80] sm:$0xff] }
 0x66b   : > { %v1988_v8 = vunpack.c.l.b16 %v1941_v63  ;;  %v1989_v9 = vunpack.c.h.b16 %v1941_v63  ;;  %v1999_v10 = vsel %vm1625_vm0, %v1998_v51, %v1986_v53  ;;  %v2001_v12 = vsel %vm1625_vm0, %v2000_v52, %v1987_v54  ;;  %v2476_v51 = vld [vmem:[#allocation14 + $0xca0] sm:$0xff] }
 0x66c   : > { %v2007_v13 = vsel %vm1625_vm0, %v2006_v55, %v1990_v0  ;;  %v2009_v14 = vsel %vm1625_vm0, %v2008_v59, %v1991_v4  ;;  %v2010_v18 = vpack.c.b16 %v2001_v12, %v1999_v10  ;;  %v6891_v52 = vcombine.high %v2344_v44, %v2348_v45  ;;  %v2480_v63 = vld [vmem:[#allocation14 + $0xcc0] sm:$0xff] }
 0x66d   : > { %v2003_v19 = vsel %vm1625_vm0, %v2002_v2, %v1988_v8  ;;  %v2005_v20 = vsel %vm1625_vm0, %v2004_v3, %v1989_v9  ;;  %v2012_v6 = vpack.c.b16 %v2009_v14, %v2007_v13  ;;  %v7019_v55 = vcombine.high %v2472_v50, %v2476_v51  ;;  %v2484_v53 = vld [vmem:[#allocation14 + $0xce0] sm:$0xff] }
 0x66e   : > { %v2011_v21 = vpack.c.b16 %v2005_v20, %v2003_v19  ;;  %v2019_v22 = vrot.slane %v2010_v18, %v8328_v11  ;;  %v6890_v59 = vcombine.low %v2344_v44, %v2348_v45  ;;  %v7018_v0 = vcombine.low %v2472_v50, %v2476_v51  ;;  %v2360_v2 = vld [vmem:[#allocation14 + $0x900] sm:$0xff] }
 0x66f   : > { %v2033_v23 = vrot.slane %v2012_v6, %v8328_v11  ;;  %v2364_v3 = vld [vmem:[#allocation14 + $0x920] sm:$0xff]  ;;  %v7027_v60 = vcombine.high %v2480_v63, %v2484_v53  ;;  %v7026_v8 = vcombine.low %v2480_v63, %v2484_v53 }
 0x670   : > { %v2026_v1 = vrot.slane %v2011_v21, %v8328_v11  ;;  %v2492_v4 = vld [vmem:[#allocation14 + $0xd20] sm:$0xff]  ;;  %v6907_v7 = vcombine.high %v2360_v2, %v2364_v3  ;;  %v6906_v13 = vcombine.low %v2360_v2, %v2364_v3 }
 0x671   : > { %v2048_v26 = vrot.slane %v2033_v23, %v8328_v11  ;;  %v2368_v9 = vld [vmem:[#allocation14 + $0x940] sm:$0xff] }
 0x672   : > { %v2034_v24 = vcombine.low %v2019_v22, %v2026_v1  ;;  %v2372_v10 = vld [vmem:[#allocation14 + $0x960] sm:$0xff] }
 0x673   : > { %v2496_v14 = vld [vmem:[#allocation14 + $0xd40] sm:$0xff]  ;;  %v6915_v19 = vcombine.high %v2368_v9, %v2372_v10  ;;  %v6914_v15 = vcombine.low %v2368_v9, %v2372_v10 }
 0x674   : > { %v2041_v25 = vrot.slane %v2034_v24, %v8328_v11  ;;  %v2500_v18 = vld [vmem:[#allocation14 + $0xd60] sm:$0xff] }
 0x675   : > { %v2376_v6 = vld [vmem:[#allocation14 + $0x980] sm:$0xff]  ;;  %v7043_v21 = vcombine.high %v2496_v14, %v2500_v18  ;;  %v7042_v24 = vcombine.low %v2496_v14, %v2500_v18 }
 0x676   : > { %v2049_v27 = vcombine.low %v2041_v25, %v2048_v26  ;;  %v2504_v22 = vld [vmem:[#allocation14 + $0xd80] sm:$0xff]  ;;  %v6923_v23 = vcombine.high %v2376_v6, %v2380_v36 }
 0x677   : > { %v2508_v1 = vld [vmem:[#allocation14 + $0xda0] sm:$0xff] }
 0x678   : > { %2051 = vst [vmem:[#allocation3] sm:$0x3f] %v2049_v27  ;;  %v2384_v25 = vld [vmem:[#allocation14 + $0x9c0] sm:$0xff]  ;;  %v7051_v27 = vcombine.high %v2504_v22, %v2508_v1  ;;  %v7050_v32 = vcombine.low %v2504_v22, %v2508_v1 }
 0x679   : > { %v2388_v26 = vld [vmem:[#allocation14 + $0x9e0] sm:$0xff] }
 0x67a   : > { %v2392_v33 = vld [vmem:[#allocation14 + $0xa00] sm:$0xff]  ;;  %v6930_v38 = vcombine.low %v2384_v25, %v2388_v26 }
 0x67b   : > { %v2524_v44 = vld [vmem:[#allocation14 + $0xe20] sm:$0xff] }
 0x67c   : > { %v2404_v50 = vld [vmem:[#allocation14 + $0xa60] sm:$0xff] }
 0x67d   : > { %v2412_v63 = vld [vmem:[#allocation14 + $0xaa0] sm:$0xff] }
 0x67e   : > { %v2540_v2 = vld [vmem:[#allocation14 + $0xea0] sm:$0xff] }
 0x67f   : > { %v2071_v28 = vld [vmem:[#allocation3] sm:$0xff]  ;;  %v2548_v9 = vld [vmem:[#allocation14 + $0xee0] sm:$0xff] }
 0x680   : > { %v2633_v16 = vrot.slane %v2071_v28, %v8328_v11  ;;  %v2626_v17 = vcombine.high %v2071_v28, %v2071_v28  ;;  %v6922_v28 = vcombine.low %v2376_v6, %v2380_v36  ;;  %v2428_v14 = vld [vmem:[#allocation14 + $0xb20] sm:$0xff] }
 0x681   : > { %v2556_v6 = vld [vmem:[#allocation14 + $0xf20] sm:$0xff] }
 0x682   : > { %v2641_v29 = vcombine.high %v2633_v16, %v2633_v16  ;;  %v8448_v30 = vrot.slane %v2626_v17, %v8328_v11  ;;  %v8451_v31 = vrot.slane %v2633_v16, %v8328_v11  ;;  %v2512_v16 = vld [vmem:[#allocation14 + $0xdc0] sm:$0xff] }
 0x683   : > { %v2516_v17 = vld [vmem:[#allocation14 + $0xde0] sm:$0xff] }
 0x684   : > { %v8454_v34 = vrot.slane %v2641_v29, %v8328_v11  ;;  %v2642_v35 = vcombine.high %v8448_v30, %v8448_v30  ;;  %v8469_v46 = vcombine.high %v8451_v31, %v8451_v31  ;;  %v6931_v29 = vcombine.high %v2384_v25, %v2388_v26  ;;  %v2436_v22 = vld [vmem:[#allocation14 + $0xb60] sm:$0xff] }
 0x685   : > { %v7059_v37 = vcombine.high %v2512_v16, %v2516_v17  ;;  %v2564_v25 = vld [vmem:[#allocation14 + $0xf60] sm:$0xff] }
 0x686   : > { %5275 = vmatprep.mubr.bf16.mxu1 %v8454_v34  ;;  %v8461_v41 = vcombine.high %v8454_v34, %v8454_v34  ;;  %v8464_v42 = vrot.slane %v2642_v35, %v8328_v11  ;;  %v2396_v35 = vld [vmem:[#allocation14 + $0xa20] sm:$0xff] }
 0x687   : > { %5276 = vmatmul.mubr.bf16.vlgmr.msra.gmra.mrb[0].mxu1 %v8451_v31  ;;  %v6939_v45 = vcombine.high %v2392_v33, %v2396_v35 }
 0x688   : > { %5326 = vmatpush1.bf16.msra.mxu1 %v6874_v58  ;;  %5316 = vmatprep.mubr.bf16.mxu0 %v8461_v41  ;;  %v8477_v49 = vcombine.high %v8464_v42, %v8464_v42  ;;  %v2356_v58 = vld [vmem:[#allocation14 + $0x8e0] sm:$0xff] }
 0x689   : > { %5357 = vmatprep.mubr.bf16.mxu1 %v8464_v42  ;;  %5317 = vmatmul.mubr.bf16.vlgmr.msra.gmra.mrb[4].mxu0 %v8469_v46  ;;  %v6899_v54 = vcombine.high %v2352_v57, %v2356_v58  ;;  %v6898_v61 = vcombine.low %v2352_v57, %v2356_v58  ;;  %v2532_v57 = vld [vmem:[#allocation14 + $0xe60] sm:$0xff] }
 0x68a   : > { %5367 = vmatpush1.bf16.msra.mxu0 %v7002_v62  ;;  %5327 = vmatprep.subr.bf16.mxu1 %v6883_v43  ;;  %v2488_v62 = vld [vmem:[#allocation14 + $0xd00] sm:$0xff] }
 0x68b   : > { %5398 = vmatprep.mubr.bf16.mxu0 %v8477_v49  ;;  %5368 = vmatprep.subr.bf16.mxu0 %v7011_v47  ;;  %v7035_v12 = vcombine.high %v2488_v62, %v2492_v4  ;;  %v7034_v20 = vcombine.low %v2488_v62, %v2492_v4  ;;  %v2520_v43 = vld [vmem:[#allocation14 + $0xe00] sm:$0xff]  ;;  %v7058_v47 = vcombine.low %v2512_v16, %v2516_v17 }
 0x68c   : > { %5328 = vmatpush1.bf16.msra.mxu1 %v6882_v48  ;;  %v2400_v48 = vld [vmem:[#allocation14 + $0xa40] sm:$0xff]  ;;  %v7067_v51 = vcombine.high %v2520_v43, %v2524_v44 }
 0x68d   : > { %5329 = vmatprep.subr.bf16.mxu1 %v6891_v52  ;;  %v6938_v52 = vcombine.low %v2392_v33, %v2396_v35  ;;  %v6947_v58 = vcombine.high %v2400_v48, %v2404_v50  ;;  %v2420_v62 = vld [vmem:[#allocation14 + $0xae0] sm:$0xff] }
 0x68e   : > { %5369 = vmatpush1.bf16.msra.mxu0 %v7010_v56  ;;  %v2528_v56 = vld [vmem:[#allocation14 + $0xe40] sm:$0xff] }
 0x68f   : > { %5370 = vmatprep.subr.bf16.mxu0 %v7019_v55  ;;  %v7066_v55 = vcombine.low %v2520_v43, %v2524_v44  ;;  %v7075_v53 = vcombine.high %v2528_v56, %v2532_v57  ;;  %v2444_v16 = vld [vmem:[#allocation14 + $0xba0] sm:$0xff] }
 0x690   : > { %5330 = vmatpush1.bf16.msra.mxu1 %v6890_v59  ;;  %v2408_v59 = vld [vmem:[#allocation14 + $0xa80] sm:$0xff] }
 0x691   : > { %5331 = vmatprep.subr.bf16.mxu1 %v6899_v54  ;;  %v6946_v54 = vcombine.low %v2400_v48, %v2404_v50  ;;  %v6955_v3 = vcombine.high %v2408_v59, %v2412_v63  ;;  %v2572_v33 = vld [vmem:[#allocation14 + $0xfa0] sm:$0xff] }
 0x692   : > { %5371 = vmatpush1.bf16.msra.mxu0 %v7018_v0  ;;  %v2536_v0 = vld [vmem:[#allocation14 + $0xe80] sm:$0xff] }
 0x693   : > { %5372 = vmatprep.subr.bf16.mxu0 %v7027_v60  ;;  %v7074_v60 = vcombine.low %v2528_v56, %v2532_v57  ;;  %v7083_v4 = vcombine.high %v2536_v0, %v2540_v2  ;;  %v2452_v43 = vld [vmem:[#allocation14 + $0xbe0] sm:$0xff]  ;;  %v2077_v56 = vld [vmem:[#allocation14 + $0x28] sm:$0xff] }
 0x694   : > { %5332 = vmatpush1.bf16.msra.mxu1 %v6898_v61  ;;  %v2416_v61 = vld [vmem:[#allocation14 + $0xac0] sm:$0xff] }
 0x695   : > { %5333 = vmatprep.subr.bf16.mxu1 %v6907_v7  ;;  %v6954_v7 = vcombine.low %v2408_v59, %v2412_v63  ;;  %v6963_v10 = vcombine.high %v2416_v61, %v2420_v62  ;;  %v2580_v48 = vld [vmem:[#allocation14 + $0xfe0] sm:$0xff]  ;;  %v2205_v59 = vld [vmem:[#allocation14 + $0x428] sm:$0xff] }
 0x696   : > { %5373 = vmatpush1.bf16.msra.mxu0 %v7026_v8  ;;  %v2544_v8 = vld [vmem:[#allocation14 + $0xec0] sm:$0xff] }
 0x697   : > { %5374 = vmatprep.subr.bf16.mxu0 %v7035_v12  ;;  %v7082_v12 = vcombine.low %v2536_v0, %v2540_v2  ;;  %v7091_v18 = vcombine.high %v2544_v8, %v2548_v9  ;;  %v2085_v0 = vld [vmem:[#allocation14 + $0x68] sm:$0xff]  ;;  %v8487_v2 = vrot.slane %v8448_v30, %v8328_v11 }
 0x698   : > { %5334 = vmatpush1.bf16.msra.mxu1 %v6906_v13  ;;  %v2424_v13 = vld [vmem:[#allocation14 + $0xb00] sm:$0xff] }
 0x699   : > { %5335 = vmatprep.subr.bf16.mxu1 %v6915_v19  ;;  %v6962_v19 = vcombine.low %v2416_v61, %v2420_v62  ;;  %v6971_v36 = vcombine.high %v2424_v13, %v2428_v14  ;;  %v2209_v61 = vld [vmem:[#allocation14 + $0x448] sm:$0xff] }
 0x69a   : > { %5375 = vmatpush1.bf16.msra.mxu0 %v7034_v20  ;;  %v2552_v20 = vld [vmem:[#allocation14 + $0xf00] sm:$0xff]  ;;  %v2213_v62 = vld [vmem:[#allocation14 + $0x468] sm:$0xff] }
 0x69b   : > { %5376 = vmatprep.subr.bf16.mxu0 %v7043_v21  ;;  %v7090_v21 = vcombine.low %v2544_v8, %v2548_v9  ;;  %v7099_v1 = vcombine.high %v2552_v20, %v2556_v6  ;;  %v2089_v8 = vld [vmem:[#allocation14 + $0x88] sm:$0xff]  ;;  %v6757_v11 = vcombine.high %v2209_v61, %v2213_v62 }
 0x69c   : > { %5336 = vmatpush1.bf16.msra.mxu1 %v6914_v15  ;;  %v2432_v15 = vld [vmem:[#allocation14 + $0xb40] sm:$0xff]  ;;  %v2093_v9 = vld [vmem:[#allocation14 + $0xa8] sm:$0xff] }
 0x69d   : > { %5337 = vmatprep.subr.bf16.mxu1 %v6923_v23  ;;  %v6970_v23 = vcombine.low %v2424_v13, %v2428_v14  ;;  %v6979_v26 = vcombine.high %v2432_v15, %v2436_v22  ;;  %v2221_v13 = vld [vmem:[#allocation14 + $0x4a8] sm:$0xff]  ;;  %v6637_v14 = vcombine.high %v2089_v8, %v2093_v9 }
 0x69e   : > { %5377 = vmatpush1.bf16.msra.mxu0 %v7042_v24  ;;  %v2560_v24 = vld [vmem:[#allocation14 + $0xf40] sm:$0xff] }
 0x69f   : > { %5378 = vmatprep.subr.bf16.mxu0 %v7051_v27  ;;  %v7098_v27 = vcombine.low %v2552_v20, %v2556_v6  ;;  %v7107_v17 = vcombine.high %v2560_v24, %v2564_v25  ;;  %v2101_v20 = vld [vmem:[#allocation14 + $0xe8] sm:$0xff] }
 0x6a0   : > { %5338 = vmatpush1.bf16.msra.mxu1 %v6922_v28  ;;  %v2440_v28 = vld [vmem:[#allocation14 + $0xb80] sm:$0xff] }
 0x6a1   : > { %5339 = vmatprep.subr.bf16.mxu1 %v6931_v29  ;;  %v6978_v29 = vcombine.low %v2432_v15, %v2436_v22  ;;  %v6987_v35 = vcombine.high %v2440_v28, %v2444_v16  ;;  %v2229_v15 = vld [vmem:[#allocation14 + $0x4e8] sm:$0xff] }
 0x6a2   : > { %5379 = vmatpush1.bf16.msra.mxu0 %v7050_v32  ;;  %v2568_v32 = vld [vmem:[#allocation14 + $0xf80] sm:$0xff] }
 0x6a3   : > { %5380 = vmatprep.subr.bf16.mxu0 %v7059_v37  ;;  %v7106_v37 = vcombine.low %v2560_v24, %v2564_v25  ;;  %v7115_v44 = vcombine.high %v2568_v32, %v2572_v33  ;;  %v2109_v24 = vld [vmem:[#allocation14 + $0x128] sm:$0xff] }
 0x6a4   : > { %5340 = vmatpush1.bf16.msra.mxu1 %v6930_v38  ;;  %v2448_v38 = vld [vmem:[#allocation14 + $0xbc0] sm:$0xff] }
 0x6a5   : > { %5341 = vmatprep.subr.bf16.mxu1 %v6939_v45  ;;  %v6986_v45 = vcombine.low %v2440_v28, %v2444_v16  ;;  %v6995_v50 = vcombine.high %v2448_v38, %v2452_v43  ;;  %v2237_v28 = vld [vmem:[#allocation14 + $0x528] sm:$0xff] }
 0x6a6   : > { %5381 = vmatpush1.bf16.msra.mxu0 %v7058_v47  ;;  %v2576_v47 = vld [vmem:[#allocation14 + $0xfc0] sm:$0xff] }
 0x6a7   : > { %5382 = vmatprep.subr.bf16.mxu0 %v7067_v51  ;;  %v7114_v51 = vcombine.low %v2568_v32, %v2572_v33  ;;  %v7123_v57 = vcombine.high %v2576_v47, %v2580_v48  ;;  %v2117_v32 = vld [vmem:[#allocation14 + $0x168] sm:$0xff] }
 0x6a8   : > { %5342 = vmatpush1.bf16.msra.mxu1 %v6938_v52  ;;  %v2073_v52 = vld [vmem:[#allocation14 + $0x8] sm:$0xff] }
 0x6a9   : > { %5343 = vmatprep.subr.bf16.mxu1 %v6947_v58  ;;  %v6994_v58 = vcombine.low %v2448_v38, %v2452_v43  ;;  %v6621_v63 = vcombine.high %v2073_v52, %v2077_v56  ;;  %v2245_v38 = vld [vmem:[#allocation14 + $0x568] sm:$0xff] }
 0x6aa   : > { %5383 = vmatpush1.bf16.msra.mxu0 %v7066_v55  ;;  %v2201_v55 = vld [vmem:[#allocation14 + $0x408] sm:$0xff] }
 0x6ab   : > { %5384 = vmatprep.subr.bf16.mxu0 %v7075_v53  ;;  %v7122_v53 = vcombine.low %v2576_v47, %v2580_v48  ;;  %v2125_v47 = vld [vmem:[#allocation14 + $0x1a8] sm:$0xff] }
 0x6ac   : > { %5344 = vmatpush1.bf16.msra.mxu1 %v6946_v54  ;;  %v2081_v54 = vld [vmem:[#allocation14 + $0x48] sm:$0xff] }
 0x6ad   : > { %5345 = vmatprep.subr.bf16.mxu1 %v6955_v3  ;;  %v6749_v3 = vcombine.high %v2201_v55, %v2205_v59  ;;  %v6628_v30 = vcombine.low %v2081_v54, %v2085_v0 }
 0x6ae   : > { %5385 = vmatpush1.bf16.msra.mxu0 %v7074_v60  ;;  %v6620_v60 = vcombine.low %v2073_v52, %v2077_v56  ;;  %v2253_v52 = vld [vmem:[#allocation14 + $0x5a8] sm:$0xff] }
 0x6af   : > { %5386 = vmatprep.subr.bf16.mxu0 %v7083_v4  ;;  %v6629_v4 = vcombine.high %v2081_v54, %v2085_v0  ;;  %v2261_v54 = vld [vmem:[#allocation14 + $0x5e8] sm:$0xff] }
 0x6b0   : > { %5346 = vmatpush1.bf16.msra.mxu1 %v6954_v7  ;;  %v6748_v7 = vcombine.low %v2201_v55, %v2205_v59  ;;  %v2133_v55 = vld [vmem:[#allocation14 + $0x1e8] sm:$0xff] }
 0x6b1   : > { %5347 = vmatprep.subr.bf16.mxu1 %v6963_v10  ;;  %v8492_v10 = vcombine.high %v8487_v2, %v8487_v2 }
 0x6b2   : > { %5387 = vmatpush1.bf16.msra.mxu0 %v7082_v12  ;;  %v2217_v12 = vld [vmem:[#allocation14 + $0x488] sm:$0xff] }
 0x6b3   : > { %5388 = vmatprep.subr.bf16.mxu0 %v7091_v18  ;;  %v6756_v18 = vcombine.low %v2209_v61, %v2213_v62  ;;  %v6765_v6 = vcombine.high %v2217_v12, %v2221_v13  ;;  %v2141_v61 = vld [vmem:[#allocation14 + $0x228] sm:$0xff] }
 0x6b4   : > { %5348 = vmatpush1.bf16.msra.mxu1 %v6962_v19  ;;  %v2097_v19 = vld [vmem:[#allocation14 + $0xc8] sm:$0xff] }
 0x6b5   : > { %5349 = vmatprep.subr.bf16.mxu1 %v6971_v36  ;;  %v6636_v36 = vcombine.low %v2089_v8, %v2093_v9  ;;  %v6645_v22 = vcombine.high %v2097_v19, %v2101_v20  ;;  %v2269_v8 = vld [vmem:[#allocation14 + $0x628] sm:$0xff] }
 0x6b6   : > { %5389 = vmatpush1.bf16.msra.mxu0 %v7090_v21  ;;  %v2225_v21 = vld [vmem:[#allocation14 + $0x4c8] sm:$0xff] }
 0x6b7   : > { %5390 = vmatprep.subr.bf16.mxu0 %v7099_v1  ;;  %v6764_v1 = vcombine.low %v2217_v12, %v2221_v13  ;;  %v6773_v25 = vcombine.high %v2225_v21, %v2229_v15  ;;  %v2149_v12 = vld [vmem:[#allocation14 + $0x268] sm:$0xff] }
 0x6b8   : > { %5350 = vmatpush1.bf16.msra.mxu1 %v6970_v23  ;;  %v2105_v23 = vld [vmem:[#allocation14 + $0x108] sm:$0xff] }
 0x6b9   : > { %5351 = vmatprep.subr.bf16.mxu1 %v6979_v26  ;;  %v6644_v26 = vcombine.low %v2097_v19, %v2101_v20  ;;  %v6653_v16 = vcombine.high %v2105_v23, %v2109_v24  ;;  %v2277_v19 = vld [vmem:[#allocation14 + $0x668] sm:$0xff] }
 0x6ba   : > { %5391 = vmatpush1.bf16.msra.mxu0 %v7098_v27  ;;  %v2233_v27 = vld [vmem:[#allocation14 + $0x508] sm:$0xff] }
 0x6bb   : > { %5392 = vmatprep.subr.bf16.mxu0 %v7107_v17  ;;  %v6772_v17 = vcombine.low %v2225_v21, %v2229_v15  ;;  %v6781_v33 = vcombine.high %v2233_v27, %v2237_v28  ;;  %v2157_v21 = vld [vmem:[#allocation14 + $0x2a8] sm:$0xff] }
 0x6bc   : > { %5352 = vmatpush1.bf16.msra.mxu1 %v6978_v29  ;;  %v2113_v29 = vld [vmem:[#allocation14 + $0x148] sm:$0xff] }
 0x6bd   : > { %5353 = vmatprep.subr.bf16.mxu1 %v6987_v35  ;;  %v6652_v35 = vcombine.low %v2105_v23, %v2109_v24  ;;  %v6661_v43 = vcombine.high %v2113_v29, %v2117_v32  ;;  %v2285_v23 = vld [vmem:[#allocation14 + $0x6a8] sm:$0xff] }
 0x6be   : > { %5393 = vmatpush1.bf16.msra.mxu0 %v7106_v37  ;;  %v2241_v37 = vld [vmem:[#allocation14 + $0x548] sm:$0xff] }
 0x6bf   : > { %5394 = vmatprep.subr.bf16.mxu0 %v7115_v44  ;;  %v6780_v44 = vcombine.low %v2233_v27, %v2237_v28  ;;  %v6789_v48 = vcombine.high %v2241_v37, %v2245_v38  ;;  %v2165_v27 = vld [vmem:[#allocation14 + $0x2e8] sm:$0xff] }
 0x6c0   : > { %5354 = vmatpush1.bf16.msra.mxu1 %v6986_v45  ;;  %v2121_v45 = vld [vmem:[#allocation14 + $0x188] sm:$0xff] }
 0x6c1   : > { %5355 = vmatprep.subr.bf16.mxu1 %v6995_v50  ;;  %v6660_v50 = vcombine.low %v2113_v29, %v2117_v32  ;;  %v6669_v56 = vcombine.high %v2121_v45, %v2125_v47  ;;  %v2293_v29 = vld [vmem:[#allocation14 + $0x6e8] sm:$0xff] }
 0x6c2   : > { %5395 = vmatpush1.bf16.msra.mxu0 %v7114_v51  ;;  %v2249_v51 = vld [vmem:[#allocation14 + $0x588] sm:$0xff] }
 0x6c3   : > { %5396 = vmatprep.subr.bf16.mxu0 %v7123_v57  ;;  %v6788_v57 = vcombine.low %v2241_v37, %v2245_v38  ;;  %v6797_v59 = vcombine.high %v2249_v51, %v2253_v52  ;;  %v2173_v37 = vld [vmem:[#allocation14 + $0x328] sm:$0xff] }
 0x6c4   : > { %5356 = vmatpush1.bf16.msra.mxu1 %v6994_v58  ;;  %v2129_v58 = vld [vmem:[#allocation14 + $0x1c8] sm:$0xff] }
 0x6c5   : > { %5407 = vmatprep.subr.bf16.mxu1 %v6621_v63  ;;  %v6668_v63 = vcombine.low %v2121_v45, %v2125_v47  ;;  %v6677_v0 = vcombine.high %v2129_v58, %v2133_v55  ;;  %v2301_v45 = vld [vmem:[#allocation14 + $0x728] sm:$0xff] }
 0x6c6   : > { %5397 = vmatpush1.bf16.msra.mxu0 %v7122_v53  ;;  %v2257_v53 = vld [vmem:[#allocation14 + $0x5c8] sm:$0xff] }
 0x6c7   : > { %5358 = vmatmul.mubr.bf16.vlgmr.msra.gmra.mrb[4].mxu1 %v8487_v2  ;;  %5448 = vmatprep.subr.bf16.mxu0 %v6749_v3  ;;  %v6796_v3 = vcombine.low %v2249_v51, %v2253_v52  ;;  %v6805_v62 = vcombine.high %v2257_v53, %v2261_v54  ;;  %v2181_v51 = vld [vmem:[#allocation14 + $0x368] sm:$0xff] }
 0x6c8   : > { %5408 = vmatpush1.bf16.msra.mxu1 %v6620_v60  ;;  %5439 = vmatprep.mubr.bf16.mxu1 %v8454_v34  ;;  %v2137_v60 = vld [vmem:[#allocation14 + $0x208] sm:$0xff] }
 0x6c9   : > { %5399 = vmatmul.mubr.bf16.vlgmr.msra.gmra.mrb[8].mxu0 %v8492_v10  ;;  %5409 = vmatprep.subr.bf16.mxu1 %v6629_v4  ;;  %v6676_v4 = vcombine.low %v2129_v58, %v2133_v55  ;;  %v6685_v9 = vcombine.high %v2137_v60, %v2141_v61  ;;  %v2309_v58 = vld [vmem:[#allocation14 + $0x768] sm:$0xff] }
 0x6ca   : > { %5449 = vmatpush1.bf16.msra.mxu0 %v6748_v7  ;;  %5480 = vmatprep.mubr.bf16.mxu0 %v8461_v41  ;;  %v2265_v7 = vld [vmem:[#allocation14 + $0x608] sm:$0xff] }
 0x6cb   : > { %5450 = vmatprep.subr.bf16.mxu0 %v6757_v11  ;;  %v6804_v11 = vcombine.low %v2257_v53, %v2261_v54  ;;  %v6813_v13 = vcombine.high %v2265_v7, %v2269_v8  ;;  %v2189_v53 = vld [vmem:[#allocation14 + $0x3a8] sm:$0xff] }
 0x6cc   : > { %5410 = vmatpush1.bf16.msra.mxu1 %v6628_v30  ;;  %v2145_v30 = vld [vmem:[#allocation14 + $0x248] sm:$0xff] }
 0x6cd   : > { %5411 = vmatprep.subr.bf16.mxu1 %v6637_v14  ;;  %v6684_v14 = vcombine.low %v2137_v60, %v2141_v61  ;;  %v6693_v20 = vcombine.high %v2145_v30, %v2149_v12  ;;  %v2317_v60 = vld [vmem:[#allocation14 + $0x7a8] sm:$0xff] }
 0x6ce   : > { %5451 = vmatpush1.bf16.msra.mxu0 %v6756_v18  ;;  %v2273_v18 = vld [vmem:[#allocation14 + $0x648] sm:$0xff] }
 0x6cf   : > { %5452 = vmatprep.subr.bf16.mxu0 %v6765_v6  ;;  %v6812_v6 = vcombine.low %v2265_v7, %v2269_v8  ;;  %v6821_v15 = vcombine.high %v2273_v18, %v2277_v19  ;;  %v2197_v7 = vld [vmem:[#allocation14 + $0x3e8] sm:$0xff] }
 0x6d0   : > { %5412 = vmatpush1.bf16.msra.mxu1 %v6636_v36  ;;  %v2153_v36 = vld [vmem:[#allocation14 + $0x288] sm:$0xff] }
 0x6d1   : > { %5413 = vmatprep.subr.bf16.mxu1 %v6645_v22  ;;  %v6692_v22 = vcombine.low %v2145_v30, %v2149_v12  ;;  %v6701_v24 = vcombine.high %v2153_v36, %v2157_v21  ;;  %v2325_v30 = vld [vmem:[#allocation14 + $0x7e8] sm:$0xff] }
 0x6d2   : > { %5453 = vmatpush1.bf16.msra.mxu0 %v6764_v1  ;;  %v2281_v1 = vld [vmem:[#allocation14 + $0x688] sm:$0xff] }
 0x6d3   : > { %5454 = vmatprep.subr.bf16.mxu0 %v6773_v25  ;;  %v6820_v25 = vcombine.low %v2273_v18, %v2277_v19  ;;  %v6829_v28 = vcombine.high %v2281_v1, %v2285_v23  ;;  %v2333_v18 = vld [vmem:[#allocation14 + $0x828] sm:$0xff] }
 0x6d4   : > { %5414 = vmatpush1.bf16.msra.mxu1 %v6644_v26  ;;  %v2161_v26 = vld [vmem:[#allocation14 + $0x2c8] sm:$0xff] }
 0x6d5   : > { %5415 = vmatprep.subr.bf16.mxu1 %v6653_v16  ;;  %v6700_v16 = vcombine.low %v2153_v36, %v2157_v21  ;;  %v6709_v32 = vcombine.high %v2161_v26, %v2165_v27  ;;  %v2461_v36 = vld [vmem:[#allocation14 + $0xc28] sm:$0xff] }
 0x6d6   : > { %5455 = vmatpush1.bf16.msra.mxu0 %v6772_v17  ;;  %v2289_v17 = vld [vmem:[#allocation14 + $0x6c8] sm:$0xff] }
 0x6d7   : > { %5456 = vmatprep.subr.bf16.mxu0 %v6781_v33  ;;  %v6828_v33 = vcombine.low %v2281_v1, %v2285_v23  ;;  %v6837_v38 = vcombine.high %v2289_v17, %v2293_v29  ;;  %v2341_v1 = vld [vmem:[#allocation14 + $0x868] sm:$0xff] }
 0x6d8   : > { %5416 = vmatpush1.bf16.msra.mxu1 %v6652_v35  ;;  %v2169_v35 = vld [vmem:[#allocation14 + $0x308] sm:$0xff] }
 0x6d9   : > { %5417 = vmatprep.subr.bf16.mxu1 %v6661_v43  ;;  %v6708_v43 = vcombine.low %v2161_v26, %v2165_v27  ;;  %v6717_v47 = vcombine.high %v2169_v35, %v2173_v37  ;;  %v2469_v26 = vld [vmem:[#allocation14 + $0xc68] sm:$0xff] }
 0x6da   : > { %5457 = vmatpush1.bf16.msra.mxu0 %v6780_v44  ;;  %v2297_v44 = vld [vmem:[#allocation14 + $0x708] sm:$0xff] }
 0x6db   : > { %5458 = vmatprep.subr.bf16.mxu0 %v6789_v48  ;;  %v6836_v48 = vcombine.low %v2289_v17, %v2293_v29  ;;  %v6845_v52 = vcombine.high %v2297_v44, %v2301_v45  ;;  %v2349_v17 = vld [vmem:[#allocation14 + $0x8a8] sm:$0xff] }
 0x6dc   : > { %5418 = vmatpush1.bf16.msra.mxu1 %v6660_v50  ;;  %v2177_v50 = vld [vmem:[#allocation14 + $0x348] sm:$0xff] }
 0x6dd   : > { %5419 = vmatprep.subr.bf16.mxu1 %v6669_v56  ;;  %v6716_v56 = vcombine.low %v2169_v35, %v2173_v37  ;;  %v6725_v55 = vcombine.high %v2177_v50, %v2181_v51  ;;  %v2477_v35 = vld [vmem:[#allocation14 + $0xca8] sm:$0xff] }
 0x6de   : > { %5459 = vmatpush1.bf16.msra.mxu0 %v6788_v57  ;;  %v2305_v57 = vld [vmem:[#allocation14 + $0x748] sm:$0xff] }
 0x6df   : > { %5460 = vmatprep.subr.bf16.mxu0 %v6797_v59  ;;  %v6844_v59 = vcombine.low %v2297_v44, %v2301_v45  ;;  %v6853_v54 = vcombine.high %v2305_v57, %v2309_v58  ;;  %v2357_v44 = vld [vmem:[#allocation14 + $0x8e8] sm:$0xff] }
 0x6e0   : > { %5420 = vmatpush1.bf16.msra.mxu1 %v6668_v63  ;;  %v2185_v63 = vld [vmem:[#allocation14 + $0x388] sm:$0xff] }
 0x6e1   : > { %5421 = vmatprep.subr.bf16.mxu1 %v6677_v0  ;;  %v6724_v0 = vcombine.low %v2177_v50, %v2181_v51  ;;  %v6733_v61 = vcombine.high %v2185_v63, %v2189_v53  ;;  %v2485_v50 = vld [vmem:[#allocation14 + $0xce8] sm:$0xff] }
 0x6e2   : > { %5461 = vmatpush1.bf16.msra.mxu0 %v6796_v3  ;;  %v2313_v3 = vld [vmem:[#allocation14 + $0x788] sm:$0xff] }
 0x6e3   : > { %5462 = vmatprep.subr.bf16.mxu0 %v6805_v62  ;;  %v6852_v62 = vcombine.low %v2305_v57, %v2309_v58  ;;  %v6861_v8 = vcombine.high %v2313_v3, %v2317_v60  ;;  %v2365_v57 = vld [vmem:[#allocation14 + $0x928] sm:$0xff] }
 0x6e4   : > { %5422 = vmatpush1.bf16.msra.mxu1 %v6676_v4  ;;  %v2193_v4 = vld [vmem:[#allocation14 + $0x3c8] sm:$0xff] }
 0x6e5   : > { %5423 = vmatprep.subr.bf16.mxu1 %v6685_v9  ;;  %v6732_v9 = vcombine.low %v2185_v63, %v2189_v53  ;;  %v6741_v12 = vcombine.high %v2193_v4, %v2197_v7  ;;  %v2493_v63 = vld [vmem:[#allocation14 + $0xd28] sm:$0xff] }
 0x6e6   : > { %5463 = vmatpush1.bf16.msra.mxu0 %v6804_v11  ;;  %v2321_v11 = vld [vmem:[#allocation14 + $0x7c8] sm:$0xff] }
 0x6e7   : > { %5464 = vmatprep.subr.bf16.mxu0 %v6813_v13  ;;  %v6860_v13 = vcombine.low %v2313_v3, %v2317_v60  ;;  %v6869_v19 = vcombine.high %v2321_v11, %v2325_v30  ;;  %v2373_v3 = vld [vmem:[#allocation14 + $0x968] sm:$0xff] }
 0x6e8   : > { %5424 = vmatpush1.bf16.msra.mxu1 %v6684_v14  ;;  %v2329_v14 = vld [vmem:[#allocation14 + $0x808] sm:$0xff] }
 0x6e9   : > { %5425 = vmatprep.subr.bf16.mxu1 %v6693_v20  ;;  %v6740_v20 = vcombine.low %v2193_v4, %v2197_v7  ;;  %v6877_v21 = vcombine.high %v2329_v14, %v2333_v18  ;;  %v2501_v4 = vld [vmem:[#allocation14 + $0xd68] sm:$0xff] }
 0x6ea   : > { %5465 = vmatpush1.bf16.msra.mxu0 %v6812_v6  ;;  %v2457_v6 = vld [vmem:[#allocation14 + $0xc08] sm:$0xff] }
 0x6eb   : > { %5466 = vmatprep.subr.bf16.mxu0 %v6821_v15  ;;  %v6868_v15 = vcombine.low %v2321_v11, %v2325_v30  ;;  %v7005_v23 = vcombine.high %v2457_v6, %v2461_v36  ;;  %v2381_v11 = vld [vmem:[#allocation14 + $0x9a8] sm:$0xff] }
 0x6ec   : > { %5426 = vmatpush1.bf16.msra.mxu1 %v6692_v22  ;;  %v2337_v22 = vld [vmem:[#allocation14 + $0x848] sm:$0xff] }
 0x6ed   : > { %5427 = vmatprep.subr.bf16.mxu1 %v6701_v24  ;;  %v6876_v24 = vcombine.low %v2329_v14, %v2333_v18  ;;  %v6885_v27 = vcombine.high %v2337_v22, %v2341_v1  ;;  %v2509_v14 = vld [vmem:[#allocation14 + $0xda8] sm:$0xff] }
 0x6ee   : > { %5467 = vmatpush1.bf16.msra.mxu0 %v6820_v25  ;;  %v2465_v25 = vld [vmem:[#allocation14 + $0xc48] sm:$0xff] }
 0x6ef   : > { %5468 = vmatprep.subr.bf16.mxu0 %v6829_v28  ;;  %v7004_v28 = vcombine.low %v2457_v6, %v2461_v36  ;;  %v7013_v29 = vcombine.high %v2465_v25, %v2469_v26  ;;  %v2389_v6 = vld [vmem:[#allocation14 + $0x9e8] sm:$0xff] }
 0x6f0   : > { %5428 = vmatpush1.bf16.msra.mxu1 %v6700_v16  ;;  %v2345_v16 = vld [vmem:[#allocation14 + $0x888] sm:$0xff] }
 0x6f1   : > { %5429 = vmatprep.subr.bf16.mxu1 %v6709_v32  ;;  %v6884_v32 = vcombine.low %v2337_v22, %v2341_v1  ;;  %v6893_v37 = vcombine.high %v2345_v16, %v2349_v17  ;;  %v2517_v22 = vld [vmem:[#allocation14 + $0xde8] sm:$0xff] }
 0x6f2   : > { %5469 = vmatpush1.bf16.msra.mxu0 %v6828_v33  ;;  %v2473_v33 = vld [vmem:[#allocation14 + $0xc88] sm:$0xff] }
 0x6f3   : > { %5470 = vmatprep.subr.bf16.mxu0 %v6837_v38  ;;  %v7012_v38 = vcombine.low %v2465_v25, %v2469_v26  ;;  %v7021_v45 = vcombine.high %v2473_v33, %v2477_v35  ;;  %v2397_v25 = vld [vmem:[#allocation14 + $0xa28] sm:$0xff] }
 0x6f4   : > { %5430 = vmatpush1.bf16.msra.mxu1 %v6708_v43  ;;  %v2353_v43 = vld [vmem:[#allocation14 + $0x8c8] sm:$0xff] }
 0x6f5   : > { %5431 = vmatprep.subr.bf16.mxu1 %v6717_v47  ;;  %v6892_v47 = vcombine.low %v2345_v16, %v2349_v17  ;;  %v6901_v51 = vcombine.high %v2353_v43, %v2357_v44  ;;  %v2525_v16 = vld [vmem:[#allocation14 + $0xe28] sm:$0xff] }
 0x6f6   : > { %5471 = vmatpush1.bf16.msra.mxu0 %v6836_v48  ;;  %v2481_v48 = vld [vmem:[#allocation14 + $0xcc8] sm:$0xff] }
 0x6f7   : > { %5472 = vmatprep.subr.bf16.mxu0 %v6845_v52  ;;  %v7020_v52 = vcombine.low %v2473_v33, %v2477_v35  ;;  %v7029_v58 = vcombine.high %v2481_v48, %v2485_v50  ;;  %v2405_v33 = vld [vmem:[#allocation14 + $0xa68] sm:$0xff] }
 0x6f8   : > { %5432 = vmatpush1.bf16.msra.mxu1 %v6716_v56  ;;  %v2361_v56 = vld [vmem:[#allocation14 + $0x908] sm:$0xff] }
 0x6f9   : > { %5433 = vmatprep.subr.bf16.mxu1 %v6725_v55  ;;  %v6900_v55 = vcombine.low %v2353_v43, %v2357_v44  ;;  %v6909_v53 = vcombine.high %v2361_v56, %v2365_v57  ;;  %v2533_v43 = vld [vmem:[#allocation14 + $0xe68] sm:$0xff] }
 0x6fa   : > { %5473 = vmatpush1.bf16.msra.mxu0 %v6844_v59  ;;  %v2489_v59 = vld [vmem:[#allocation14 + $0xd08] sm:$0xff] }
 0x6fb   : > { %5474 = vmatprep.subr.bf16.mxu0 %v6853_v54  ;;  %v7028_v54 = vcombine.low %v2481_v48, %v2485_v50  ;;  %v7037_v60 = vcombine.high %v2489_v59, %v2493_v63  ;;  %v2413_v48 = vld [vmem:[#allocation14 + $0xaa8] sm:$0xff] }
 0x6fc   : > { %5434 = vmatpush1.bf16.msra.mxu1 %v6724_v0  ;;  %v2369_v0 = vld [vmem:[#allocation14 + $0x948] sm:$0xff] }
 0x6fd   : > { %5435 = vmatprep.subr.bf16.mxu1 %v6733_v61  ;;  %v6908_v61 = vcombine.low %v2361_v56, %v2365_v57  ;;  %v6917_v7 = vcombine.high %v2369_v0, %v2373_v3  ;;  %v2541_v56 = vld [vmem:[#allocation14 + $0xea8] sm:$0xff] }
 0x6fe   : > { %5475 = vmatpush1.bf16.msra.mxu0 %v6852_v62  ;;  %v2497_v62 = vld [vmem:[#allocation14 + $0xd48] sm:$0xff] }
 0x6ff   : > { %5476 = vmatprep.subr.bf16.mxu0 %v6861_v8  ;;  %v7036_v8 = vcombine.low %v2489_v59, %v2493_v63  ;;  %v7045_v30 = vcombine.high %v2497_v62, %v2501_v4  ;;  %v2421_v59 = vld [vmem:[#allocation14 + $0xae8] sm:$0xff] }
 0x700   : > { %5436 = vmatpush1.bf16.msra.mxu1 %v6732_v9  ;;  %v2377_v9 = vld [vmem:[#allocation14 + $0x988] sm:$0xff] }
 0x701   : > { %5437 = vmatprep.subr.bf16.mxu1 %v6741_v12  ;;  %v6916_v12 = vcombine.low %v2369_v0, %v2373_v3  ;;  %v6925_v18 = vcombine.high %v2377_v9, %v2381_v11  ;;  %v2549_v0 = vld [vmem:[#allocation14 + $0xee8] sm:$0xff] }
 0x702   : > { %5477 = vmatpush1.bf16.msra.mxu0 %v6860_v13  ;;  %v2505_v13 = vld [vmem:[#allocation14 + $0xd88] sm:$0xff] }
 0x703   : > { %5478 = vmatprep.subr.bf16.mxu0 %v6869_v19  ;;  %v7044_v19 = vcombine.low %v2497_v62, %v2501_v4  ;;  %v7053_v36 = vcombine.high %v2505_v13, %v2509_v14  ;;  %v2429_v62 = vld [vmem:[#allocation14 + $0xb28] sm:$0xff] }
 0x704   : > { %5438 = vmatpush1.bf16.msra.mxu1 %v6740_v20  ;;  %v2385_v20 = vld [vmem:[#allocation14 + $0x9c8] sm:$0xff] }
 0x705   : > { %5489 = vmatprep.subr.bf16.mxu1 %v6877_v21  ;;  %v6924_v21 = vcombine.low %v2377_v9, %v2381_v11  ;;  %v6933_v1 = vcombine.high %v2385_v20, %v2389_v6  ;;  %v2557_v9 = vld [vmem:[#allocation14 + $0xf28] sm:$0xff] }
 0x706   : > { %5479 = vmatpush1.bf16.msra.mxu0 %v6868_v15  ;;  %v2513_v15 = vld [vmem:[#allocation14 + $0xdc8] sm:$0xff] }
 0x707   : > { %5440 = vmatmul.mubr.bf16.vlgmr.msra.gmra.mrb[8].mxu1 %v8451_v31  ;;  %5530 = vmatprep.subr.bf16.mxu0 %v7005_v23  ;;  %v7052_v23 = vcombine.low %v2505_v13, %v2509_v14  ;;  %v7061_v26 = vcombine.high %v2513_v15, %v2517_v22  ;;  %v2437_v13 = vld [vmem:[#allocation14 + $0xb68] sm:$0xff] }
 0x708   : > { %5490 = vmatpush1.bf16.msra.mxu1 %v6876_v24  ;;  %5521 = vmatprep.mubr.bf16.mxu1 %v8464_v42  ;;  %v2393_v24 = vld [vmem:[#allocation14 + $0xa08] sm:$0xff] }
 0x709   : > { %5481 = vmatmul.mubr.bf16.vlgmr.msra.gmra.mrb[12].mxu0 %v8469_v46  ;;  %5491 = vmatprep.subr.bf16.mxu1 %v6885_v27  ;;  %v6932_v27 = vcombine.low %v2385_v20, %v2389_v6  ;;  %v6941_v17 = vcombine.high %v2393_v24, %v2397_v25  ;;  %v2565_v20 = vld [vmem:[#allocation14 + $0xf68] sm:$0xff] }
 0x70a   : > { %5531 = vmatpush1.bf16.msra.mxu0 %v7004_v28  ;;  %5562 = vmatprep.mubr.bf16.mxu0 %v8477_v49  ;;  %v2521_v28 = vld [vmem:[#allocation14 + $0xe08] sm:$0xff] }
 0x70b   : > { %5532 = vmatprep.subr.bf16.mxu0 %v7013_v29  ;;  %v7060_v29 = vcombine.low %v2513_v15, %v2517_v22  ;;  %v7069_v35 = vcombine.high %v2521_v28, %v2525_v16  ;;  %v2445_v15 = vld [vmem:[#allocation14 + $0xba8] sm:$0xff] }
 0x70c   : > { %5492 = vmatpush1.bf16.msra.mxu1 %v6884_v32  ;;  %v2401_v32 = vld [vmem:[#allocation14 + $0xa48] sm:$0xff] }
 0x70d   : > { %5493 = vmatprep.subr.bf16.mxu1 %v6893_v37  ;;  %v6940_v37 = vcombine.low %v2393_v24, %v2397_v25  ;;  %v6949_v44 = vcombine.high %v2401_v32, %v2405_v33  ;;  %v2573_v24 = vld [vmem:[#allocation14 + $0xfa8] sm:$0xff] }
 0x70e   : > { %5533 = vmatpush1.bf16.msra.mxu0 %v7012_v38  ;;  %v2529_v38 = vld [vmem:[#allocation14 + $0xe48] sm:$0xff] }
 0x70f   : > { %5534 = vmatprep.subr.bf16.mxu0 %v7021_v45  ;;  %v7068_v45 = vcombine.low %v2521_v28, %v2525_v16  ;;  %v7077_v50 = vcombine.high %v2529_v38, %v2533_v43  ;;  %v2453_v28 = vld [vmem:[#allocation14 + $0xbe8] sm:$0xff] }
 0x710   : > { %5494 = vmatpush1.bf16.msra.mxu1 %v6892_v47  ;;  %v2409_v47 = vld [vmem:[#allocation14 + $0xa88] sm:$0xff] }
 0x711   : > { %5495 = vmatprep.subr.bf16.mxu1 %v6901_v51  ;;  %v6948_v51 = vcombine.low %v2401_v32, %v2405_v33  ;;  %v6957_v57 = vcombine.high %v2409_v47, %v2413_v48  ;;  %v2581_v32 = vld [vmem:[#allocation14 + $0xfe8] sm:$0xff] }
 0x712   : > { %5535 = vmatpush1.bf16.msra.mxu0 %v7020_v52  ;;  %v2537_v52 = vld [vmem:[#allocation14 + $0xe88] sm:$0xff] }
 0x713   : > { %5536 = vmatprep.subr.bf16.mxu0 %v7029_v58  ;;  %v7076_v58 = vcombine.low %v2529_v38, %v2533_v43  ;;  %v7085_v63 = vcombine.high %v2537_v52, %v2541_v56  ;;  %v2078_v38 = vld [vmem:[#allocation14 + $0x30] sm:$0xff] }
 0x714   : > { %5496 = vmatpush1.bf16.msra.mxu1 %v6900_v55  ;;  %v2417_v55 = vld [vmem:[#allocation14 + $0xac8] sm:$0xff] }
 0x715   : > { %5497 = vmatprep.subr.bf16.mxu1 %v6909_v53  ;;  %v6956_v53 = vcombine.low %v2409_v47, %v2413_v48  ;;  %v6965_v3 = vcombine.high %v2417_v55, %v2421_v59  ;;  %v2206_v47 = vld [vmem:[#allocation14 + $0x430] sm:$0xff] }
 0x716   : > { %5537 = vmatpush1.bf16.msra.mxu0 %v7028_v54  ;;  %v2545_v54 = vld [vmem:[#allocation14 + $0xec8] sm:$0xff] }
 0x717   : > { %5538 = vmatprep.subr.bf16.mxu0 %v7037_v60  ;;  %v7084_v60 = vcombine.low %v2537_v52, %v2541_v56  ;;  %v7093_v4 = vcombine.high %v2545_v54, %v2549_v0  ;;  %v2086_v52 = vld [vmem:[#allocation14 + $0x70] sm:$0xff] }
 0x718   : > { %5498 = vmatpush1.bf16.msra.mxu1 %v6908_v61  ;;  %v2425_v61 = vld [vmem:[#allocation14 + $0xb08] sm:$0xff] }
 0x719   : > { %5499 = vmatprep.subr.bf16.mxu1 %v6917_v7  ;;  %v6964_v7 = vcombine.low %v2417_v55, %v2421_v59  ;;  %v6973_v11 = vcombine.high %v2425_v61, %v2429_v62  ;;  %v2214_v55 = vld [vmem:[#allocation14 + $0x470] sm:$0xff] }
 0x71a   : > { %5539 = vmatpush1.bf16.msra.mxu0 %v7036_v8  ;;  %v2553_v8 = vld [vmem:[#allocation14 + $0xf08] sm:$0xff] }
 0x71b   : > { %5540 = vmatprep.subr.bf16.mxu0 %v7045_v30  ;;  %v7092_v30 = vcombine.low %v2545_v54, %v2549_v0  ;;  %v7101_v14 = vcombine.high %v2553_v8, %v2557_v9  ;;  %v2094_v54 = vld [vmem:[#allocation14 + $0xb0] sm:$0xff] }
 0x71c   : > { %5500 = vmatpush1.bf16.msra.mxu1 %v6916_v12  ;;  %v2433_v12 = vld [vmem:[#allocation14 + $0xb48] sm:$0xff] }
 0x71d   : > { %5501 = vmatprep.subr.bf16.mxu1 %v6925_v18  ;;  %v6972_v18 = vcombine.low %v2425_v61, %v2429_v62  ;;  %v6981_v6 = vcombine.high %v2433_v12, %v2437_v13  ;;  %v2222_v61 = vld [vmem:[#allocation14 + $0x4b0] sm:$0xff] }
 0x71e   : > { %5541 = vmatpush1.bf16.msra.mxu0 %v7044_v19  ;;  %v2561_v19 = vld [vmem:[#allocation14 + $0xf48] sm:$0xff] }
 0x71f   : > { %5542 = vmatprep.subr.bf16.mxu0 %v7053_v36  ;;  %v7100_v36 = vcombine.low %v2553_v8, %v2557_v9  ;;  %v7109_v22 = vcombine.high %v2561_v19, %v2565_v20  ;;  %v2102_v8 = vld [vmem:[#allocation14 + $0xf0] sm:$0xff] }
 0x720   : > { %5502 = vmatpush1.bf16.msra.mxu1 %v6924_v21  ;;  %v2441_v21 = vld [vmem:[#allocation14 + $0xb88] sm:$0xff] }
 0x721   : > { %5503 = vmatprep.subr.bf16.mxu1 %v6933_v1  ;;  %v6980_v1 = vcombine.low %v2433_v12, %v2437_v13  ;;  %v6989_v25 = vcombine.high %v2441_v21, %v2445_v15  ;;  %v2230_v12 = vld [vmem:[#allocation14 + $0x4f0] sm:$0xff] }
 0x722   : > { %5543 = vmatpush1.bf16.msra.mxu0 %v7052_v23  ;;  %v2569_v23 = vld [vmem:[#allocation14 + $0xf88] sm:$0xff] }
 0x723   : > { %5544 = vmatprep.subr.bf16.mxu0 %v7061_v26  ;;  %v7108_v26 = vcombine.low %v2561_v19, %v2565_v20  ;;  %v7117_v16 = vcombine.high %v2569_v23, %v2573_v24  ;;  %v2110_v19 = vld [vmem:[#allocation14 + $0x130] sm:$0xff] }
 0x724   : > { %5504 = vmatpush1.bf16.msra.mxu1 %v6932_v27  ;;  %v2449_v27 = vld [vmem:[#allocation14 + $0xbc8] sm:$0xff] }
 0x725   : > { %5505 = vmatprep.subr.bf16.mxu1 %v6941_v17  ;;  %v6988_v17 = vcombine.low %v2441_v21, %v2445_v15  ;;  %v6997_v33 = vcombine.high %v2449_v27, %v2453_v28  ;;  %v2238_v21 = vld [vmem:[#allocation14 + $0x530] sm:$0xff] }
 0x726   : > { %5545 = vmatpush1.bf16.msra.mxu0 %v7060_v29  ;;  %v2577_v29 = vld [vmem:[#allocation14 + $0xfc8] sm:$0xff] }
 0x727   : > { %5546 = vmatprep.subr.bf16.mxu0 %v7069_v35  ;;  %v7116_v35 = vcombine.low %v2569_v23, %v2573_v24  ;;  %v7125_v43 = vcombine.high %v2577_v29, %v2581_v32  ;;  %v2118_v23 = vld [vmem:[#allocation14 + $0x170] sm:$0xff] }
 0x728   : > { %5506 = vmatpush1.bf16.msra.mxu1 %v6940_v37  ;;  %v2074_v37 = vld [vmem:[#allocation14 + $0x10] sm:$0xff] }
 0x729   : > { %5507 = vmatprep.subr.bf16.mxu1 %v6949_v44  ;;  %v6996_v44 = vcombine.low %v2449_v27, %v2453_v28  ;;  %v6623_v48 = vcombine.high %v2074_v37, %v2078_v38  ;;  %v2242_v27 = vld [vmem:[#allocation14 + $0x550] sm:$0xff] }
 0x72a   : > { %5547 = vmatpush1.bf16.msra.mxu0 %v7068_v45  ;;  %v2202_v45 = vld [vmem:[#allocation14 + $0x410] sm:$0xff] }
 0x72b   : > { %5548 = vmatprep.subr.bf16.mxu0 %v7077_v50  ;;  %v7124_v50 = vcombine.low %v2577_v29, %v2581_v32  ;;  %v6751_v56 = vcombine.high %v2202_v45, %v2206_v47  ;;  %v2246_v28 = vld [vmem:[#allocation14 + $0x570] sm:$0xff] }
 0x72c   : > { %5508 = vmatpush1.bf16.msra.mxu1 %v6948_v51  ;;  %v2082_v51 = vld [vmem:[#allocation14 + $0x50] sm:$0xff] }
 0x72d   : > { %5509 = vmatprep.subr.bf16.mxu1 %v6957_v57  ;;  %v6622_v57 = vcombine.low %v2074_v37, %v2078_v38  ;;  %v6631_v59 = vcombine.high %v2082_v51, %v2086_v52  ;;  %v2122_v29 = vld [vmem:[#allocation14 + $0x190] sm:$0xff] }
 0x72e   : > { %5549 = vmatpush1.bf16.msra.mxu0 %v7076_v58  ;;  %v2210_v58 = vld [vmem:[#allocation14 + $0x450] sm:$0xff] }
 0x72f   : > { %5550 = vmatprep.subr.bf16.mxu0 %v7085_v63  ;;  %v6750_v63 = vcombine.low %v2202_v45, %v2206_v47  ;;  %v6759_v0 = vcombine.high %v2210_v58, %v2214_v55  ;;  %v2126_v32 = vld [vmem:[#allocation14 + $0x1b0] sm:$0xff] }
 0x730   : > { %5510 = vmatpush1.bf16.msra.mxu1 %v6956_v53  ;;  %v2090_v53 = vld [vmem:[#allocation14 + $0x90] sm:$0xff]  ;;  %v6671_v45 = vcombine.high %v2122_v29, %v2126_v32 }
 0x731   : > { %5511 = vmatprep.subr.bf16.mxu1 %v6965_v3  ;;  %v6630_v3 = vcombine.low %v2082_v51, %v2086_v52  ;;  %v6639_v62 = vcombine.high %v2090_v53, %v2094_v54  ;;  %v2134_v51 = vld [vmem:[#allocation14 + $0x1f0] sm:$0xff] }
 0x732   : > { %5551 = vmatpush1.bf16.msra.mxu0 %v7084_v60  ;;  %v2218_v60 = vld [vmem:[#allocation14 + $0x490] sm:$0xff] }
 0x733   : > { %5552 = vmatprep.subr.bf16.mxu0 %v7093_v4  ;;  %v6758_v4 = vcombine.low %v2210_v58, %v2214_v55  ;;  %v6767_v9 = vcombine.high %v2218_v60, %v2222_v61 }
 0x734   : > { %5512 = vmatpush1.bf16.msra.mxu1 %v6964_v7  ;;  %v2098_v7 = vld [vmem:[#allocation14 + $0xd0] sm:$0xff] }
 0x735   : > { %5513 = vmatprep.subr.bf16.mxu1 %v6973_v11  ;;  %v6638_v11 = vcombine.low %v2090_v53, %v2094_v54  ;;  %v6647_v13 = vcombine.high %v2098_v7, %v2102_v8 }
 0x736   : > { %5553 = vmatpush1.bf16.msra.mxu0 %v7092_v30  ;;  %v2226_v30 = vld [vmem:[#allocation14 + $0x4d0] sm:$0xff] }
 0x737   : > { %5554 = vmatprep.subr.bf16.mxu0 %v7101_v14  ;;  %v6766_v14 = vcombine.low %v2218_v60, %v2222_v61  ;;  %v6775_v20 = vcombine.high %v2226_v30, %v2230_v12 }
 0x738   : > { %5514 = vmatpush1.bf16.msra.mxu1 %v6972_v18  ;;  %v2106_v18 = vld [vmem:[#allocation14 + $0x110] sm:$0xff] }
 0x739   : > { %5515 = vmatprep.subr.bf16.mxu1 %v6981_v6  ;;  %v6646_v6 = vcombine.low %v2098_v7, %v2102_v8  ;;  %v6655_v15 = vcombine.high %v2106_v18, %v2110_v19  ;;  %v2142_v7 = vld [vmem:[#allocation14 + $0x230] sm:$0xff] }
 0x73a   : > { %5555 = vmatpush1.bf16.msra.mxu0 %v7100_v36  ;;  %v2234_v36 = vld [vmem:[#allocation14 + $0x510] sm:$0xff] }
 0x73b   : > { %5556 = vmatprep.subr.bf16.mxu0 %v7109_v22  ;;  %v6774_v22 = vcombine.low %v2226_v30, %v2230_v12  ;;  %v6783_v24 = vcombine.high %v2234_v36, %v2238_v21  ;;  %v2266_v30 = vld [vmem:[#allocation14 + $0x610] sm:$0xff] }
 0x73c   : > { %5516 = vmatpush1.bf16.msra.mxu1 %v6980_v1  ;;  %v2114_v1 = vld [vmem:[#allocation14 + $0x150] sm:$0xff] }
 0x73d   : > { %5517 = vmatprep.subr.bf16.mxu1 %v6989_v25  ;;  %v6654_v25 = vcombine.low %v2106_v18, %v2110_v19  ;;  %v6662_v37 = vcombine.low %v2114_v1, %v2118_v23  ;;  %v2270_v12 = vld [vmem:[#allocation14 + $0x630] sm:$0xff] }
 0x73e   : > { %5557 = vmatpush1.bf16.msra.mxu0 %v7108_v26  ;;  %v8505_v26 = vld [vmem:[#allocation17 + $0x4] sm:$0xff]  ;;  %v2146_v18 = vld [vmem:[#allocation14 + $0x250] sm:$0xff] }
 0x73f   : > { %5558 = vmatprep.subr.bf16.mxu0 %v7117_v16  ;;  %v6663_v16 = vcombine.high %v2114_v1, %v2118_v23  ;;  %v2592_v38 = vrot.slane %v8505_v26, %v8336_v40  ;;  %v2262_v40 = vld [vmem:[#allocation14 + $0x5f0] sm:$0xff] }
 0x740   : > { %5518 = vmatpush1.bf16.msra.mxu1 %v6988_v17  ;;  %v6782_v17 = vcombine.low %v2234_v36, %v2238_v21  ;;  %v2150_v19 = vld [vmem:[#allocation14 + $0x270] sm:$0xff] }
 0x741   : > { %5519 = vmatprep.subr.bf16.mxu1 %v6997_v33  ;;  %v2588_v33 = vrot.slane %v8505_v26, %v8333_v39  ;;  %v2274_v36 = vld [vmem:[#allocation14 + $0x650] sm:$0xff] }
 0x742   : > { %5559 = vmatpush1.bf16.msra.mxu0 %v7116_v35  ;;  %v6791_v35 = vcombine.high %v2242_v27, %v2246_v28  ;;  %v2278_v21 = vld [vmem:[#allocation14 + $0x670] sm:$0xff] }
 0x743   : > { %5560 = vmatprep.subr.bf16.mxu0 %v7125_v43  ;;  %v2250_v43 = vld [vmem:[#allocation14 + $0x590] sm:$0xff] }
 0x744   : > { %5520 = vmatpush1.bf16.msra.mxu1 %v6996_v44  ;;  %v2254_v44 = vld [vmem:[#allocation14 + $0x5b0] sm:$0xff] }
 0x745   : > { %5571 = vmatprep.subr.bf16.mxu1 %v6623_v48  ;;  %v6790_v48 = vcombine.low %v2242_v27, %v2246_v28  ;;  %v2154_v1 = vld [vmem:[#allocation14 + $0x290] sm:$0xff] }
 0x746   : > { %5561 = vmatpush1.bf16.msra.mxu0 %v7124_v50  ;;  %v2130_v50 = vld [vmem:[#allocation14 + $0x1d0] sm:$0xff] }
 0x747   : > { %5522 = vmatmul.mubr.bf16.vlgmr.msra.gmra.mrb[12].mxu1 %v8487_v2  ;;  %5612 = vmatprep.subr.bf16.mxu0 %v6751_v56  ;;  %v2158_v23 = vld [vmem:[#allocation14 + $0x2b0] sm:$0xff] }
 0x748   : > { %5572 = vmatpush1.bf16.msra.mxu1 %v6622_v57  ;;  %5603 = vmatprep.mubr.bf16.mxu1 %v8454_v34  ;;  %v6799_v57 = vcombine.high %v2250_v43, %v2254_v44  ;;  %v2282_v27 = vld [vmem:[#allocation14 + $0x690] sm:$0xff] }
 0x749   : > { %5563 = vmatmul.mubr.bf16.vlgmr.msra.gmra.mrb[16].mxu0 %v8492_v10  ;;  %5573 = vmatprep.subr.bf16.mxu1 %v6631_v59  ;;  %v6670_v59 = vcombine.low %v2122_v29, %v2126_v32  ;;  %v2286_v28 = vld [vmem:[#allocation14 + $0x6b0] sm:$0xff] }
 0x74a   : > { %5613 = vmatpush1.bf16.msra.mxu0 %v6750_v63  ;;  %5644 = vmatprep.mubr.bf16.mxu0 %v8461_v41  ;;  %v2258_v63 = vld [vmem:[#allocation14 + $0x5d0] sm:$0xff] }
 0x74b   : > { %5614 = vmatprep.subr.bf16.mxu0 %v6759_v0  ;;  %v2162_v29 = vld [vmem:[#allocation14 + $0x2d0] sm:$0xff] }
 0x74c   : > { %5574 = vmatpush1.bf16.msra.mxu1 %v6630_v3  ;;  %v6679_v3 = vcombine.high %v2130_v50, %v2134_v51  ;;  %v2166_v32 = vld [vmem:[#allocation14 + $0x2f0] sm:$0xff] }
 0x74d   : > { %5575 = vmatprep.subr.bf16.mxu1 %v6639_v62  ;;  %v6798_v62 = vcombine.low %v2250_v43, %v2254_v44  ;;  %v6711_v43 = vcombine.high %v2162_v29, %v2166_v32  ;;  %v6830_v44 = vcombine.low %v2282_v27, %v2286_v28 }
 0x74e   : > { %5615 = vmatpush1.bf16.msra.mxu0 %v6758_v4  ;;  %v2138_v4 = vld [vmem:[#allocation14 + $0x210] sm:$0xff] }
 0x74f   : > { %5616 = vmatprep.subr.bf16.mxu0 %v6767_v9  ;;  %v6807_v9 = vcombine.high %v2258_v63, %v2262_v40 }
 0x750   : > { %5576 = vmatpush1.bf16.msra.mxu1 %v6638_v11  ;;  %v6678_v11 = vcombine.low %v2130_v50, %v2134_v51  ;;  %v6710_v50 = vcombine.low %v2162_v29, %v2166_v32  ;;  %v2298_v51 = vld [vmem:[#allocation14 + $0x710] sm:$0xff] }
 0x751   : > { %5577 = vmatprep.subr.bf16.mxu1 %v6647_v13  ;;  %v6687_v13 = vcombine.high %v2138_v4, %v2142_v7  ;;  %v2466_v29 = vld [vmem:[#allocation14 + $0xc50] sm:$0xff] }
 0x752   : > { %5617 = vmatpush1.bf16.msra.mxu0 %v6766_v14  ;;  %v6806_v14 = vcombine.low %v2258_v63, %v2262_v40  ;;  %v2306_v63 = vld [vmem:[#allocation14 + $0x750] sm:$0xff] }
 0x753   : > { %5618 = vmatprep.subr.bf16.mxu0 %v6775_v20  ;;  %v6815_v20 = vcombine.high %v2266_v30, %v2270_v12  ;;  %v2310_v40 = vld [vmem:[#allocation14 + $0x770] sm:$0xff] }
 0x754   : > { %5578 = vmatpush1.bf16.msra.mxu1 %v6646_v6  ;;  %v6686_v6 = vcombine.low %v2138_v4, %v2142_v7  ;;  %v2314_v7 = vld [vmem:[#allocation14 + $0x790] sm:$0xff] }
 0x755   : > { %5579 = vmatprep.subr.bf16.mxu1 %v6655_v15  ;;  %v6695_v15 = vcombine.high %v2146_v18, %v2150_v19  ;;  %v2470_v32 = vld [vmem:[#allocation14 + $0xc70] sm:$0xff] }
 0x756   : > { %5619 = vmatpush1.bf16.msra.mxu0 %v6774_v22  ;;  %v6814_v22 = vcombine.low %v2266_v30, %v2270_v12  ;;  %v2194_v30 = vld [vmem:[#allocation14 + $0x3d0] sm:$0xff] }
 0x757   : > { %5620 = vmatprep.subr.bf16.mxu0 %v6783_v24  ;;  %v6823_v24 = vcombine.high %v2274_v36, %v2278_v21  ;;  %v2198_v12 = vld [vmem:[#allocation14 + $0x3f0] sm:$0xff] }
 0x758   : > { %5580 = vmatpush1.bf16.msra.mxu1 %v6654_v25  ;;  %v6694_v25 = vcombine.low %v2146_v18, %v2150_v19  ;;  %v2322_v18 = vld [vmem:[#allocation14 + $0x7d0] sm:$0xff] }
 0x759   : > { %5581 = vmatprep.subr.bf16.mxu1 %v6663_v16  ;;  %v6703_v16 = vcombine.high %v2154_v1, %v2158_v23  ;;  %v2326_v19 = vld [vmem:[#allocation14 + $0x7f0] sm:$0xff] }
 0x75a   : > { %5621 = vmatpush1.bf16.msra.mxu0 %v6782_v17  ;;  %v5277_v47 = vpop.f32.mrb[0].mxu1  ;;  %v6822_v17 = vcombine.low %v2274_v36, %v2278_v21  ;;  %v2330_v36 = vld [vmem:[#allocation14 + $0x810] sm:$0xff] }
 0x75b   : > { %v5278_v52 = vadd.f32 %v5277_v47, %v2588_v33  ;;  %v5279_v56 = vpop.f32.mrb[1].mxu1  ;;  %5622 = vmatprep.subr.bf16.mxu0 %v6791_v35  ;;  %v6831_v33 = vcombine.high %v2282_v27, %v2286_v28  ;;  %v6702_v35 = vcombine.low %v2154_v1, %v2158_v23  ;;  %v2174_v47 = vld [vmem:[#allocation14 + $0x330] sm:$0xff] }
 0x75c   : > { %v5280_v39 = vadd.f32 %v5279_v56, %v2592_v38  ;;  %5582 = vmatpush1.bf16.msra.mxu1 %v6662_v37  ;;  %v5281_v58 = vpop.f32.mrb[2].mxu1  ;;  %v5318_v55 = vpop.f32.mrb[4].mxu0  ;;  %v2290_v37 = vld [vmem:[#allocation14 + $0x6d0] sm:$0xff] }
 0x75d   : > { %v8511_v53 = vadd.f32 %v5318_v55, %v5278_v52  ;;  %v5282_v54 = vpop.f32.mrb[3].mxu1  ;;  %v5320_v0 = vpop.f32.mrb[5].mxu0  ;;  %5583 = vmatprep.subr.bf16.mxu1 %v6671_v45  ;;  %v2294_v38 = vld [vmem:[#allocation14 + $0x6f0] sm:$0xff] }
 0x75e   : > { %v8513_v60 = vadd.f32 %v5320_v0, %v5280_v39  ;;  %5623 = vmatpush1.bf16.msra.mxu0 %v6790_v48  ;;  %v5322_v61 = vpop.f32.mrb[6].mxu0  ;;  %v2170_v45 = vld [vmem:[#allocation14 + $0x310] sm:$0xff]  ;;  %v6839_v48 = vcombine.high %v2290_v37, %v2294_v38 }
 0x75f   : > { %v5323_v8 = vpop.f32.mrb[7].mxu0  ;;  %5624 = vmatprep.subr.bf16.mxu0 %v6799_v57  ;;  %v2302_v52 = vld [vmem:[#allocation14 + $0x730] sm:$0xff]  ;;  %v6719_v56 = vcombine.high %v2170_v45, %v2174_v47  ;;  %v6838_v57 = vcombine.low %v2290_v37, %v2294_v38 }
 0x760   : > { %5584 = vmatpush1.bf16.msra.mxu1 %v6670_v59  ;;  %v2178_v39 = vld [vmem:[#allocation14 + $0x350] sm:$0xff]  ;;  %v6847_v55 = vcombine.high %v2298_v51, %v2302_v52  ;;  %v6718_v59 = vcombine.low %v2170_v45, %v2174_v47  ;;  %v6846_v0 = vcombine.low %v2298_v51, %v2302_v52 }
 0x761   : > { %5585 = vmatprep.subr.bf16.mxu1 %v6679_v3  ;;  %v2182_v58 = vld [vmem:[#allocation14 + $0x370] sm:$0xff] }
 0x762   : > { %5625 = vmatpush1.bf16.msra.mxu0 %v6798_v62  ;;  %v6727_v54 = vcombine.high %v2178_v39, %v2182_v58  ;;  %v2186_v3 = vld [vmem:[#allocation14 + $0x390] sm:$0xff]  ;;  %v6855_v62 = vcombine.high %v2306_v63, %v2310_v40  ;;  %v6726_v4 = vcombine.low %v2178_v39, %v2182_v58 }
 0x763   : > { %5626 = vmatprep.subr.bf16.mxu0 %v6807_v9  ;;  %v2190_v61 = vld [vmem:[#allocation14 + $0x3b0] sm:$0xff] }
 0x764   : > { %5586 = vmatpush1.bf16.msra.mxu1 %v6678_v11  ;;  %v2318_v8 = vld [vmem:[#allocation14 + $0x7b0] sm:$0xff]  ;;  %v6735_v9 = vcombine.high %v2186_v3, %v2190_v61  ;;  %v6854_v11 = vcombine.low %v2306_v63, %v2310_v40 }
 0x765   : > { %5587 = vmatprep.subr.bf16.mxu1 %v6687_v13  ;;  %v6863_v13 = vcombine.high %v2314_v7, %v2318_v8  ;;  %v2334_v21 = vld [vmem:[#allocation14 + $0x830] sm:$0xff] }
 0x766   : > { %5627 = vmatpush1.bf16.msra.mxu0 %v6806_v14  ;;  %v6734_v14 = vcombine.low %v2186_v3, %v2190_v61  ;;  %v2458_v1 = vld [vmem:[#allocation14 + $0xc10] sm:$0xff] }
 0x767   : > { %5628 = vmatprep.subr.bf16.mxu0 %v6815_v20  ;;  %v6743_v20 = vcombine.high %v2194_v30, %v2198_v12  ;;  %v2462_v23 = vld [vmem:[#allocation14 + $0xc30] sm:$0xff] }
 0x768   : > { %5588 = vmatpush1.bf16.msra.mxu1 %v6686_v6  ;;  %v6862_v6 = vcombine.low %v2314_v7, %v2318_v8  ;;  %v2338_v27 = vld [vmem:[#allocation14 + $0x850] sm:$0xff] }
 0x769   : > { %5589 = vmatprep.subr.bf16.mxu1 %v6695_v15  ;;  %v6871_v15 = vcombine.high %v2322_v18, %v2326_v19  ;;  %v2342_v28 = vld [vmem:[#allocation14 + $0x870] sm:$0xff] }
 0x76a   : > { %5629 = vmatpush1.bf16.msra.mxu0 %v6814_v22  ;;  %v6742_v22 = vcombine.low %v2194_v30, %v2198_v12  ;;  %v2346_v37 = vld [vmem:[#allocation14 + $0x890] sm:$0xff] }
 0x76b   : > { %5630 = vmatprep.subr.bf16.mxu0 %v6823_v24  ;;  %v6879_v24 = vcombine.high %v2330_v36, %v2334_v21  ;;  %v2350_v38 = vld [vmem:[#allocation14 + $0x8b0] sm:$0xff] }
 0x76c   : > { %5590 = vmatpush1.bf16.msra.mxu1 %v6694_v25  ;;  %v6870_v25 = vcombine.low %v2322_v18, %v2326_v19  ;;  %v2474_v45 = vld [vmem:[#allocation14 + $0xc90] sm:$0xff] }
 0x76d   : > { %5591 = vmatprep.subr.bf16.mxu1 %v6703_v16  ;;  %v7007_v16 = vcombine.high %v2458_v1, %v2462_v23  ;;  %v2478_v47 = vld [vmem:[#allocation14 + $0xcb0] sm:$0xff] }
 0x76e   : > { %5631 = vmatpush1.bf16.msra.mxu0 %v6822_v17  ;;  %v6878_v17 = vcombine.low %v2330_v36, %v2334_v21  ;;  %v2354_v51 = vld [vmem:[#allocation14 + $0x8d0] sm:$0xff] }
 0x76f   : > { %5632 = vmatprep.subr.bf16.mxu0 %v6831_v33  ;;  %v6887_v33 = vcombine.high %v2338_v27, %v2342_v28  ;;  %v2358_v52 = vld [vmem:[#allocation14 + $0x8f0] sm:$0xff] }
 0x770   : > { %5592 = vmatpush1.bf16.msra.mxu1 %v6702_v35  ;;  %v7006_v35 = vcombine.low %v2458_v1, %v2462_v23  ;;  %v2482_v39 = vld [vmem:[#allocation14 + $0xcd0] sm:$0xff] }
 0x771   : > { %5593 = vmatprep.subr.bf16.mxu1 %v6711_v43  ;;  %v7015_v43 = vcombine.high %v2466_v29, %v2470_v32  ;;  %v2486_v58 = vld [vmem:[#allocation14 + $0xcf0] sm:$0xff] }
 0x772   : > { %5633 = vmatpush1.bf16.msra.mxu0 %v6830_v44  ;;  %v6886_v44 = vcombine.low %v2338_v27, %v2342_v28  ;;  %v2362_v63 = vld [vmem:[#allocation14 + $0x910] sm:$0xff] }
 0x773   : > { %5634 = vmatprep.subr.bf16.mxu0 %v6839_v48  ;;  %v6895_v48 = vcombine.high %v2346_v37, %v2350_v38  ;;  %v2366_v40 = vld [vmem:[#allocation14 + $0x930] sm:$0xff] }
 0x774   : > { %5594 = vmatpush1.bf16.msra.mxu1 %v6710_v50  ;;  %v7014_v50 = vcombine.low %v2466_v29, %v2470_v32  ;;  %v2490_v3 = vld [vmem:[#allocation14 + $0xd10] sm:$0xff] }
 0x775   : > { %5595 = vmatprep.subr.bf16.mxu1 %v6719_v56  ;;  %v7023_v56 = vcombine.high %v2474_v45, %v2478_v47  ;;  %v2494_v61 = vld [vmem:[#allocation14 + $0xd30] sm:$0xff] }
 0x776   : > { %5635 = vmatpush1.bf16.msra.mxu0 %v6838_v57  ;;  %v6894_v57 = vcombine.low %v2346_v37, %v2350_v38  ;;  %v2370_v7 = vld [vmem:[#allocation14 + $0x950] sm:$0xff] }
 0x777   : > { %5636 = vmatprep.subr.bf16.mxu0 %v6847_v55  ;;  %v6903_v55 = vcombine.high %v2354_v51, %v2358_v52  ;;  %v2374_v8 = vld [vmem:[#allocation14 + $0x970] sm:$0xff] }
 0x778   : > { %5596 = vmatpush1.bf16.msra.mxu1 %v6718_v59  ;;  %v7022_v59 = vcombine.low %v2474_v45, %v2478_v47  ;;  %v2498_v30 = vld [vmem:[#allocation14 + $0xd50] sm:$0xff] }
 0x779   : > { %5597 = vmatprep.subr.bf16.mxu1 %v6727_v54  ;;  %v7031_v54 = vcombine.high %v2482_v39, %v2486_v58  ;;  %v2502_v12 = vld [vmem:[#allocation14 + $0xd70] sm:$0xff] }
 0x77a   : > { %5637 = vmatpush1.bf16.msra.mxu0 %v6846_v0  ;;  %v6902_v0 = vcombine.low %v2354_v51, %v2358_v52  ;;  %v2378_v18 = vld [vmem:[#allocation14 + $0x990] sm:$0xff]  ;;  %v7046_v1 = vcombine.low %v2498_v30, %v2502_v12 }
 0x77b   : > { %5638 = vmatprep.subr.bf16.mxu0 %v6855_v62  ;;  %v6911_v62 = vcombine.high %v2362_v63, %v2366_v40  ;;  %v2382_v19 = vld [vmem:[#allocation14 + $0x9b0] sm:$0xff] }
 0x77c   : > { %5598 = vmatpush1.bf16.msra.mxu1 %v6726_v4  ;;  %v7030_v4 = vcombine.low %v2482_v39, %v2486_v58  ;;  %v2506_v36 = vld [vmem:[#allocation14 + $0xd90] sm:$0xff]  ;;  %v6926_v32 = vcombine.low %v2378_v18, %v2382_v19 }
 0x77d   : > { %5599 = vmatprep.subr.bf16.mxu1 %v6735_v9  ;;  %v7039_v9 = vcombine.high %v2490_v3, %v2494_v61  ;;  %v2510_v21 = vld [vmem:[#allocation14 + $0xdb0] sm:$0xff] }
 0x77e   : > { %5639 = vmatpush1.bf16.msra.mxu0 %v6854_v11  ;;  %v6910_v11 = vcombine.low %v2362_v63, %v2366_v40  ;;  %v2386_v23 = vld [vmem:[#allocation14 + $0x9d0] sm:$0xff]  ;;  %v7055_v28 = vcombine.high %v2506_v36, %v2510_v21  ;;  %v7054_v47 = vcombine.low %v2506_v36, %v2510_v21 }
 0x77f   : > { %5640 = vmatprep.subr.bf16.mxu0 %v6863_v13  ;;  %v6919_v13 = vcombine.high %v2370_v7, %v2374_v8 }
 0x780   : > { %5600 = vmatpush1.bf16.msra.mxu1 %v6734_v14  ;;  %v7038_v14 = vcombine.low %v2490_v3, %v2494_v61 }
 0x781   : > { %5601 = vmatprep.subr.bf16.mxu1 %v6743_v20  ;;  %v7047_v20 = vcombine.high %v2498_v30, %v2502_v12 }
 0x782   : > { %5641 = vmatpush1.bf16.msra.mxu0 %v6862_v6  ;;  %v6918_v6 = vcombine.low %v2370_v7, %v2374_v8 }
 0x783   : > { %5642 = vmatprep.subr.bf16.mxu0 %v6871_v15  ;;  %v6927_v15 = vcombine.high %v2378_v18, %v2382_v19 }
 0x784   : > { %5602 = vmatpush1.bf16.msra.mxu1 %v6742_v22 }
 0x785   : > { %5653 = vmatprep.subr.bf16.mxu1 %v6879_v24  ;;  %v2390_v24 = vld [vmem:[#allocation14 + $0x9f0] sm:$0xff] }
 0x786   : > { %5643 = vmatpush1.bf16.msra.mxu0 %v6870_v25  ;;  %v6934_v52 = vcombine.low %v2386_v23, %v2390_v24 }
 0x787   : > { %5604 = vmatmul.mubr.bf16.vlgmr.msra.gmra.mrb[16].mxu1 %v8451_v31  ;;  %5694 = vmatprep.subr.bf16.mxu0 %v7007_v16 }
 0x788   : > { %5654 = vmatpush1.bf16.msra.mxu1 %v6878_v17  ;;  %5685 = vmatprep.mubr.bf16.mxu1 %v8464_v42 }
 0x789   : > { %5645 = vmatmul.mubr.bf16.vlgmr.msra.gmra.mrb[20].mxu0 %v8469_v46  ;;  %5655 = vmatprep.subr.bf16.mxu1 %v6887_v33  ;;  %v2514_v33 = vld [vmem:[#allocation14 + $0xdd0] sm:$0xff] }
 0x78a   : > { %5695 = vmatpush1.bf16.msra.mxu0 %v7006_v35  ;;  %5726 = vmatprep.mubr.bf16.mxu0 %v8477_v49  ;;  %v2518_v35 = vld [vmem:[#allocation14 + $0xdf0] sm:$0xff] }
 0x78b   : > { %5696 = vmatprep.subr.bf16.mxu0 %v7015_v43  ;;  %v7063_v51 = vcombine.high %v2514_v33, %v2518_v35  ;;  %v7062_v58 = vcombine.low %v2514_v33, %v2518_v35  ;;  %v2562_v33 = vld [vmem:[#allocation14 + $0xf50] sm:$0xff] }
 0x78c   : > { %5656 = vmatpush1.bf16.msra.mxu1 %v6886_v44  ;;  %v6935_v44 = vcombine.high %v2386_v23, %v2390_v24  ;;  %v2554_v24 = vld [vmem:[#allocation14 + $0xf10] sm:$0xff] }
 0x78d   : > { %5657 = vmatprep.subr.bf16.mxu1 %v6895_v48  ;;  %v2394_v48 = vld [vmem:[#allocation14 + $0xa10] sm:$0xff] }
 0x78e   : > { %5697 = vmatpush1.bf16.msra.mxu0 %v7014_v50  ;;  %v2398_v50 = vld [vmem:[#allocation14 + $0xa30] sm:$0xff] }
 0x78f   : > { %5698 = vmatprep.subr.bf16.mxu0 %v7023_v56  ;;  %v2522_v56 = vld [vmem:[#allocation14 + $0xe10] sm:$0xff]  ;;  %v6943_v39 = vcombine.high %v2394_v48, %v2398_v50  ;;  %v6942_v40 = vcombine.low %v2394_v48, %v2398_v50 }
 0x790   : > { %5658 = vmatpush1.bf16.msra.mxu1 %v6894_v57  ;;  %v2526_v57 = vld [vmem:[#allocation14 + $0xe30] sm:$0xff] }
 0x791   : > { %5659 = vmatprep.subr.bf16.mxu1 %v6903_v55  ;;  %v2402_v55 = vld [vmem:[#allocation14 + $0xa50] sm:$0xff]  ;;  %v7071_v63 = vcombine.high %v2522_v56, %v2526_v57  ;;  %v7070_v61 = vcombine.low %v2522_v56, %v2526_v57 }
 0x792   : > { %5699 = vmatpush1.bf16.msra.mxu0 %v7022_v59  ;;  %v2406_v59 = vld [vmem:[#allocation14 + $0xa70] sm:$0xff] }
 0x793   : > { %5700 = vmatprep.subr.bf16.mxu0 %v7031_v54  ;;  %v2530_v54 = vld [vmem:[#allocation14 + $0xe50] sm:$0xff]  ;;  %v6951_v3 = vcombine.high %v2402_v55, %v2406_v59  ;;  %v6950_v8 = vcombine.low %v2402_v55, %v2406_v59 }
 0x794   : > { %5660 = vmatpush1.bf16.msra.mxu1 %v6902_v0  ;;  %v2534_v0 = vld [vmem:[#allocation14 + $0xe70] sm:$0xff] }
 0x795   : > { %5661 = vmatprep.subr.bf16.mxu1 %v6911_v62  ;;  %v2410_v62 = vld [vmem:[#allocation14 + $0xa90] sm:$0xff]  ;;  %v7079_v7 = vcombine.high %v2530_v54, %v2534_v0  ;;  %v7078_v12 = vcombine.low %v2530_v54, %v2534_v0  ;;  %v2075_v54 = vld [vmem:[#allocation14 + $0x18] sm:$0xff] }
 0x796   : > { %5701 = vmatpush1.bf16.msra.mxu0 %v7030_v4  ;;  %v2414_v4 = vld [vmem:[#allocation14 + $0xab0] sm:$0xff]  ;;  %v2079_v0 = vld [vmem:[#allocation14 + $0x38] sm:$0xff] }
 0x797   : > { %5702 = vmatprep.subr.bf16.mxu0 %v7039_v9  ;;  %v2538_v9 = vld [vmem:[#allocation14 + $0xe90] sm:$0xff]  ;;  %v6959_v30 = vcombine.high %v2410_v62, %v2414_v4  ;;  %v6958_v19 = vcombine.low %v2410_v62, %v2414_v4  ;;  %v2203_v62 = vld [vmem:[#allocation14 + $0x418] sm:$0xff] }
 0x798   : > { %5662 = vmatpush1.bf16.msra.mxu1 %v6910_v11  ;;  %v2542_v11 = vld [vmem:[#allocation14 + $0xeb0] sm:$0xff]  ;;  %v2207_v4 = vld [vmem:[#allocation14 + $0x438] sm:$0xff] }
 0x799   : > { %5663 = vmatprep.subr.bf16.mxu1 %v6919_v13  ;;  %v2418_v13 = vld [vmem:[#allocation14 + $0xad0] sm:$0xff]  ;;  %v7087_v18 = vcombine.high %v2538_v9, %v2542_v11  ;;  %v7086_v21 = vcombine.low %v2538_v9, %v2542_v11  ;;  %v2083_v9 = vld [vmem:[#allocation14 + $0x58] sm:$0xff] }
 0x79a   : > { %v5359_v22 = vpop.f32.mrb[4].mxu1  ;;  %5703 = vmatpush1.bf16.msra.mxu0 %v7038_v14  ;;  %v2422_v14 = vld [vmem:[#allocation14 + $0xaf0] sm:$0xff]  ;;  %v2087_v11 = vld [vmem:[#allocation14 + $0x78] sm:$0xff] }
 0x79b   : > { %v5360_v25 = vadd.f32 %v5359_v22, %v8511_v53  ;;  %v5361_v27 = vpop.f32.mrb[5].mxu1  ;;  %5704 = vmatprep.subr.bf16.mxu0 %v7047_v20  ;;  %v2546_v20 = vld [vmem:[#allocation14 + $0xed0] sm:$0xff]  ;;  %v6967_v36 = vcombine.high %v2418_v13, %v2422_v14  ;;  %v6966_v23 = vcombine.low %v2418_v13, %v2422_v14  ;;  %v2211_v13 = vld [vmem:[#allocation14 + $0x458] sm:$0xff] }
 0x79c   : > { %v5362_v16 = vadd.f32 %v5361_v27, %v8513_v60  ;;  %v5363_v17 = vpop.f32.mrb[6].mxu1  ;;  %v5400_v29 = vpop.f32.mrb[8].mxu0  ;;  %5664 = vmatpush1.bf16.msra.mxu1 %v6918_v6  ;;  %v2550_v6 = vld [vmem:[#allocation14 + $0xef0] sm:$0xff]  ;;  %v2215_v14 = vld [vmem:[#allocation14 + $0x478] sm:$0xff] }
 0x79d   : > { %v8521_v37 = vadd.f32 %v5400_v29, %v5360_v25  ;;  %v5364_v38 = vpop.f32.mrb[7].mxu1  ;;  %v5402_v43 = vpop.f32.mrb[9].mxu0  ;;  %5665 = vmatprep.subr.bf16.mxu1 %v6927_v15  ;;  %v2426_v15 = vld [vmem:[#allocation14 + $0xb10] sm:$0xff] }
 0x79e   : > { %v8523_v45 = vadd.f32 %v5402_v43, %v5362_v16  ;;  %v5404_v53 = vpop.f32.mrb[10].mxu0  ;;  %5705 = vmatpush1.bf16.msra.mxu0 %v7046_v1  ;;  %v2430_v22 = vld [vmem:[#allocation14 + $0xb30] sm:$0xff]  ;;  %v7095_v1 = vcombine.high %v2546_v20, %v2550_v6 }
 0x79f   : > { %v5405_v60 = vpop.f32.mrb[11].mxu0  ;;  %5706 = vmatprep.subr.bf16.mxu0 %v7055_v28  ;;  %v2558_v25 = vld [vmem:[#allocation14 + $0xf30] sm:$0xff]  ;;  %v6975_v27 = vcombine.high %v2426_v15, %v2430_v22  ;;  %v7094_v28 = vcombine.low %v2546_v20, %v2550_v6  ;;  %v2091_v20 = vld [vmem:[#allocation14 + $0x98] sm:$0xff] }
 0x7a0   : > { %5666 = vmatpush1.bf16.msra.mxu1 %v6926_v32  ;;  %v2434_v16 = vld [vmem:[#allocation14 + $0xb50] sm:$0xff]  ;;  %v7103_v29 = vcombine.high %v2554_v24, %v2558_v25  ;;  %v6974_v32 = vcombine.low %v2426_v15, %v2430_v22  ;;  %v7102_v43 = vcombine.low %v2554_v24, %v2558_v25  ;;  %v2095_v6 = vld [vmem:[#allocation14 + $0xb8] sm:$0xff] }
 0x7a1   : > { %5667 = vmatprep.subr.bf16.mxu1 %v6935_v44  ;;  %v2438_v17 = vld [vmem:[#allocation14 + $0xb70] sm:$0xff]  ;;  %v2219_v15 = vld [vmem:[#allocation14 + $0x498] sm:$0xff] }
 0x7a2   : > { %5707 = vmatpush1.bf16.msra.mxu0 %v7054_v47  ;;  %v2566_v35 = vld [vmem:[#allocation14 + $0xf70] sm:$0xff]  ;;  %v6983_v38 = vcombine.high %v2434_v16, %v2438_v17  ;;  %v6982_v48 = vcombine.low %v2434_v16, %v2438_v17  ;;  %v2223_v22 = vld [vmem:[#allocation14 + $0x4b8] sm:$0xff] }
 0x7a3   : > { %5708 = vmatprep.subr.bf16.mxu0 %v7063_v51  ;;  %v2442_v44 = vld [vmem:[#allocation14 + $0xb90] sm:$0xff]  ;;  %v7111_v47 = vcombine.high %v2562_v33, %v2566_v35  ;;  %v2099_v24 = vld [vmem:[#allocation14 + $0xd8] sm:$0xff] }
 0x7a4   : > { %5668 = vmatpush1.bf16.msra.mxu1 %v6934_v52  ;;  %v2446_v53 = vld [vmem:[#allocation14 + $0xbb0] sm:$0xff]  ;;  %v7110_v52 = vcombine.low %v2562_v33, %v2566_v35  ;;  %v2103_v25 = vld [vmem:[#allocation14 + $0xf8] sm:$0xff] }
 0x7a5   : > { %5669 = vmatprep.subr.bf16.mxu1 %v6943_v39  ;;  %v2570_v50 = vld [vmem:[#allocation14 + $0xf90] sm:$0xff]  ;;  %v6991_v51 = vcombine.high %v2442_v44, %v2446_v53  ;;  %v2227_v16 = vld [vmem:[#allocation14 + $0x4d8] sm:$0xff] }
 0x7a6   : > { %5709 = vmatpush1.bf16.msra.mxu0 %v7062_v58  ;;  %v2574_v60 = vld [vmem:[#allocation14 + $0xfb0] sm:$0xff]  ;;  %v6990_v58 = vcombine.low %v2442_v44, %v2446_v53  ;;  %v2231_v17 = vld [vmem:[#allocation14 + $0x4f8] sm:$0xff] }
 0x7a7   : > { %5710 = vmatprep.subr.bf16.mxu0 %v7071_v63  ;;  %v2450_v56 = vld [vmem:[#allocation14 + $0xbd0] sm:$0xff]  ;;  %v7119_v39 = vcombine.high %v2570_v50, %v2574_v60  ;;  %v2111_v33 = vld [vmem:[#allocation14 + $0x138] sm:$0xff]  ;;  %v6777_v35 = vcombine.high %v2227_v16, %v2231_v17  ;;  %v6776_v53 = vcombine.low %v2227_v16, %v2231_v17 }
 0x7a8   : > { %5670 = vmatpush1.bf16.msra.mxu1 %v6942_v40  ;;  %v2454_v57 = vld [vmem:[#allocation14 + $0xbf0] sm:$0xff]  ;;  %v7118_v40 = vcombine.low %v2570_v50, %v2574_v60  ;;  %v2595_v60 = vsub.s32 2, %v8325_v5  ;;  %v2267_v17 = vld [vmem:[#allocation14 + $0x618] sm:$0xff] }
 0x7a9   : > { %5671 = vmatprep.subr.bf16.mxu1 %v6951_v3  ;;  %v2578_v55 = vld [vmem:[#allocation14 + $0xfd0] sm:$0xff]  ;;  %v6999_v63 = vcombine.high %v2450_v56, %v2454_v57 }
 0x7aa   : > { %5711 = vmatpush1.bf16.msra.mxu0 %v7070_v61  ;;  %v2582_v59 = vld [vmem:[#allocation14 + $0xff0] sm:$0xff]  ;;  %v6998_v61 = vcombine.low %v2450_v56, %v2454_v57  ;;  %v2243_v56 = vld [vmem:[#allocation14 + $0x558] sm:$0xff] }
 0x7ab   : > { %5712 = vmatprep.subr.bf16.mxu0 %v7079_v7  ;;  %v7127_v3 = vcombine.high %v2578_v55, %v2582_v59  ;;  %v6625_v7 = vcombine.high %v2075_v54, %v2079_v0  ;;  %v2247_v57 = vld [vmem:[#allocation14 + $0x578] sm:$0xff] }
 0x7ac   : > { %5672 = vmatpush1.bf16.msra.mxu1 %v6950_v8  ;;  %v7126_v8 = vcombine.low %v2578_v55, %v2582_v59  ;;  %v2123_v55 = vld [vmem:[#allocation14 + $0x198] sm:$0xff] }
 0x7ad   : > { %5673 = vmatprep.subr.bf16.mxu1 %v6959_v30  ;;  %v6753_v30 = vcombine.high %v2203_v62, %v2207_v4  ;;  %v2127_v59 = vld [vmem:[#allocation14 + $0x1b8] sm:$0xff] }
 0x7ae   : > { %5713 = vmatpush1.bf16.msra.mxu0 %v7078_v12  ;;  %v6624_v12 = vcombine.low %v2075_v54, %v2079_v0 }
 0x7af   : > { %5714 = vmatprep.subr.bf16.mxu0 %v7087_v18  ;;  %v6633_v18 = vcombine.high %v2083_v9, %v2087_v11 }
 0x7b0   : > { %5674 = vmatpush1.bf16.msra.mxu1 %v6958_v19  ;;  %v6752_v19 = vcombine.low %v2203_v62, %v2207_v4  ;;  %v6673_v62 = vcombine.high %v2123_v55, %v2127_v59 }
 0x7b1   : > { %5675 = vmatprep.subr.bf16.mxu1 %v6967_v36  ;;  %v6761_v36 = vcombine.high %v2211_v13, %v2215_v14 }
 0x7b2   : > { %5715 = vmatpush1.bf16.msra.mxu0 %v7086_v21  ;;  %v6632_v21 = vcombine.low %v2083_v9, %v2087_v11  ;;  %v2135_v9 = vld [vmem:[#allocation14 + $0x1f8] sm:$0xff] }
 0x7b3   : > { %5716 = vmatprep.subr.bf16.mxu0 %v7095_v1  ;;  %v6641_v1 = vcombine.high %v2091_v20, %v2095_v6 }
 0x7b4   : > { %5676 = vmatpush1.bf16.msra.mxu1 %v6966_v23  ;;  %v6760_v23 = vcombine.low %v2211_v13, %v2215_v14 }
 0x7b5   : > { %5677 = vmatprep.subr.bf16.mxu1 %v6975_v27  ;;  %v6769_v27 = vcombine.high %v2219_v15, %v2223_v22 }
 0x7b6   : > { %5717 = vmatpush1.bf16.msra.mxu0 %v7094_v28  ;;  %v6640_v28 = vcombine.low %v2091_v20, %v2095_v6  ;;  %v2263_v20 = vld [vmem:[#allocation14 + $0x5f8] sm:$0xff] }
 0x7b7   : > { %5718 = vmatprep.subr.bf16.mxu0 %v7103_v29  ;;  %v6768_v29 = vcombine.low %v2219_v15, %v2223_v22 }
 0x7b8   : > { %5678 = vmatpush1.bf16.msra.mxu1 %v6974_v32  ;;  %v2107_v32 = vld [vmem:[#allocation14 + $0x118] sm:$0xff] }
 0x7b9   : > { %5679 = vmatprep.subr.bf16.mxu1 %v6983_v38  ;;  %v6648_v38 = vcombine.low %v2099_v24, %v2103_v25  ;;  %v6657_v44 = vcombine.high %v2107_v32, %v2111_v33 }
 0x7ba   : > { %5719 = vmatpush1.bf16.msra.mxu0 %v7102_v43  ;;  %v2239_v43 = vld [vmem:[#allocation14 + $0x538] sm:$0xff] }
 0x7bb   : > { %5720 = vmatprep.subr.bf16.mxu0 %v7111_v47  ;;  %v2115_v47 = vld [vmem:[#allocation14 + $0x158] sm:$0xff] }
 0x7bc   : > { %5680 = vmatpush1.bf16.msra.mxu1 %v6982_v48  ;;  %v2119_v48 = vld [vmem:[#allocation14 + $0x178] sm:$0xff] }
 0x7bd   : > { %5681 = vmatprep.subr.bf16.mxu1 %v6991_v51  ;;  %v6656_v51 = vcombine.low %v2107_v32, %v2111_v33  ;;  %v6664_v0 = vcombine.low %v2115_v47, %v2119_v48  ;;  %v2147_v33 = vld [vmem:[#allocation14 + $0x258] sm:$0xff] }
 0x7be   : > { %5721 = vmatpush1.bf16.msra.mxu0 %v7110_v52  ;;  %v2599_v52 = vsub.s32 3, %v8325_v5 }
 0x7bf   : > { %5722 = vmatprep.subr.bf16.mxu0 %v7119_v39  ;;  %v6665_v39 = vcombine.high %v2115_v47, %v2119_v48  ;;  %v2155_v48 = vld [vmem:[#allocation14 + $0x298] sm:$0xff] }
 0x7c0   : > { %5682 = vmatpush1.bf16.msra.mxu1 %v6990_v58  ;;  %v2600_v54 = vrot.slane %v8505_v26, %v2599_v52  ;;  %v2283_v52 = vld [vmem:[#allocation14 + $0x698] sm:$0xff] }
 0x7c1   : > { %5683 = vmatprep.subr.bf16.mxu1 %v6999_v63  ;;  %v2596_v63 = vrot.slane %v8505_v26, %v2595_v60  ;;  %v2259_v26 = vld [vmem:[#allocation14 + $0x5d8] sm:$0xff] }
 0x7c2   : > { %5723 = vmatpush1.bf16.msra.mxu0 %v7118_v40  ;;  %v6793_v40 = vcombine.high %v2243_v56, %v2247_v57  ;;  %v6808_v32 = vcombine.low %v2259_v26, %v2263_v20 }
 0x7c3   : > { %5724 = vmatprep.subr.bf16.mxu0 %v7127_v3  ;;  %v2251_v3 = vld [vmem:[#allocation14 + $0x598] sm:$0xff] }
 0x7c4   : > { %5684 = vmatpush1.bf16.msra.mxu1 %v6998_v61  ;;  %v2255_v61 = vld [vmem:[#allocation14 + $0x5b8] sm:$0xff] }
 0x7c5   : > { %5735 = vmatprep.subr.bf16.mxu1 %v6625_v7  ;;  %v6792_v7 = vcombine.low %v2243_v56, %v2247_v57  ;;  %v2287_v56 = vld [vmem:[#allocation14 + $0x6b8] sm:$0xff] }
 0x7c6   : > { %5725 = vmatpush1.bf16.msra.mxu0 %v7126_v8  ;;  %v2131_v8 = vld [vmem:[#allocation14 + $0x1d8] sm:$0xff] }
 0x7c7   : > { %5686 = vmatmul.mubr.bf16.vlgmr.msra.gmra.mrb[20].mxu1 %v8487_v2  ;;  %5776 = vmatprep.subr.bf16.mxu0 %v6753_v30  ;;  %v6681_v15 = vcombine.high %v2131_v8, %v2135_v9  ;;  %v6680_v16 = vcombine.low %v2131_v8, %v2135_v9  ;;  %v2299_v8 = vld [vmem:[#allocation14 + $0x718] sm:$0xff] }
 0x7c8   : > { %5736 = vmatpush1.bf16.msra.mxu1 %v6624_v12  ;;  %5767 = vmatprep.mubr.bf16.mxu1 %v8454_v34  ;;  %v6649_v34 = vcombine.high %v2099_v24, %v2103_v25  ;;  %v6801_v12 = vcombine.high %v2251_v3, %v2255_v61  ;;  %v2139_v24 = vld [vmem:[#allocation14 + $0x218] sm:$0xff] }
 0x7c9   : > { %5727 = vmatmul.mubr.bf16.vlgmr.msra.gmra.mrb[24].mxu0 %v8492_v10  ;;  %5737 = vmatprep.subr.bf16.mxu1 %v6633_v18  ;;  %v2143_v25 = vld [vmem:[#allocation14 + $0x238] sm:$0xff] }
 0x7ca   : > { %5777 = vmatpush1.bf16.msra.mxu0 %v6752_v19  ;;  %5808 = vmatprep.mubr.bf16.mxu0 %v8461_v41  ;;  %v2235_v41 = vld [vmem:[#allocation14 + $0x518] sm:$0xff]  ;;  %v6672_v19 = vcombine.low %v2123_v55, %v2127_v59  ;;  %v6833_v59 = vcombine.high %v2283_v52, %v2287_v56 }
 0x7cb   : > { %5778 = vmatprep.subr.bf16.mxu0 %v6761_v36  ;;  %v6785_v50 = vcombine.high %v2235_v41, %v2239_v43  ;;  %v6784_v58 = vcombine.low %v2235_v41, %v2239_v43  ;;  %v6688_v41 = vcombine.low %v2139_v24, %v2143_v25  ;;  %v2275_v43 = vld [vmem:[#allocation14 + $0x658] sm:$0xff] }
 0x7cc   : > { %5738 = vmatpush1.bf16.msra.mxu1 %v6632_v21  ;;  %v2167_v55 = vld [vmem:[#allocation14 + $0x2f8] sm:$0xff] }
 0x7cd   : > { %5739 = vmatprep.subr.bf16.mxu1 %v6641_v1  ;;  %v2303_v9 = vld [vmem:[#allocation14 + $0x738] sm:$0xff] }
 0x7ce   : > { %5779 = vmatpush1.bf16.msra.mxu0 %v6760_v23  ;;  %v6800_v23 = vcombine.low %v2251_v3, %v2255_v61  ;;  %v6832_v3 = vcombine.low %v2283_v52, %v2287_v56  ;;  %v2171_v61 = vld [vmem:[#allocation14 + $0x318] sm:$0xff] }
 0x7cf   : > { %5780 = vmatprep.subr.bf16.mxu0 %v6769_v27  ;;  %v2343_v52 = vld [vmem:[#allocation14 + $0x878] sm:$0xff] }
 0x7d0   : > { %5740 = vmatpush1.bf16.msra.mxu1 %v6640_v28  ;;  %v6809_v28 = vcombine.high %v2259_v26, %v2263_v20  ;;  %v2311_v26 = vld [vmem:[#allocation14 + $0x778] sm:$0xff] }
 0x7d1   : > { %5741 = vmatprep.subr.bf16.mxu1 %v6649_v34  ;;  %v2271_v34 = vld [vmem:[#allocation14 + $0x638] sm:$0xff] }
 0x7d2   : > { %5781 = vmatpush1.bf16.msra.mxu0 %v6768_v29  ;;  %v6689_v29 = vcombine.high %v2139_v24, %v2143_v25  ;;  %v6816_v47 = vcombine.low %v2267_v17, %v2271_v34  ;;  %v2315_v24 = vld [vmem:[#allocation14 + $0x798] sm:$0xff] }
 0x7d3   : > { %5782 = vmatprep.subr.bf16.mxu0 %v6777_v35  ;;  %v2151_v35 = vld [vmem:[#allocation14 + $0x278] sm:$0xff] }
 0x7d4   : > { %5742 = vmatpush1.bf16.msra.mxu1 %v6648_v38  ;;  %v6817_v38 = vcombine.high %v2267_v17, %v2271_v34  ;;  %v2319_v25 = vld [vmem:[#allocation14 + $0x7b8] sm:$0xff] }
 0x7d5   : > { %5743 = vmatprep.subr.bf16.mxu1 %v6657_v44  ;;  %v2279_v44 = vld [vmem:[#allocation14 + $0x678] sm:$0xff]  ;;  %v6865_v34 = vcombine.high %v2315_v24, %v2319_v25 }
 0x7d6   : > { %5783 = vmatpush1.bf16.msra.mxu0 %v6776_v53  ;;  %v6697_v53 = vcombine.high %v2147_v33, %v2151_v35  ;;  %v6825_v60 = vcombine.high %v2275_v43, %v2279_v44  ;;  %v2199_v17 = vld [vmem:[#allocation14 + $0x3f8] sm:$0xff] }
 0x7d7   : > { %5784 = vmatprep.subr.bf16.mxu0 %v6785_v50  ;;  %v2159_v50 = vld [vmem:[#allocation14 + $0x2b8] sm:$0xff] }
 0x7d8   : > { %5744 = vmatpush1.bf16.msra.mxu1 %v6656_v51  ;;  %v6696_v51 = vcombine.low %v2147_v33, %v2151_v35  ;;  %v6705_v57 = vcombine.high %v2155_v48, %v2159_v50  ;;  %v2327_v33 = vld [vmem:[#allocation14 + $0x7f8] sm:$0xff] }
 0x7d9   : > { %5745 = vmatprep.subr.bf16.mxu1 %v6665_v39  ;;  %v6824_v39 = vcombine.low %v2275_v43, %v2279_v44  ;;  %v2335_v43 = vld [vmem:[#allocation14 + $0x838] sm:$0xff] }
 0x7da   : > { %v5441_v4 = vpop.f32.mrb[8].mxu1  ;;  %5785 = vmatpush1.bf16.msra.mxu0 %v6784_v58  ;;  %v2163_v58 = vld [vmem:[#allocation14 + $0x2d8] sm:$0xff] }
 0x7db   : > { %v5442_v11 = vadd.f32 %v5441_v4, %v2596_v63  ;;  %v5443_v30 = vpop.f32.mrb[9].mxu1  ;;  %5786 = vmatprep.subr.bf16.mxu0 %v6793_v40  ;;  %v6704_v63 = vcombine.low %v2155_v48, %v2159_v50  ;;  %v2291_v40 = vld [vmem:[#allocation14 + $0x6d8] sm:$0xff] }
 0x7dc   : > { %v5444_v13 = vadd.f32 %v5443_v30, %v2600_v54  ;;  %v5445_v14 = vpop.f32.mrb[10].mxu1  ;;  %v5482_v18 = vpop.f32.mrb[12].mxu0  ;;  %5746 = vmatpush1.bf16.msra.mxu1 %v6664_v0  ;;  %v2295_v54 = vld [vmem:[#allocation14 + $0x6f8] sm:$0xff]  ;;  %v6713_v0 = vcombine.high %v2163_v58, %v2167_v55 }
 0x7dd   : > { %v8533_v6 = vadd.f32 %v5482_v18, %v5442_v11  ;;  %v5446_v36 = vpop.f32.mrb[11].mxu1  ;;  %v5484_v21 = vpop.f32.mrb[13].mxu0  ;;  %5747 = vmatprep.subr.bf16.mxu1 %v6673_v62  ;;  %v2175_v62 = vld [vmem:[#allocation14 + $0x338] sm:$0xff]  ;;  %v6841_v4 = vcombine.high %v2291_v40, %v2295_v54  ;;  %v6840_v30 = vcombine.low %v2291_v40, %v2295_v54  ;;  %v6849_v14 = vcombine.high %v2299_v8, %v2303_v9 }
 0x7de   : > { %v8535_v22 = vadd.f32 %v5484_v21, %v5444_v13  ;;  %v5486_v1 = vpop.f32.mrb[14].mxu0  ;;  %5787 = vmatpush1.bf16.msra.mxu0 %v6792_v7  ;;  %v6712_v7 = vcombine.low %v2163_v58, %v2167_v55  ;;  %v6721_v11 = vcombine.high %v2171_v61, %v2175_v62  ;;  %v2183_v13 = vld [vmem:[#allocation14 + $0x378] sm:$0xff]  ;;  %v6720_v18 = vcombine.low %v2171_v61, %v2175_v62 }
 0x7df   : > { %v5487_v27 = vpop.f32.mrb[15].mxu0  ;;  %5788 = vmatprep.subr.bf16.mxu0 %v6801_v12  ;;  %v2179_v12 = vld [vmem:[#allocation14 + $0x358] sm:$0xff]  ;;  %v6848_v36 = vcombine.low %v2299_v8, %v2303_v9 }
 0x7e0   : > { %5748 = vmatpush1.bf16.msra.mxu1 %v6672_v19  ;;  %v2307_v19 = vld [vmem:[#allocation14 + $0x758] sm:$0xff]  ;;  %v6729_v20 = vcombine.high %v2179_v12, %v2183_v13 }
 0x7e1   : > { %5749 = vmatprep.subr.bf16.mxu1 %v6681_v15  ;;  %v2187_v21 = vld [vmem:[#allocation14 + $0x398] sm:$0xff]  ;;  %v6857_v1 = vcombine.high %v2307_v19, %v2311_v26 }
 0x7e2   : > { %5789 = vmatpush1.bf16.msra.mxu0 %v6800_v23  ;;  %v2191_v15 = vld [vmem:[#allocation14 + $0x3b8] sm:$0xff]  ;;  %v6728_v23 = vcombine.low %v2179_v12, %v2183_v13 }
 0x7e3   : > { %5790 = vmatprep.subr.bf16.mxu0 %v6809_v28  ;;  %v6737_v27 = vcombine.high %v2187_v21, %v2191_v15  ;;  %v6856_v28 = vcombine.low %v2307_v19, %v2311_v26  ;;  %v2463_v48 = vld [vmem:[#allocation14 + $0xc38] sm:$0xff] }
 0x7e4   : > { %5750 = vmatpush1.bf16.msra.mxu1 %v6680_v16  ;;  %v2195_v16 = vld [vmem:[#allocation14 + $0x3d8] sm:$0xff] }
 0x7e5   : > { %5751 = vmatprep.subr.bf16.mxu1 %v6689_v29  ;;  %v6736_v29 = vcombine.low %v2187_v21, %v2191_v15  ;;  %v6745_v35 = vcombine.high %v2195_v16, %v2199_v17  ;;  %v2471_v58 = vld [vmem:[#allocation14 + $0xc78] sm:$0xff] }
 0x7e6   : > { %5791 = vmatpush1.bf16.msra.mxu0 %v6808_v32  ;;  %v2323_v32 = vld [vmem:[#allocation14 + $0x7d8] sm:$0xff] }
 0x7e7   : > { %5792 = vmatprep.subr.bf16.mxu0 %v6817_v38  ;;  %v6864_v38 = vcombine.low %v2315_v24, %v2319_v25  ;;  %v6873_v44 = vcombine.high %v2323_v32, %v2327_v33  ;;  %v2351_v40 = vld [vmem:[#allocation14 + $0x8b8] sm:$0xff] }
 0x7e8   : > { %5752 = vmatpush1.bf16.msra.mxu1 %v6688_v41  ;;  %v2331_v41 = vld [vmem:[#allocation14 + $0x818] sm:$0xff] }
 0x7e9   : > { %5753 = vmatprep.subr.bf16.mxu1 %v6697_v53  ;;  %v6744_v53 = vcombine.low %v2195_v16, %v2199_v17  ;;  %v6881_v50 = vcombine.high %v2331_v41, %v2335_v43  ;;  %v2479_v61 = vld [vmem:[#allocation14 + $0xcb8] sm:$0xff] }
 0x7ea   : > { %5793 = vmatpush1.bf16.msra.mxu0 %v6816_v47  ;;  %v2459_v47 = vld [vmem:[#allocation14 + $0xc18] sm:$0xff] }
 0x7eb   : > { %5794 = vmatprep.subr.bf16.mxu0 %v6825_v60  ;;  %v6872_v60 = vcombine.low %v2323_v32, %v2327_v33  ;;  %v7009_v56 = vcombine.high %v2459_v47, %v2463_v48  ;;  %v2359_v8 = vld [vmem:[#allocation14 + $0x8f8] sm:$0xff] }
 0x7ec   : > { %5754 = vmatpush1.bf16.msra.mxu1 %v6696_v51  ;;  %v2339_v51 = vld [vmem:[#allocation14 + $0x858] sm:$0xff] }
 0x7ed   : > { %5755 = vmatprep.subr.bf16.mxu1 %v6705_v57  ;;  %v6880_v57 = vcombine.low %v2331_v41, %v2335_v43  ;;  %v6889_v55 = vcombine.high %v2339_v51, %v2343_v52  ;;  %v2363_v13 = vld [vmem:[#allocation14 + $0x918] sm:$0xff] }
 0x7ee   : > { %5795 = vmatpush1.bf16.msra.mxu0 %v6824_v39  ;;  %v2467_v39 = vld [vmem:[#allocation14 + $0xc58] sm:$0xff] }
 0x7ef   : > { %5796 = vmatprep.subr.bf16.mxu0 %v6833_v59  ;;  %v7008_v59 = vcombine.low %v2459_v47, %v2463_v48  ;;  %v7017_v54 = vcombine.high %v2467_v39, %v2471_v58  ;;  %v2495_v19 = vld [vmem:[#allocation14 + $0xd38] sm:$0xff] }
 0x7f0   : > { %5756 = vmatpush1.bf16.msra.mxu1 %v6704_v63  ;;  %v2347_v63 = vld [vmem:[#allocation14 + $0x898] sm:$0xff] }
 0x7f1   : > { %5757 = vmatprep.subr.bf16.mxu1 %v6713_v0  ;;  %v6888_v0 = vcombine.low %v2339_v51, %v2343_v52  ;;  %v6897_v62 = vcombine.high %v2347_v63, %v2351_v40  ;;  %v6896_v9 = vcombine.low %v2347_v63, %v2351_v40  ;;  %v2375_v21 = vld [vmem:[#allocation14 + $0x978] sm:$0xff] }
 0x7f2   : > { %5797 = vmatpush1.bf16.msra.mxu0 %v6832_v3  ;;  %v2475_v3 = vld [vmem:[#allocation14 + $0xc98] sm:$0xff] }
 0x7f3   : > { %5798 = vmatprep.subr.bf16.mxu0 %v6841_v4  ;;  %v7016_v4 = vcombine.low %v2467_v39, %v2471_v58  ;;  %v7024_v12 = vcombine.low %v2475_v3, %v2479_v61  ;;  %v2503_v24 = vld [vmem:[#allocation14 + $0xd78] sm:$0xff] }
 0x7f4   : > { %5758 = vmatpush1.bf16.msra.mxu1 %v6712_v7  ;;  %v2355_v7 = vld [vmem:[#allocation14 + $0x8d8] sm:$0xff] }
 0x7f5   : > { %5759 = vmatprep.subr.bf16.mxu1 %v6721_v11  ;;  %v2483_v11 = vld [vmem:[#allocation14 + $0xcd8] sm:$0xff] }
 0x7f6   : > { %5799 = vmatpush1.bf16.msra.mxu0 %v6840_v30  ;;  %v2487_v30 = vld [vmem:[#allocation14 + $0xcf8] sm:$0xff] }
 0x7f7   : > { %5800 = vmatprep.subr.bf16.mxu0 %v6849_v14  ;;  %v7033_v14 = vcombine.high %v2483_v11, %v2487_v30  ;;  %v2383_v16 = vld [vmem:[#allocation14 + $0x9b8] sm:$0xff] }
 0x7f8   : > { %5760 = vmatpush1.bf16.msra.mxu1 %v6720_v18  ;;  %v6904_v18 = vcombine.low %v2355_v7, %v2359_v8  ;;  %v2511_v32 = vld [vmem:[#allocation14 + $0xdb8] sm:$0xff] }
 0x7f9   : > { %5761 = vmatprep.subr.bf16.mxu1 %v6729_v20  ;;  %v7032_v20 = vcombine.low %v2483_v11, %v2487_v30  ;;  %v2387_v41 = vld [vmem:[#allocation14 + $0x9d8] sm:$0xff] }
 0x7fa   : > { %5801 = vmatpush1.bf16.msra.mxu0 %v6848_v36  ;;  %v2371_v36 = vld [vmem:[#allocation14 + $0x958] sm:$0xff] }
 0x7fb   : > { %5802 = vmatprep.subr.bf16.mxu0 %v6857_v1  ;;  %v6921_v25 = vcombine.high %v2371_v36, %v2375_v21  ;;  %v2391_v43 = vld [vmem:[#allocation14 + $0x9f8] sm:$0xff] }
 0x7fc   : > { %5762 = vmatpush1.bf16.msra.mxu1 %v6728_v23  ;;  %v2499_v23 = vld [vmem:[#allocation14 + $0xd58] sm:$0xff] }
 0x7fd   : > { %5763 = vmatprep.subr.bf16.mxu1 %v6737_v27  ;;  %v7049_v17 = vcombine.high %v2499_v23, %v2503_v24  ;;  %v2515_v52 = vld [vmem:[#allocation14 + $0xdd8] sm:$0xff] }
 0x7fe   : > { %5803 = vmatpush1.bf16.msra.mxu0 %v6856_v28  ;;  %v2379_v28 = vld [vmem:[#allocation14 + $0x998] sm:$0xff] }
 0x7ff   : > { %5804 = vmatprep.subr.bf16.mxu0 %v6865_v34  ;;  %v6920_v34 = vcombine.low %v2371_v36, %v2375_v21  ;;  %v6929_v33 = vcombine.high %v2379_v28, %v2383_v16  ;;  %v6928_v51 = vcombine.low %v2379_v28, %v2383_v16  ;;  %v2395_v40 = vld [vmem:[#allocation14 + $0xa18] sm:$0xff] }
 0x800   : > { %5764 = vmatpush1.bf16.msra.mxu1 %v6736_v29  ;;  %v2507_v29 = vld [vmem:[#allocation14 + $0xd98] sm:$0xff] }
 0x801   : > { %5765 = vmatprep.subr.bf16.mxu1 %v6745_v35  ;;  %v7057_v47 = vcombine.high %v2507_v29, %v2511_v32  ;;  %v7056_v63 = vcombine.low %v2507_v29, %v2511_v32  ;;  %v2531_v30 = vld [vmem:[#allocation14 + $0xe58] sm:$0xff] }
 0x802   : > { %5805 = vmatpush1.bf16.msra.mxu0 %v6864_v38  ;;  %v7048_v38 = vcombine.low %v2499_v23, %v2503_v24  ;;  %v2419_v21 = vld [vmem:[#allocation14 + $0xad8] sm:$0xff] }
 0x803   : > { %5806 = vmatprep.subr.bf16.mxu0 %v6873_v44  ;;  %v2547_v24 = vld [vmem:[#allocation14 + $0xed8] sm:$0xff] }
 0x804   : > { %5766 = vmatpush1.bf16.msra.mxu1 %v6744_v53  ;;  %v2427_v16 = vld [vmem:[#allocation14 + $0xb18] sm:$0xff] }
 0x805   : > { %5817 = vmatprep.subr.bf16.mxu1 %v6881_v50  ;;  %v2555_v32 = vld [vmem:[#allocation14 + $0xf18] sm:$0xff] }
 0x806   : > { %5807 = vmatpush1.bf16.msra.mxu0 %v6872_v60 }
 0x807   : > { %5768 = vmatmul.mubr.bf16.vlgmr.msra.gmra.mrb[24].mxu1 %v8451_v31  ;;  %5858 = vmatprep.subr.bf16.mxu0 %v7009_v56  ;;  %v7025_v31 = vcombine.high %v2475_v3, %v2479_v61  ;;  %v2519_v56 = vld [vmem:[#allocation14 + $0xdf8] sm:$0xff]  ;;  %v6936_v3 = vcombine.low %v2387_v41, %v2391_v43 }
 0x808   : > { %5818 = vmatpush1.bf16.msra.mxu1 %v6880_v57  ;;  %5849 = vmatprep.mubr.bf16.mxu1 %v8464_v42  ;;  %v6905_v42 = vcombine.high %v2355_v7, %v2359_v8  ;;  %v2523_v61 = vld [vmem:[#allocation14 + $0xe18] sm:$0xff]  ;;  %v7064_v7 = vcombine.low %v2515_v52, %v2519_v56 }
 0x809   : > { %5809 = vmatmul.mubr.bf16.vlgmr.msra.gmra.mrb[28].mxu0 %v8469_v46  ;;  %5819 = vmatprep.subr.bf16.mxu1 %v6889_v55  ;;  %v2367_v46 = vld [vmem:[#allocation14 + $0x938] sm:$0xff]  ;;  %v6937_v55 = vcombine.high %v2387_v41, %v2391_v43 }
 0x80a   : > { %5859 = vmatpush1.bf16.msra.mxu0 %v7008_v59  ;;  %5890 = vmatprep.mubr.bf16.mxu0 %v8477_v49  ;;  %v2491_v49 = vld [vmem:[#allocation14 + $0xd18] sm:$0xff]  ;;  %v6913_v26 = vcombine.high %v2363_v13, %v2367_v46  ;;  %v6912_v1 = vcombine.low %v2363_v13, %v2367_v46 }
 0x80b   : > { %5860 = vmatprep.subr.bf16.mxu0 %v7017_v54  ;;  %v7041_v15 = vcombine.high %v2491_v49, %v2495_v19  ;;  %v7040_v27 = vcombine.low %v2491_v49, %v2495_v19  ;;  %v2399_v54 = vld [vmem:[#allocation14 + $0xa38] sm:$0xff] }
 0x80c   : > { %5820 = vmatpush1.bf16.msra.mxu1 %v6888_v0  ;;  %v7065_v0 = vcombine.high %v2515_v52, %v2519_v56  ;;  %v2403_v8 = vld [vmem:[#allocation14 + $0xa58] sm:$0xff]  ;;  %v6944_v11 = vcombine.low %v2395_v40, %v2399_v54 }
 0x80d   : > { %5821 = vmatprep.subr.bf16.mxu1 %v6897_v62  ;;  %v2527_v62 = vld [vmem:[#allocation14 + $0xe38] sm:$0xff] }
 0x80e   : > { %5861 = vmatpush1.bf16.msra.mxu0 %v7016_v4  ;;  %v6945_v4 = vcombine.high %v2395_v40, %v2399_v54  ;;  %v7072_v13 = vcombine.low %v2523_v61, %v2527_v62  ;;  %v2411_v46 = vld [vmem:[#allocation14 + $0xa98] sm:$0xff] }
 0x80f   : > { %5862 = vmatprep.subr.bf16.mxu0 %v7025_v31  ;;  %v2407_v31 = vld [vmem:[#allocation14 + $0xa78] sm:$0xff] }
 0x810   : > { %5822 = vmatpush1.bf16.msra.mxu1 %v6896_v9  ;;  %v7073_v9 = vcombine.high %v2523_v61, %v2527_v62  ;;  %v6952_v49 = vcombine.low %v2403_v8, %v2407_v31  ;;  %v2539_v19 = vld [vmem:[#allocation14 + $0xe98] sm:$0xff] }
 0x811   : > { %5823 = vmatprep.subr.bf16.mxu1 %v6905_v42  ;;  %v2535_v42 = vld [vmem:[#allocation14 + $0xe78] sm:$0xff] }
 0x812   : > { %5863 = vmatpush1.bf16.msra.mxu0 %v7024_v12  ;;  %v6953_v12 = vcombine.high %v2403_v8, %v2407_v31  ;;  %v7080_v36 = vcombine.low %v2531_v30, %v2535_v42  ;;  %v2435_v41 = vld [vmem:[#allocation14 + $0xb58] sm:$0xff] }
 0x813   : > { %5864 = vmatprep.subr.bf16.mxu0 %v7033_v14  ;;  %v2415_v14 = vld [vmem:[#allocation14 + $0xab8] sm:$0xff] }
 0x814   : > { %5824 = vmatpush1.bf16.msra.mxu1 %v6904_v18  ;;  %v7081_v18 = vcombine.high %v2531_v30, %v2535_v42  ;;  %v6960_v23 = vcombine.low %v2411_v46, %v2415_v14  ;;  %v2439_v43 = vld [vmem:[#allocation14 + $0xb78] sm:$0xff]  ;;  %v8551_v30 = vld [vmem:[#allocation17 + $0x4] sm:$0xff] }
 0x815   : > { %5825 = vmatprep.subr.bf16.mxu1 %v6913_v26  ;;  %v2543_v26 = vld [vmem:[#allocation14 + $0xeb8] sm:$0xff] }
 0x816   : > { %5865 = vmatpush1.bf16.msra.mxu0 %v7032_v20  ;;  %v6961_v20 = vcombine.high %v2411_v46, %v2415_v14  ;;  %v7088_v28 = vcombine.low %v2539_v19, %v2543_v26  ;;  %v2447_v52 = vld [vmem:[#allocation14 + $0xbb8] sm:$0xff] }
 0x817   : > { %5866 = vmatprep.subr.bf16.mxu0 %v7041_v15  ;;  %v2423_v15 = vld [vmem:[#allocation14 + $0xaf8] sm:$0xff] }
 0x818   : > { %5826 = vmatpush1.bf16.msra.mxu1 %v6912_v1  ;;  %v7089_v1 = vcombine.high %v2539_v19, %v2543_v26  ;;  %v6968_v29 = vcombine.low %v2419_v21, %v2423_v15  ;;  %v2451_v40 = vld [vmem:[#allocation14 + $0xbd8] sm:$0xff] }
 0x819   : > { %5827 = vmatprep.subr.bf16.mxu1 %v6921_v25  ;;  %v2551_v25 = vld [vmem:[#allocation14 + $0xef8] sm:$0xff] }
 0x81a   : > { %v5523_v35 = vpop.f32.mrb[12].mxu1  ;;  %5867 = vmatpush1.bf16.msra.mxu0 %v7040_v27  ;;  %v6969_v27 = vcombine.high %v2419_v21, %v2423_v15  ;;  %v2455_v54 = vld [vmem:[#allocation14 + $0xbf8] sm:$0xff]  ;;  %v7989_v15 = vmov 1983009808  }
 0x81b   : > { %v5524_v44 = vadd.f32 %v5523_v35, %v8533_v6  ;;  %v5525_v53 = vpop.f32.mrb[13].mxu1  ;;  %5868 = vmatprep.subr.bf16.mxu0 %v7049_v17  ;;  %v2431_v17 = vld [vmem:[#allocation14 + $0xb38] sm:$0xff]  ;;  %v7001_v62 = vcombine.high %v2451_v40, %v2455_v54  ;;  %v7000_v8 = vcombine.low %v2451_v40, %v2455_v54 }
 0x81c   : > { %v5526_v48 = vadd.f32 %v5525_v53, %v8535_v22  ;;  %v5527_v50 = vpop.f32.mrb[14].mxu1  ;;  %v5564_v60 = vpop.f32.mrb[16].mxu0  ;;  %5828 = vmatpush1.bf16.msra.mxu1 %v6920_v34  ;;  %v7097_v34 = vcombine.high %v2547_v24, %v2551_v25  ;;  %v6977_v35 = vcombine.high %v2427_v16, %v2431_v17  ;;  %v6976_v53 = vcombine.low %v2427_v16, %v2431_v17  ;;  %v2583_v61 = vld [vmem:[#allocation14 + $0xff8] sm:$0xff] }
 0x81d   : > { %v8543_v57 = vadd.f32 %v5564_v60, %v5524_v44  ;;  %v5528_v39 = vpop.f32.mrb[15].mxu1  ;;  %v5566_v58 = vpop.f32.mrb[17].mxu0  ;;  %5829 = vmatprep.subr.bf16.mxu1 %v6929_v33  ;;  %v2559_v33 = vld [vmem:[#allocation14 + $0xf38] sm:$0xff]  ;;  %v6985_v50 = vcombine.high %v2435_v41, %v2439_v43 }
 0x81e   : > { %v8545_v59 = vadd.f32 %v5566_v58, %v5526_v48  ;;  %v5568_v6 = vpop.f32.mrb[18].mxu0  ;;  %5869 = vmatpush1.bf16.msra.mxu0 %v7048_v38  ;;  %v7096_v38 = vcombine.low %v2547_v24, %v2551_v25  ;;  %v7105_v44 = vcombine.high %v2555_v32, %v2559_v33  ;;  %v2567_v48 = vld [vmem:[#allocation14 + $0xf78] sm:$0xff]  ;;  %v7104_v60 = vcombine.low %v2555_v32, %v2559_v33  ;;  %v5899_v25 = vld [vmem:[%s8298_s17] sm:$0xff] }
 0x81f   : > { %v5569_v22 = vpop.f32.mrb[19].mxu0  ;;  %5870 = vmatprep.subr.bf16.mxu0 %v7057_v47  ;;  %v2563_v47 = vld [vmem:[#allocation14 + $0xf58] sm:$0xff]  ;;  %v6984_v39 = vcombine.low %v2435_v41, %v2439_v43 }
 0x820   : > { %5830 = vmatpush1.bf16.msra.mxu1 %v6928_v51  ;;  %v2443_v51 = vld [vmem:[#allocation14 + $0xb98] sm:$0xff]  ;;  %v7113_v56 = vcombine.high %v2563_v47, %v2567_v48 }
 0x821   : > { %5831 = vmatprep.subr.bf16.mxu1 %v6937_v55  ;;  %v2571_v58 = vld [vmem:[#allocation14 + $0xf98] sm:$0xff]  ;;  %v6993_v6 = vcombine.high %v2443_v51, %v2447_v52 }
 0x822   : > { %5871 = vmatpush1.bf16.msra.mxu0 %v7056_v63  ;;  %v2575_v55 = vld [vmem:[#allocation14 + $0xfb8] sm:$0xff]  ;;  %v7112_v63 = vcombine.low %v2563_v47, %v2567_v48 }
 0x823   : > { %5872 = vmatprep.subr.bf16.mxu0 %v7065_v0  ;;  %v7121_v22 = vcombine.high %v2571_v58, %v2575_v55  ;;  %v6992_v0 = vcombine.low %v2443_v51, %v2447_v52 }
 0x824   : > { %5832 = vmatpush1.bf16.msra.mxu1 %v6936_v3  ;;  %v2579_v3 = vld [vmem:[#allocation14 + $0xfd8] sm:$0xff] }
 0x825   : > { %5833 = vmatprep.subr.bf16.mxu1 %v6945_v4  ;;  %v7120_v4 = vcombine.low %v2571_v58, %v2575_v55  ;;  %v7128_v31 = vcombine.low %v2579_v3, %v2583_v61 }
 0x826   : > { %5873 = vmatpush1.bf16.msra.mxu0 %v7064_v7  ;;  %v7129_v7 = vcombine.high %v2579_v3, %v2583_v61 }
 0x827   : > { %5874 = vmatprep.subr.bf16.mxu0 %v7073_v9  ;;  %v2603_v9 = vsub.s32 4, %v8325_v5 }
 0x828   : > { %5834 = vmatpush1.bf16.msra.mxu1 %v6944_v11  ;;  %v2607_v11 = vsub.s32 5, %v8325_v5 }
 0x829   : > { %5835 = vmatprep.subr.bf16.mxu1 %v6953_v12  ;;  %v2604_v42 = vrot.slane %v8551_v30, %v2603_v9  ;;  %v7136_v9 = vld.sshfl [vmem:[#allocation5] sm:$0x33 pattern:$0x76325410] }
 0x82a   : > { %5875 = vmatpush1.bf16.msra.mxu0 %v7072_v13  ;;  %v2608_v12 = vrot.slane %v8551_v30, %v2607_v11  ;;  %v7547_v11 = vld [vmem:[#allocation15 + $0x8] sm:$0xff]  }
 0x82b   : > { %5876 = vmatprep.subr.bf16.mxu0 %v7081_v18 }
 0x82c   : > { %5836 = vmatpush1.bf16.msra.mxu1 %v6952_v49 }
 0x82d   : > { %5837 = vmatprep.subr.bf16.mxu1 %v6961_v20 }
 0x82e   : > { %5877 = vmatpush1.bf16.msra.mxu0 %v7080_v36 }
 0x82f   : > { %5878 = vmatprep.subr.bf16.mxu0 %v7089_v1  ;;  %v5905_v1 = vunpack.c.l.s4 %v7989_v15 }
 0x830   : > { %5838 = vmatpush1.bf16.msra.mxu1 %v6960_v23 }
 0x831   : > { %5839 = vmatprep.subr.bf16.mxu1 %v6969_v27  ;;  %v5906_v23 = vunpack.c.0.s8 %v5905_v1  ;;  %v5903_v27 = vcombine.high %v5899_v25, %v5899_v25  ;;  %v7551_v1 = vld [vmem:[#allocation15 + $0x18] sm:$0xff]  }
 0x832   : > { %5879 = vmatpush1.bf16.msra.mxu0 %v7088_v28 }
 0x833   : > { %5880 = vmatprep.subr.bf16.mxu0 %v7097_v34  ;;  %v8556_v24 = vsub.s32 %v5906_v23, %v8325_v5 }
 0x834   : > { %5840 = vmatpush1.bf16.msra.mxu1 %v6968_v29 }
 0x835   : > { %5841 = vmatprep.subr.bf16.mxu1 %v6977_v35  ;;  %v5910_v28 = vrot.slane %v5899_v25, %v8556_v24  ;;  %v5917_v16 = vrot.slane %v5903_v27, %v8556_v24  ;;  %v7552_v25 = vld [vmem:[#allocation15 + $0x60] sm:$0xff]  }
 0x836   : > { %5881 = vmatpush1.bf16.msra.mxu0 %v7096_v38  ;;  %v7553_v27 = vld [vmem:[#allocation15 + $0x20] sm:$0xff]  }
 0x837   : > { %5882 = vmatprep.subr.bf16.mxu0 %v7105_v44  ;;  %v5918_v17 = vcombine.high %v5910_v28, %v5910_v28  ;;  %v5919_v34 = vcombine.high %v5917_v16, %v5917_v16  ;;  %v5945_v29 = vadd.f32 %v5910_v28, %v8521_v37  ;;  %v5947_v33 = vadd.f32 %v5917_v16, %v8543_v57  ;;  %v7554_v28 = vld [vmem:[#allocation15 + $0x68] sm:$0xff]  }
 0x838   : > { %5842 = vmatpush1.bf16.msra.mxu1 %v6976_v53  ;;  %v8566_v53 = vld [vmem:[%s8298_s17 + $0x8] sm:$0xff]  ;;  %s7990_s17 = smov [#allocation19]  }
 0x839   : > { %5843 = vmatprep.subr.bf16.mxu1 %v6985_v50  ;;  %v5946_v32 = vadd.f32 %v5918_v17, %v8523_v45  ;;  %v5948_v35 = vadd.f32 %v5919_v34, %v8545_v59  ;;  %v7130_v38 = vmul.f32 -1.442695, %v5945_v29  ;;  %v7132_v43 = vmul.f32 -1.442695, %v5947_v33  ;;  %v7555_v17 = vld [vmem:[#allocation15 + $0x28] sm:$0xff]   ;;  %v7556_v34 = vld [vmem:[#allocation15 + $0x70] sm:$0xff]  }
 0x83a   : > { %5883 = vmatpush1.bf16.msra.mxu0 %v7104_v60  ;;  %v5927_v37 = vrot.slane %v8566_v53, %v8556_v24  ;;  %v7557_v29 = vld [vmem:[#allocation15 + $0x30] sm:$0xff]   ;;  %v7559_v33 = vld [vmem:[#allocation15 + $0x38] sm:$0xff]   ;;  %s6245_s29 = sshll.u32 %s7990_s17, 4  ;;  %s6246_s29 = int_to_ptr.vmem [resolvable:$true] %s6245_s29 }
 0x83b   : > { %5884 = vmatprep.subr.bf16.mxu0 %v7113_v56  ;;  %v7131_v41 = vmul.f32 -1.442695, %v5946_v32  ;;  %v7133_v44 = vmul.f32 -1.442695, %v5948_v35  ;;  %7576 = vpow2.f32 %v7130_v38  ;;  %v7558_v32 = vld [vmem:[#allocation15 + $0x78] sm:$0xff]   ;;  %v2611_v35 = vsub.s32 6, %v8325_v5  ;;  %p7812_p0 = scmp.lt.s32.totalorder %s6246_s29, %s6246_s29 }
 0x83c   : > { %5844 = vmatpush1.bf16.msra.mxu1 %v6984_v39  ;;  %v2615_v38 = vsub.s32 7, %v8325_v5  ;;  %s7805_s15 = scalar_lea.vmem %s6246_s29, 64 }
 0x83d   : > { %5845 = vmatprep.subr.bf16.mxu1 %v6993_v6  ;;  %7578 = vpow2.f32 %v7131_v41  ;;  %v2612_v41 = vrot.slane %v8551_v30, %v2611_v35  ;;  %p7806_p7 = scmp.ne.s32.totalorder %s6246_s29, %s7805_s15  ;;  %p7813_p1 = scmp.lt.s32.totalorder %s7805_s15, %s7805_s15 }
 0x83e   : > { %5885 = vmatpush1.bf16.msra.mxu0 %v7112_v63  ;;  %7580 = vpow2.f32 %v7132_v43  ;;  %v5935_v63 = vcombine.high %v5927_v37, %v5927_v37  ;;  %v2616_v43 = vrot.slane %v8551_v30, %v2615_v38 }
 0x83f   : > { %5886 = vmatprep.subr.bf16.mxu0 %v7121_v22  ;;  %7582 = vpow2.f32 %v7133_v44  ;;  %p7807_p12 = pnand %p7806_p7, %p8755_p8  ;;  %p7814_p6 = por %p7813_p1, %p7812_p0 }
 0x840   : > { %5846 = vmatpush1.bf16.msra.mxu1 %v6992_v0 }
 0x841   : > { %5847 = vmatprep.subr.bf16.mxu1 %v7001_v62  ;;  %p7808_p2 = pneg %p7807_p12 }
 0x842   : > { %5887 = vmatpush1.bf16.msra.mxu0 %v7120_v4 }
 0x843   : > { %5888 = vmatprep.subr.bf16.mxu0 %v7129_v7  ;;  %v7544_v7 = vld [vmem:[#allocation15 + $0x40] sm:$0xff]   ;;  %p7815_p5 = pnand %p7814_p6, %p7808_p2 }
 0x844   : > { %5848 = vmatpush1.bf16.msra.mxu1 %v7000_v8  ;;  %v7545_v8 = vld [vmem:[#allocation15] sm:$0xff]  }
 0x845   : > { %v7577_v47 = vpop.eup %7576  ;;  %7169 = vmatprep.subr.bf16.mxu1 %v7544_v7 }
 0x846   : > { %5889 = vmatpush1.bf16.msra.mxu0 %v7128_v31  ;;  %v5959_v57 = vadd.f32 1.0, %v7577_v47  ;;  %v7546_v31 = vld [vmem:[#allocation15 + $0x48] sm:$0xff]  }
 0x847   : > { %5850 = vmatmul.mubr.bf16.vlgmr.msra.gmra.mrb[28].mxu1 %v8487_v2  ;;  %v7579_v48 = vpop.eup %7578 }
 0x848   : > { %v7581_v50 = vpop.eup %7580  ;;  %v5960_v60 = vadd.f32 1.0, %v7579_v48  ;;  %7584 = vrcp.f32 %v5959_v57  ;;  %7170 = vmatpush3.bf16.msra.mxu1 %v7545_v8 }
 0x849   : > { %5891 = vmatmul.mubr.bf16.vlgmr.msra.gmra.mrb[32].mxu0 %v8492_v10  ;;  %v7583_v45 = vpop.eup %7582  ;;  %v5971_v51 = vadd.f32 1.0, %v7581_v50  ;;  %7171 = vmatprep.subr.bf16.mxu1 %v7546_v31 }
 0x84a   : > { %v5972_v39 = vadd.f32 1.0, %v7583_v45  ;;  %7586 = vrcp.f32 %v5960_v60 }
 0x84b   : > { %7588 = vrcp.f32 %v5971_v51 }
 0x84c   : > { %7590 = vrcp.f32 %v5972_v39  ;;  %7172 = vmatpush3.bf16.msra.mxu1 %v7547_v11  ;;  %v5920_v39 = vcombine.high %v8566_v53, %v8566_v53 }
 0x84e   : > { %v5934_v5 = vrot.slane %v5920_v39, %v8556_v24 }
 0x85a   : > { %v5605_v13 = vpop.f32.mrb[16].mxu1 }
 0x85b   : > { %v5606_v46 = vadd.f32 %v5605_v13, %v2604_v42  ;;  %v5607_v14 = vpop.f32.mrb[17].mxu1  ;;  %v7585_v42 = vpop.eup %7584 }
 0x85c   : > { %v5608_v18 = vadd.f32 %v5607_v14, %v2608_v12  ;;  %v5609_v49 = vpop.f32.mrb[18].mxu1  ;;  %v5646_v19 = vpop.f32.mrb[20].mxu0  ;;  %v7548_v14 = vld [vmem:[#allocation15 + $0x50] sm:$0xff]  }
 0x85d   : > { %v5647_v2 = vadd.f32 %v5646_v19, %v5606_v46  ;;  %v5610_v26 = vpop.f32.mrb[19].mxu1  ;;  %v5648_v10 = vpop.f32.mrb[21].mxu0  ;;  %v5999_v46 = vcombine.high %v7136_v9, %v7136_v9  ;;  %v7549_v49 = vld [vmem:[#allocation15 + $0x10] sm:$0xff]   ;;  %7173 = vmatprep.subr.bf16.mxu1 %v7548_v14 }
 0x85e   : > { %v5649_v20 = vadd.f32 %v5648_v10, %v5608_v18  ;;  %v5650_v36 = vpop.f32.mrb[22].mxu0  ;;  %v7587_v12 = vpop.eup %7586  ;;  %7174 = vmatpush3.bf16.msra.mxu1 %v7549_v49 }
 0x85f   : > { %v5651_v21 = vpop.f32.mrb[23].mxu0  ;;  %v7589_v13 = vpop.eup %7588 }
 0x860   : > { %v7591_v18 = vpop.eup %7590  ;;  %v6002_v26 = vmul.f32 %v7589_v13, %v7136_v9  ;;  %v7550_v21 = vld [vmem:[#allocation15 + $0x58] sm:$0xff]  }
 0x861   : > { %7175 = vmatprep.subr.bf16.mxu1 %v7550_v21 }
 0x862   : > { %7176 = vmatpush3.bf16.msra.mxu1 %v7551_v1 }
 0x863   : > { %7177 = vmatprep.subr.bf16.mxu1 %v7552_v25 }
 0x866   : > { %7178 = vmatpush3.bf16.msra.mxu1 %v7553_v27 }
 0x867   : > { %7179 = vmatprep.subr.bf16.mxu1 %v7554_v28 }
 0x86a   : > { %7180 = vmatpush3.bf16.msra.mxu1 %v7555_v17 }
 0x86b   : > { %7181 = vmatprep.subr.bf16.mxu1 %v7556_v34 }
 0x86e   : > { %7182 = vmatpush3.bf16.msra.mxu1 %v7557_v29 }
 0x86f   : > { %7183 = vmatprep.subr.bf16.mxu1 %v7558_v32 }
 0x872   : > { %7184 = vmatpush3.bf16.msra.mxu1 %v7559_v33 }
 0x89a   : > { %v5687_v59 = vpop.f32.mrb[20].mxu1 }
 0x89b   : > { %v5688_v52 = vadd.f32 %v5687_v59, %v5647_v2  ;;  %v5689_v56 = vpop.f32.mrb[21].mxu1 }
 0x89c   : > { %v5690_v58 = vadd.f32 %v5689_v56, %v5649_v20  ;;  %v5691_v55 = vpop.f32.mrb[22].mxu1  ;;  %v5728_v6 = vpop.f32.mrb[24].mxu0  ;;  %v6003_v20 = vmul.f32 %v7591_v18, %v5999_v46 }
 0x89d   : > { %v5729_v40 = vadd.f32 %v5728_v6, %v5688_v52  ;;  %v5692_v54 = vpop.f32.mrb[23].mxu1  ;;  %v5730_v22 = vpop.f32.mrb[25].mxu0 }
 0x89e   : > { %v5731_v0 = vadd.f32 %v5730_v22, %v5690_v58  ;;  %v5732_v3 = vpop.f32.mrb[26].mxu0  ;;  %v5936_v54 = vcombine.high %v5934_v5, %v5934_v5 }
 0x89f   : > { %v5949_v61 = vadd.f32 %v5927_v37, %v5729_v40  ;;  %v5733_v62 = vpop.f32.mrb[27].mxu0 }
 0x8a0   : > { %v5950_v4 = vadd.f32 %v5935_v63, %v5731_v0 }
 0x8a1   : > { %7592 = vtanh.f32 %v5949_v61 }
 0x8a2   : > { %7594 = vtanh.f32 %v5950_v4 }
 0x8ab   : > { %v7593_v19 = vpop.eup %7592 }
 0x8ac   : > { %v7595_v2 = vpop.eup %7594  ;;  %v6004_v10 = vmul.f32 %v7593_v19, %v7585_v42 }
 0x8ad   : > { %v6005_v36 = vmul.f32 %v7595_v2, %v7587_v12 }
 0x8ae   : > { %v6006_v15 = vadd.f32 %v6004_v10, %v6002_v26 }
 0x8af   : > { %v8570_v23 = vadd.f32 %v6005_v36, %v6003_v20 }
 0x8b1   : > { %v6026_v16 = vcombine.low %v6006_v15, %v8570_v23 }
 0x8b3   : > { %7138 = vst.sshfl [vmem:[#allocation5] sm:$0x33 pattern:$0x76325410] %v6026_v16 }
 0x8b4   : > { %7140 = vst.sshfl [vmem:[#allocation21] sm:$0x33 pattern:$0x76325410] %v6026_v16 }
 0x8da   : > { %v5769_v44 = vpop.f32.mrb[24].mxu1 }
 0x8db   : > { %v5770_v47 = vadd.f32 %v5769_v44, %v2612_v41  ;;  %v5771_v48 = vpop.f32.mrb[25].mxu1 }
 0x8dc   : > { %v5772_v50 = vadd.f32 %v5771_v48, %v2616_v43  ;;  %v5773_v37 = vpop.f32.mrb[26].mxu1  ;;  %v5810_v45 = vpop.f32.mrb[28].mxu0 }
 0x8dd   : > { %v5811_v57 = vadd.f32 %v5810_v45, %v5770_v47  ;;  %v5774_v60 = vpop.f32.mrb[27].mxu1  ;;  %v5812_v59 = vpop.f32.mrb[29].mxu0 }
 0x8de   : > { %v5813_v51 = vadd.f32 %v5812_v59, %v5772_v50  ;;  %v5814_v52 = vpop.f32.mrb[30].mxu0 }
 0x8df   : > { %v5815_v56 = vpop.f32.mrb[31].mxu0 }
 0x91a   : > { %v5851_v58 = vpop.f32.mrb[28].mxu1 }
 0x91b   : > { %v5852_v55 = vadd.f32 %v5851_v58, %v5811_v57  ;;  %v5853_v30 = vpop.f32.mrb[29].mxu1 }
 0x91c   : > { %v5854_v6 = vadd.f32 %v5853_v30, %v5813_v51  ;;  %v5855_v63 = vpop.f32.mrb[30].mxu1  ;;  %v5892_v40 = vpop.f32.mrb[32].mxu0 }
 0x91d   : > { %v5893_v22 = vadd.f32 %v5892_v40, %v5852_v55  ;;  %v5856_v0 = vpop.f32.mrb[31].mxu1  ;;  %v5894_v3 = vpop.f32.mrb[33].mxu0 }
 0x91e   : > { %v5895_v61 = vadd.f32 %v5894_v3, %v5854_v6  ;;  %v5896_v62 = vpop.f32.mrb[34].mxu0 }
 0x91f   : > { %v5951_v4 = vadd.f32 %v5934_v5, %v5893_v22  ;;  %v5897_v7 = vpop.f32.mrb[35].mxu0 }
 0x920   : > { %v5952_v8 = vadd.f32 %v5936_v54, %v5895_v61 }
 0x921   : > { %v7134_v31 = vmul.f32 -1.442695, %v5951_v4 }
 0x922   : > { %v7135_v9 = vmul.f32 -1.442695, %v5952_v8 }
 0x923   : > { %7596 = vpow2.f32 %v7134_v31 }
 0x924   : > { %7598 = vpow2.f32 %v7135_v9 }
 0x925   : > { %7600 = vtanh.f32 %v6006_v15 }
 0x926   : > { %7602 = vtanh.f32 %v8570_v23 }
 0x92d   : > { %v7597_v24 = vpop.eup %7596 }
 0x92e   : > { %v7599_v53 = vpop.eup %7598  ;;  %v5985_v11 = vadd.f32 1.0, %v7597_v24 }
 0x92f   : > { %v5986_v42 = vadd.f32 1.0, %v7599_v53  ;;  %v7601_v12 = vpop.eup %7600 }
 0x930   : > { %7604 = vrcp.f32 %v5985_v11  ;;  %v7603_v13 = vpop.eup %7602 }
 0x931   : > { %7606 = vrcp.f32 %v5986_v42 }
 0x93a   : > { %v7605_v46 = vpop.eup %7604 }
 0x93b   : > { %v7607_v14 = vpop.eup %7606  ;;  %v6010_v18 = vmul.f32 %v7605_v46, %v7601_v12 }
 0x93c   : > { %v6011_v49 = vmul.f32 %v7607_v14, %v7603_v13 }
 0x93d   : > { %v6038_v26 = vpack.c.bf16 %v6010_v18, %v6010_v18 }
 0x93e   : > { %v6039_v19 = vpack.c.bf16 %v6011_v49, %v6011_v49  ;;  %v6014_v2 = vcombine.low %v6010_v18, %v6011_v49 }
 0x940   : > { %6206 = vmatprep.mubr.bf16.mxu1 %v6039_v19  ;;  %7137 = vst.sshfl [vmem:[#allocation4] sm:$0x33 pattern:$0x76325410] %v6014_v2 }
 0x941   : > { %7139 = vst.sshfl [vmem:[#allocation19] sm:$0x33 pattern:$0x76325410] %v6014_v2  ;;  %6207 = vmatmul.mubr.bf16.vlgmr.msra.gmra.mrb[32].mxu1 %v6038_v26 }
 0x942   : > { %7818 = shalt.err (!%p7815_p5)
}
 0x943   : > { %s7819_s19 = scalar_lea.hbm %s8708_s10, 64  ;;  %p8756_p13 = pmov %p8755_p8 }
 0x944   : > { %p7820_p9 = scmp.ne.s32.totalorder %s8708_s10, %s7819_s19  ;;  %p7825_p3 = scmp.lt.u32.totalorder %s7819_s19, %s8708_s10 }
 0x946   : > { %p7821_p10 = pnand %p7820_p9, %p8756_p13 }
 0x948   : > { %p7822_p11 = pneg %p7821_p10 }
 0x94a   : > { %p7827_p4 = pnand %p7825_p3, %p7822_p11 }
 0x94c   : > { %7830 = shalt.err (!%p7827_p4)
}
 0x94d   : > { %p8757_p7 = pmov %p8755_p8  ;;  %s7160_s27 = sshll.u32 %s8080_s25, 5 }
 0x94e   : > { %s7991_s5 = smov [#allocation21]   ;;  %s8605_s15 = scalar_lea.hbm %s8710_s12, %s7160_s27 }
 0x94f   : > { %7229 = dma.vmem_to_hbm [thread:$0]  (%p8757_p7), %s6246_s29, 64, %s8708_s10, [#allocation20]  }
 0x950   : > { %s6256_s1 = sshll.u32 %s7991_s5, 4  ;;  %p8758_p12 = pmov %p8757_p7  ;;  %s6257_s1 = int_to_ptr.vmem [resolvable:$true] %s6256_s1 }
 0x951   : > { %s7831_s18 = scalar_lea.vmem %s6257_s1, 64  ;;  %p7838_p1 = scmp.lt.s32.totalorder %s6257_s1, %s6257_s1 }
 0x952   : > { %p7832_p8 = scmp.ne.s32.totalorder %s6257_s1, %s7831_s18  ;;  %p7839_p6 = scmp.lt.s32.totalorder %s7831_s18, %s7831_s18 }
 0x954   : > { %p7833_p2 = pnand %p7832_p8, %p8758_p12  ;;  %p7840_p5 = por %p7839_p6, %p7838_p1 }
 0x956   : > { %p7834_p0 = pneg %p7833_p2 }
 0x958   : > { %p7841_p9 = pnand %p7840_p5, %p7834_p0 }
 0x95a   : > { %7844 = shalt.err (!%p7841_p9)
}
 0x95b   : > { %s7845_s19 = scalar_lea.hbm %s8709_s11, 64  ;;  %p8759_p10 = pmov %p8757_p7 }
 0x95c   : > { %p7846_p13 = scmp.ne.s32.totalorder %s8709_s11, %s7845_s19  ;;  %p7851_p4 = scmp.lt.u32.totalorder %s7845_s19, %s8709_s11 }
 0x95e   : > { %p7847_p11 = pnand %p7846_p13, %p8759_p10 }
 0x960   : > { %p7848_p3 = pneg %p7847_p11 }
 0x962   : > { %p7853_p7 = pnand %p7851_p4, %p7848_p3 }
 0x964   : > { %7856 = shalt.err (!%p7853_p7)
}
 0x965   : > { %p8760_p8 = pmov %p8759_p10  ;;  %s8761_s5 = sld [smem:[#allocation36_spill]] }
 0x966   : > { %s6269_s30 = sshll.u32 %s8302_s28, 4  ;;  %s6221_s17 = scalar_lea.sflag [#allocation23], %s8290_s14  ;;  %s6270_s30 = int_to_ptr.vmem [resolvable:$true] %s6269_s30 }
 0x967   : > { %7231 = dma.vmem_to_hbm [thread:$0]  (%p8760_p8), %s6257_s1, 64, %s8709_s11, [#allocation20]  }
 0x968   : > { %s7857_s18 = scalar_lea.vmem %s6270_s30, 32  ;;  %s7992_s29 = smov [#allocation22]  }
 0x969   : > { %p7858_p12 = scmp.ne.s32.totalorder %s6270_s30, %s7857_s18  ;;  %s7861_s16 = sshll.u32 %s7992_s29, 4  ;;  %s7862_s16 = int_to_ptr.vmem [resolvable:$false] %s7861_s16 }
 0x96a   : > { %s7863_s19 = scalar_lea.vmem %s7862_s16, 64  ;;  %p7864_p6 = scmp.lt.s32.totalorder %s6270_s30, %s7862_s16 }
 0x96b   : > { %p8762_p2 = scmp.ne.s32.totalorder %s8761_s5, 0  ;;  %p7865_p5 = scmp.lt.s32.totalorder %s7863_s19, %s7857_s18 }
 0x96d   : > { %p7859_p0 = pnand %p7858_p12, %p8762_p2  ;;  %p7866_p9 = por %p7865_p5, %p7864_p6 }
 0x96f   : > { %p7860_p1 = pneg %p7859_p0 }
 0x971   : > { %p7867_p13 = pnand %p7866_p9, %p7860_p1 }
 0x973   : > { %7870 = shalt.err (!%p7867_p13)
}
 0x974   : > { %s7871_s28 = scalar_lea.hbm %s8605_s15, 32  ;;  %s7875_s21 = scalar_lea.hbm %s8710_s12, 256 }
 0x975   : > { %p7872_p10 = scmp.ne.s32.totalorder %s8605_s15, %s7871_s28  ;;  %p7876_p4 = scmp.lt.u32.totalorder %s8605_s15, %s8710_s12 }
 0x976   : > { %p7877_p7 = scmp.lt.u32.totalorder %s7875_s21, %s7871_s28  ;;  %p7879_p12 = scmp.lt.u32.totalorder %s7871_s28, %s8605_s15 }
 0x977   : > { %p7873_p11 = pnand %p7872_p10, %p8762_p2 }
 0x978   : > { %p7878_p8 = por %p7877_p7, %p7876_p4 }
 0x979   : > { %p7874_p3 = pneg %p7873_p11 }
 0x97a   : > { %p7880_p0 = por %p7879_p12, %p7878_p8 }
 0x97c   : > { %p7881_p1 = pnand %p7880_p0, %p7874_p3 }
 0x97e   : > { %7884 = shalt.err (!%p7881_p1)
}
 0x97f   : > { %7232 = dma.vmem_to_hbm [thread:$0]  (%p8762_p2), %s6270_s30, 32, %s8605_s15, %s6221_s17   ;;  %v7141_v20 = vld [vmem:[#allocation17 + $0xc] ss:$0 sm:$0xff] }
 0x980   : > { %s6234_s24 = sshll.u32 %s8300_s23, 4  ;;  %s8763_s29 = sld [smem:[#allocation40_spill]]  ;;  %s8652_s24 = int_to_ptr.vmem [resolvable:$true] %s6234_s24 }
 0x981   : > { %s6216_s15 = scalar_lea.sflag [#allocation8], %s8290_s14  ;;  %s7885_s30 = scalar_lea.vmem %s8652_s24, 32 }
 0x982   : > { %p7886_p6 = scmp.ne.s32.totalorder %s8652_s24, %s7885_s30  ;;  %s7993_s17 = smov [#allocation18]  }
 0x983   : > { %s7889_s19 = sshll.u32 %s7993_s17, 4  ;;  %s7890_s19 = int_to_ptr.vmem [resolvable:$false] %s7889_s19 }
 0x984   : > { %p7887_p5 = pnand %p7886_p6, %p8762_p2  ;;  %s7891_s28 = scalar_lea.vmem %s7890_s19, 64 }
 0x985   : > { %p7892_p13 = scmp.lt.s32.totalorder %s8652_s24, %s7890_s19  ;;  %p7893_p10 = scmp.lt.s32.totalorder %s7891_s28, %s7885_s30 }
 0x986   : > { %s8650_s16 = scalar_lea.hbm %s8763_s29, %s7160_s27  ;;  %p7888_p9 = pneg %p7887_p5 }
 0x987   : > { %p7894_p11 = por %p7893_p10, %p7892_p13 }
 0x989   : > { %p7895_p3 = pnand %p7894_p11, %p7888_p9 }
 0xa14   : > { %v7185_v10 = vpop.f32.mrb[32].mxu1 }
 0xa15   : > { %v7186_v36 = vpop.f32.mrb[33].mxu1 }
 0xa16   : > { %v7187_v21 = vadd.f32 %v7186_v36, %v7185_v10  ;;  %v7188_v15 = vpop.f32.mrb[34].mxu1 }
 0xa17   : > { %v7189_v1 = vpop.f32.mrb[35].mxu1 }
 0xa18   : > { %v6209_v23 = vadd.f32 %v7187_v21, %v7141_v20 }
 0xa1a   : > { %6214 = vst [vmem:[%s8300_s23] sm:$0x3] %v6209_v23 }
 0xa1b   : > { %7898 = shalt.err (!%p7895_p3)
}
 0xa1c   : > { %s7899_s14 = scalar_lea.hbm %s8650_s16, 32  ;;  %s7903_s1 = scalar_lea.hbm %s8763_s29, 256 }
 0xa1d   : > { %p7900_p4 = scmp.ne.s32.totalorder %s8650_s16, %s7899_s14  ;;  %p7904_p12 = scmp.lt.u32.totalorder %s8650_s16, %s8763_s29 }
 0xa1e   : > { %p7905_p0 = scmp.lt.u32.totalorder %s7903_s1, %s7899_s14  ;;  %p7907_p6 = scmp.lt.u32.totalorder %s7899_s14, %s8650_s16 }
 0xa1f   : > { %p7901_p7 = pnand %p7900_p4, %p8762_p2 }
 0xa20   : > { %p7906_p1 = por %p7905_p0, %p7904_p12 }
 0xa21   : > { %p7902_p8 = pneg %p7901_p7 }
 0xa22   : > { %p7908_p5 = por %p7907_p6, %p7906_p1 }
 0xa24   : > { %p7909_p9 = pnand %p7908_p5, %p7902_p8 }
 0xa26   : > { %7912 = shalt.err (!%p7909_p9)
}
 0xa27   : > { %7227 = dma.vmem_to_hbm [thread:$0]  (%p8762_p2), %s8652_s24, 32, %s8650_s16, %s6216_s15  }
 0xa28   : > { %p8764_p13 = scmp.eq.s32.totalorder %s8080_s25, 7 }
 0xa2a   : > { %7946 = dma.done.wait (%p8764_p13), [#allocation20], 128   ;;  %p8765_p10 = pmov %p8764_p13 }
 0xa2c   : > { %7948 = vsyncadd (%p8765_p10), [#allocation20], 4294967168 }
 0xa2d PF: > { %s8766_s9 = sld [smem:[#allocation33_spill]]  ;;  %s8767_s13 = sld [smem:[#allocation31_spill]] }
 0xa2e   : > { %s8768_s20 = sld [smem:[#allocation37_spill]] }
 0xa33   : > { %p7286_p11 = scmp.ge.s32.totalorder %s8766_s9, 2  ;;  %s6289_s18 = sand.u32 1, %s8767_s13  }
 0xa34   : > { %p8769_p3 = scmp.ne.s32.totalorder %s8768_s20, 0  ;;  %s6290_s30 = scalar_lea.sflag [#allocation8], %s6289_s18 }
 0xa36   : > { %p7262_p4 = pnand %p7286_p11, %p8769_p3 }
 0xa38   : > { %7950 = dma.done.wait (!%p7262_p4), %s6290_s30, 32  }
 0xa39   : > { %7952 = vsyncadd (!%p7262_p4), %s6290_s30, 4294967264  ;;  %s6299_s5 = scalar_lea.sflag [#allocation23], %s6289_s18 }
 0xa3a   : > { %7954 = dma.done.wait (!%p7262_p4), %s6299_s5, 32  }
 0xa3b   : > { %7956 = vsyncadd (!%p7262_p4), %s6299_s5, 4294967264  ;;  %s8770_s24 = sld [smem:[#allocation34_spill]]  ;;  %s8771_s16 = sld [smem:[#allocation32_spill]] }
 0xa3c   : > { %s8772_s23 = sld [smem:[#allocation35_spill]]  ;;  %s8773_s21 = smov %s7963_s22 }
 0xa41   : > { %p31_p2 = scmp.ge.s32.totalorder %s8770_s24, 10   ;;  %s8774_s22 = smov %s8771_s16 }
 0xa43   :  { %33 = sbr.rel (!%p31_p2) target bundleno = 14 (0xe), region = 157 }
 0xa4a   :  { %6304 = vsyncpa [#allocation7], 1 }
 0xa4b   :  { %6306 = vsyncpa [#allocation7 + $0x1], 1 }
 0xa4c   :  { %6307 = vsyncpa [#allocation10], 1 }
 0xa4d   :  { %6308 = vsyncpa [#allocation13], 1 }
 0xa4e   :  { %6309 = vsyncpa [#allocation16], 1 }
 0xa4f   :  { %6310 = vsyncpa [#allocation8], 1 }
 0xa50   :  { %6312 = vsyncpa [#allocation8 + $0x1], 1 }
 0xa51   :  { %6313 = vsyncpa [#allocation20], 1 }
 0xa52   :  { %6314 = vsyncpa [#allocation23], 1 }
 0xa53   :  { %6316 = vsyncpa [#allocation23 + $0x1], 1 }

</bundles_post_ra>
